<compile_context>
chip_gen: v7x
topology: tpu7x:2x2x1
jax: 0.10.0
libtpu: 0.0.40
codegen_flags: <defaults>
</compile_context>

<pallas_src>
import functools

import jax
import jax.numpy as jnp
from jax import lax
from jax.experimental import pallas as pl
from jax.experimental.pallas import tpu as pltpu

LEAKY_SLOPE = 0.1  # matches F.leaky_relu(..., 0.1) in the PyTorch module
HALO = 2           # rows of halo needed for two stacked 3x3 convs


# ----------------------------------------------------------------------------
# Fused kernel: CFM0 + conv0 + relu + CFM1 + conv1 + residual.
# One grid step = one (TH, W) row tile of one image.  The 2-row halo inputs
# supply the extra rows the two stacked 3x3 convs need; rows outside the image
# are zeroed in-kernel (this implements the convs' zero padding).
# ----------------------------------------------------------------------------
def _resblock_cfm_kernel(fea_ref, ftop_ref, fbot_ref,
                         cond_ref, ctop_ref, cbot_ref,
                         w0a_ref, b0a_ref, w1a_ref, b1a_ref, wc0_ref, bc0_ref,
                         w0b_ref, b0b_ref, w1b_ref, b1b_ref, wc1_ref, bc1_ref,
                         out_ref, *, TH, W, H):
    h_idx = pl.program_id(1)
    h0 = h_idx * TH
    CF = fea_ref.shape[-1]

    # ---- assemble (TH+4, W, C) haloed tiles (image rows h0-2 .. h0+TH+1) ----
    ff = jnp.concatenate([ftop_ref[0], fea_ref[0], fbot_ref[0]],
                         axis=0).astype(jnp.float32)          # (TH+4, W, CF)
    cc = jnp.concatenate([ctop_ref[0], cond_ref[0], cbot_ref[0]],
                         axis=0).astype(jnp.float32)          # (TH+4, W, CC)

    def cfm(feat, condt, w0, b0, w1, b1):
        # packed scale|shift branches in two matmuls; "+1" folded into b1.
        z = lax.dot_general(condt, w0, (((2,), (0,)), ((), ())),
                            preferred_element_type=jnp.float32) + b0
        z = jnp.where(z >= 0, z, LEAKY_SLOPE * z)             # leaky_relu(0.1)
        s = lax.dot_general(z, w1, (((2,), (0,)), ((), ())),
                            preferred_element_type=jnp.float32) + b1
        return feat * s[..., :CF] + s[..., CF:]

    def row_mask(x, first_img_row):
        # zero rows outside the image: conv zero-pad + tail-tile overreads.
        r = lax.broadcasted_iota(jnp.int32, (x.shape[0], 1, 1), 0)
        img = first_img_row + r
        return jnp.where((img >= 0) & (img < H), x, 0.0)

    def conv3x3(g, wc, bc, rows_out):
        # g: (rows_out+2, W, CF), already row-masked.  Zero-pad columns and do
        # the 3x3 conv as 9 shifted MXU matmuls.
        zcol = jnp.zeros((rows_out + 2, 1, CF), jnp.float32)
        gp = jnp.concatenate([zcol, g, zcol], axis=1)         # (ro+2, W+2, CF)
        acc = jnp.zeros((rows_out, W, CF), jnp.float32)
        for ky in range(3):
            for kx in range(3):
                acc = acc + lax.dot_general(
                    gp[ky:ky + rows_out, kx:kx + W, :],
                    wc[ky, kx].astype(jnp.float32),
                    (((2,), (0,)), ((), ())),
                    preferred_element_type=jnp.float32)
        return acc + bc

    # ---- layer 0: fea = relu(conv0(CFM0(fea0, cond))) on rows [h0-1, h0+TH] -
    g0 = cfm(ff, cc, w0a_ref[...], b0a_ref[...], w1a_ref[...], b1a_ref[...])
    g0 = row_mask(g0, h0 - 2)
    fea_t = jnp.maximum(conv3x3(g0, wc0_ref, bc0_ref[...], TH + 2), 0.0)

    # ---- layer 1: out = fea0 + conv1(CFM1(fea, cond)) on rows [h0, h0+TH) ---
    g1 = cfm(fea_t, cc[1:TH + 3],
             w0b_ref[...], b0b_ref[...], w1b_ref[...], b1b_ref[...])
    g1 = row_mask(g1, h0 - 1)
    out = conv3x3(g1, wc1_ref, bc1_ref[...], TH)
    out = out + ff[2:TH + 2]                                  # fused residual

    out_ref[0] = out.astype(out_ref.dtype)


def _halo_rows(x, TH, nH, halo):
    """top[n, h*halo + j] = x[n, h*TH - halo + j] (clamped; out-of-image rows
    are zeroed inside the kernel), bot analogously below the tile."""
    N, H, W, C = x.shape
    hs = jnp.arange(nH)[:, None]
    off = jnp.arange(halo)[None, :]
    top_idx = jnp.clip(hs * TH - halo + off, 0, H - 1)        # (nH, halo)
    bot_idx = jnp.clip(hs * TH + TH + off, 0, H - 1)
    top = x[:, top_idx].reshape(N, nH * halo, W, C)
    bot = x[:, bot_idx].reshape(N, nH * halo, W, C)
    return top, bot


def resblock_cfm_fused(fea0, cond, pp, *, tile_h=None):
    """Whole ResBlock_CFM forward over NHWC tensors in one pallas_call."""
    N, H, W, CF = fea0.shape
    CC = cond.shape[-1]
    TH = min(H, 64 if tile_h is None else tile_h)
    nH = -(-H // TH)                                          # cdiv

    f_top, f_bot = _halo_rows(fea0, TH, nH, HALO)
    c_top, c_bot = _halo_rows(cond, TH, nH, HALO)

    kernel = functools.partial(_resblock_cfm_kernel, TH=TH, W=W, H=H)

    tile = lambda shape: pl.BlockSpec(shape, lambda n, h: (n, h, 0, 0))
    rep2 = lambda shape: pl.BlockSpec(shape, lambda n, h: (0, 0))
    rep4 = lambda shape: pl.BlockSpec(shape, lambda n, h: (0, 0, 0, 0))

    in_specs = [
        tile((1, TH, W, CF)), tile((1, HALO, W, CF)), tile((1, HALO, W, CF)),
        tile((1, TH, W, CC)), tile((1, HALO, W, CC)), tile((1, HALO, W, CC)),
        # CFM0 packed + conv0
        rep2((CC, 2 * CC)), rep2((1, 2 * CC)),
        rep2((2 * CC, 2 * CF)), rep2((1, 2 * CF)),
        rep4((3, 3, CF, CF)), rep2((1, CF)),
        # CFM1 packed + conv1
        rep2((CC, 2 * CC)), rep2((1, 2 * CC)),
        rep2((2 * CC, 2 * CF)), rep2((1, 2 * CF)),
        rep4((3, 3, CF, CF)), rep2((1, CF)),
    ]
    args = [fea0, f_top, f_bot, cond, c_top, c_bot,
            pp["cfm0"]["w0"], pp["cfm0"]["b0"], pp["cfm0"]["w1"], pp["cfm0"]["b1"],
            pp["conv0_w"], pp["conv0_b"],
            pp["cfm1"]["w0"], pp["cfm1"]["b0"], pp["cfm1"]["w1"], pp["cfm1"]["b1"],
            pp["conv1_w"], pp["conv1_b"]]

    return pl.pallas_call(
        kernel,
        out_shape=jax.ShapeDtypeStruct((N, H, W, CF), jnp.float32),
        grid=(N, nH),
        in_specs=in_specs,
        out_specs=tile((1, TH, W, CF)),
        compiler_params=pltpu.CompilerParams(
            dimension_semantics=("parallel", "parallel"),
            vmem_limit_bytes=48 * 1024 * 1024),
    )(*args)


# ----------------------------------------------------------------------------
# Parameters: deterministic init (unpacked, PyTorch-like) + packing for kernel.
# ----------------------------------------------------------------------------
def init_params(key):
    keys = iter(jax.random.split(key, 20))

    def w(shape, fan_in):
        bound = 1.0 / (fan_in ** 0.5)
        return jax.random.uniform(next(keys), shape, jnp.float32, -bound, bound)

    def cfm():
        return {
            "scale_w0": w((32, 32), 32), "scale_b0": w((1, 32), 32),
            "scale_w1": w((32, 64), 32), "scale_b1": w((1, 64), 32),
            "shift_w0": w((32, 32), 32), "shift_b0": w((1, 32), 32),
            "shift_w1": w((32, 64), 32), "shift_b1": w((1, 64), 32),
        }

    return {
        "cfm0": cfm(),
        "conv0_w": w((3, 3, 64, 64), 64 * 9), "conv0_b": w((1, 64), 64 * 9),
        "cfm1": cfm(),
        "conv1_w": w((3, 3, 64, 64), 64 * 9), "conv1_b": w((1, 64), 64 * 9),
    }


def _pack_cfm(p):
    cc = p["scale_w0"].shape[0]
    cf = p["scale_w1"].shape[1]
    w1 = jnp.zeros((2 * cc, 2 * cf), jnp.float32)
    w1 = w1.at[:cc, :cf].set(p["scale_w1"])
    w1 = w1.at[cc:, cf:].set(p["shift_w1"])
    return {
        "w0": jnp.concatenate([p["scale_w0"], p["shift_w0"]], axis=1),
        "b0": jnp.concatenate([p["scale_b0"], p["shift_b0"]], axis=1),
        "w1": w1,
        "b1": jnp.concatenate([p["scale_b1"] + 1.0, p["shift_b1"]], axis=1),
    }


def pack_params(p):
    return {
        "cfm0": _pack_cfm(p["cfm0"]), "cfm1": _pack_cfm(p["cfm1"]),
        "conv0_w": p["conv0_w"], "conv0_b": p["conv0_b"],
        "conv1_w": p["conv1_w"], "conv1_b": p["conv1_b"],
    }


# ----------------------------------------------------------------------------
# Full ResBlock_CFM forward (NCHW in / NCHW out, like the PyTorch module).
# ----------------------------------------------------------------------------
def resblock_cfm(fea0_nchw, cond_nchw, pp, *, tile_h=None):
    fea0 = jnp.transpose(fea0_nchw, (0, 2, 3, 1))   # NHWC
    cond = jnp.transpose(cond_nchw, (0, 2, 3, 1))
    out = resblock_cfm_fused(fea0, cond, pp, tile_h=tile_h)
    # TODO(synk): the NCHW<->NHWC transposes are kept only for interface parity
    # with the PyTorch module; drop them if the surrounding model is NHWC.
    return jnp.transpose(out, (0, 3, 1, 2)), cond_nchw


# ----------------------------------------------------------------------------
# Pure-JAX reference (uses the unpacked parameters; correctness check only).
# ----------------------------------------------------------------------------
def _ref_cfm(fea, cond, p):
    z = cond @ p["scale_w0"] + p["scale_b0"][0]
    z = jnp.where(z >= 0, z, LEAKY_SLOPE * z)
    scale = z @ p["scale_w1"] + p["scale_b1"][0]
    z = cond @ p["shift_w0"] + p["shift_b0"][0]
    z = jnp.where(z >= 0, z, LEAKY_SLOPE * z)
    shift = z @ p["shift_w1"] + p["shift_b1"][0]
    return fea * (scale + 1.0) + shift


def _ref_conv(x, w, b, relu):
    y = lax.conv_general_dilated(x, w, (1, 1), "SAME",
                                 dimension_numbers=("NHWC", "HWIO", "NHWC")) + b[0]
    return jnp.maximum(y, 0.0) if relu else y


def ref_forward(fea0_nchw, cond_nchw, p):
    fea0 = jnp.transpose(fea0_nchw, (0, 2, 3, 1))
    cond = jnp.transpose(cond_nchw, (0, 2, 3, 1))
    fea = _ref_cfm(fea0, cond, p["cfm0"])
    fea = _ref_conv(fea, p["conv0_w"], p["conv0_b"], True)
    fea = _ref_cfm(fea, cond, p["cfm1"])
    fea = _ref_conv(fea, p["conv1_w"], p["conv1_b"], False)
    out = fea0 + fea
    return jnp.transpose(out, (0, 3, 1, 2)), cond_nchw


if __name__ == "__main__":
    key = jax.random.PRNGKey(0)
    kp, k0, k1 = jax.random.split(key, 3)
    params = init_params(kp)
    packed = pack_params(params)

    N, H, W = 2, 16, 16
    fea0 = jax.random.normal(k0, (N, 64, H, W), jnp.float32)
    cond = jax.random.normal(k1, (N, 32, H, W), jnp.float32)

    # tile_h=8 -> 2 row tiles per image, exercising the halo / tiling path.
    fwd = jax.jit(functools.partial(resblock_cfm, tile_h=8))
    out0, out1 = fwd(fea0, cond, packed)
    jax.block_until_ready((out0, out1))

    ref0, ref1 = ref_forward(fea0, cond, params)
    assert out0.shape == (N, 64, H, W) and out1.shape == (N, 32, H, W)
    assert jnp.allclose(out0, ref0, atol=2e-4, rtol=2e-4)
    assert jnp.allclose(out1, ref1)

    print("KERNEL_OK")
</pallas_src>

<mosaic_0001>
module attributes {stable_mosaic.version = 11 : i64} {
  func.func @_resblock_cfm_kernel(%arg0: i32, %arg1: i32, %arg2: memref<1x8x16x64xf32, #tpu.memory_space<vmem>>, %arg3: memref<1x2x16x64xf32, #tpu.memory_space<vmem>>, %arg4: memref<1x2x16x64xf32, #tpu.memory_space<vmem>>, %arg5: memref<1x8x16x32xf32, #tpu.memory_space<vmem>>, %arg6: memref<1x2x16x32xf32, #tpu.memory_space<vmem>>, %arg7: memref<1x2x16x32xf32, #tpu.memory_space<vmem>>, %arg8: memref<32x64xf32, #tpu.memory_space<vmem>>, %arg9: memref<1x64xf32, #tpu.memory_space<vmem>>, %arg10: memref<64x128xf32, #tpu.memory_space<vmem>>, %arg11: memref<1x128xf32, #tpu.memory_space<vmem>>, %arg12: memref<3x3x64x64xf32, #tpu.memory_space<vmem>>, %arg13: memref<1x64xf32, #tpu.memory_space<vmem>>, %arg14: memref<32x64xf32, #tpu.memory_space<vmem>>, %arg15: memref<1x64xf32, #tpu.memory_space<vmem>>, %arg16: memref<64x128xf32, #tpu.memory_space<vmem>>, %arg17: memref<1x128xf32, #tpu.memory_space<vmem>>, %arg18: memref<3x3x64x64xf32, #tpu.memory_space<vmem>>, %arg19: memref<1x64xf32, #tpu.memory_space<vmem>>, %arg20: memref<1x8x16x64xf32, #tpu.memory_space<vmem>>) attributes {dimension_semantics = [#tpu.dimension_semantics<parallel>, #tpu.dimension_semantics<parallel>], iteration_bounds = array<i64: 2, 2>, scalar_prefetch = 0 : i64, scratch_operands = 0 : i64, tpu.core_type = #tpu.core_type<tc>, window_params = [{transform_indices = @transform_0, window_bounds = array<i64: 1, 8, 16, 64>}, {transform_indices = @transform_1, window_bounds = array<i64: 1, 2, 16, 64>}, {transform_indices = @transform_2, window_bounds = array<i64: 1, 2, 16, 64>}, {transform_indices = @transform_3, window_bounds = array<i64: 1, 8, 16, 32>}, {transform_indices = @transform_4, window_bounds = array<i64: 1, 2, 16, 32>}, {transform_indices = @transform_5, window_bounds = array<i64: 1, 2, 16, 32>}, {pipeline_mode = #tpu.pipeline_mode<synchronous>, transform_indices = @transform_6, window_bounds = array<i64: 32, 64>}, {pipeline_mode = #tpu.pipeline_mode<synchronous>, transform_indices = @transform_7, window_bounds = array<i64: 1, 64>}, {pipeline_mode = #tpu.pipeline_mode<synchronous>, transform_indices = @transform_8, window_bounds = array<i64: 64, 128>}, {pipeline_mode = #tpu.pipeline_mode<synchronous>, transform_indices = @transform_9, window_bounds = array<i64: 1, 128>}, {pipeline_mode = #tpu.pipeline_mode<synchronous>, transform_indices = @transform_10, window_bounds = array<i64: 3, 3, 64, 64>}, {pipeline_mode = #tpu.pipeline_mode<synchronous>, transform_indices = @transform_11, window_bounds = array<i64: 1, 64>}, {pipeline_mode = #tpu.pipeline_mode<synchronous>, transform_indices = @transform_12, window_bounds = array<i64: 32, 64>}, {pipeline_mode = #tpu.pipeline_mode<synchronous>, transform_indices = @transform_13, window_bounds = array<i64: 1, 64>}, {pipeline_mode = #tpu.pipeline_mode<synchronous>, transform_indices = @transform_14, window_bounds = array<i64: 64, 128>}, {pipeline_mode = #tpu.pipeline_mode<synchronous>, transform_indices = @transform_15, window_bounds = array<i64: 1, 128>}, {pipeline_mode = #tpu.pipeline_mode<synchronous>, transform_indices = @transform_16, window_bounds = array<i64: 3, 3, 64, 64>}, {pipeline_mode = #tpu.pipeline_mode<synchronous>, transform_indices = @transform_17, window_bounds = array<i64: 1, 64>}, {transform_indices = @transform_18, window_bounds = array<i64: 1, 8, 16, 64>}]} {
    %c8_i32 = arith.constant 8 : i32
    %0 = arith.muli %arg1, %c8_i32 : i32
    %c0 = arith.constant 0 : index
    %c0_0 = arith.constant 0 : index
    %c0_1 = arith.constant 0 : index
    %c0_2 = arith.constant 0 : index
    %1 = vector.load %arg3[%c0, %c0_0, %c0_1, %c0_2] : memref<1x2x16x64xf32, #tpu.memory_space<vmem>>, vector<1x2x16x64xf32>
    %2 = vector.shape_cast %1 : vector<1x2x16x64xf32> to vector<2x16x64xf32>
    %c0_3 = arith.constant 0 : index
    %c0_4 = arith.constant 0 : index
    %c0_5 = arith.constant 0 : index
    %c0_6 = arith.constant 0 : index
    %3 = vector.load %arg2[%c0_3, %c0_4, %c0_5, %c0_6] : memref<1x8x16x64xf32, #tpu.memory_space<vmem>>, vector<1x8x16x64xf32>
    %4 = vector.shape_cast %3 : vector<1x8x16x64xf32> to vector<8x16x64xf32>
    %c0_7 = arith.constant 0 : index
    %c0_8 = arith.constant 0 : index
    %c0_9 = arith.constant 0 : index
    %c0_10 = arith.constant 0 : index
    %5 = vector.load %arg4[%c0_7, %c0_8, %c0_9, %c0_10] : memref<1x2x16x64xf32, #tpu.memory_space<vmem>>, vector<1x2x16x64xf32>
    %6 = vector.shape_cast %5 : vector<1x2x16x64xf32> to vector<2x16x64xf32>
    %7 = tpu.concatenate %2, %4, %6 in 0 : vector<2x16x64xf32>, vector<8x16x64xf32>, vector<2x16x64xf32> -> vector<12x16x64xf32>
    %c0_11 = arith.constant 0 : index
    %c0_12 = arith.constant 0 : index
    %c0_13 = arith.constant 0 : index
    %c0_14 = arith.constant 0 : index
    %8 = vector.load %arg6[%c0_11, %c0_12, %c0_13, %c0_14] : memref<1x2x16x32xf32, #tpu.memory_space<vmem>>, vector<1x2x16x32xf32>
    %9 = vector.shape_cast %8 : vector<1x2x16x32xf32> to vector<2x16x32xf32>
    %c0_15 = arith.constant 0 : index
    %c0_16 = arith.constant 0 : index
    %c0_17 = arith.constant 0 : index
    %c0_18 = arith.constant 0 : index
    %10 = vector.load %arg5[%c0_15, %c0_16, %c0_17, %c0_18] : memref<1x8x16x32xf32, #tpu.memory_space<vmem>>, vector<1x8x16x32xf32>
    %11 = vector.shape_cast %10 : vector<1x8x16x32xf32> to vector<8x16x32xf32>
    %c0_19 = arith.constant 0 : index
    %c0_20 = arith.constant 0 : index
    %c0_21 = arith.constant 0 : index
    %c0_22 = arith.constant 0 : index
    %12 = vector.load %arg7[%c0_19, %c0_20, %c0_21, %c0_22] : memref<1x2x16x32xf32, #tpu.memory_space<vmem>>, vector<1x2x16x32xf32>
    %13 = vector.shape_cast %12 : vector<1x2x16x32xf32> to vector<2x16x32xf32>
    %14 = tpu.concatenate %9, %11, %13 in 0 : vector<2x16x32xf32>, vector<8x16x32xf32>, vector<2x16x32xf32> -> vector<12x16x32xf32>
    %c0_23 = arith.constant 0 : index
    %c0_24 = arith.constant 0 : index
    %15 = vector.load %arg8[%c0_23, %c0_24] : memref<32x64xf32, #tpu.memory_space<vmem>>, vector<32x64xf32>
    %c0_25 = arith.constant 0 : index
    %c0_26 = arith.constant 0 : index
    %16 = vector.load %arg9[%c0_25, %c0_26] : memref<1x64xf32, #tpu.memory_space<vmem>>, vector<1x64xf32>
    %c0_27 = arith.constant 0 : index
    %c0_28 = arith.constant 0 : index
    %17 = vector.load %arg10[%c0_27, %c0_28] : memref<64x128xf32, #tpu.memory_space<vmem>>, vector<64x128xf32>
    %c0_29 = arith.constant 0 : index
    %c0_30 = arith.constant 0 : index
    %18 = vector.load %arg11[%c0_29, %c0_30] : memref<1x128xf32, #tpu.memory_space<vmem>>, vector<1x128xf32>
    %cst = arith.constant dense<0.000000e+00> : vector<12x16x64xf32>
    %19 = tpu.matmul %14, %15, %cst {dimension_numbers = #tpu.dot_dimension_numbers<[2], [0], [0, 1], [1], [0, 0, 0, 1, 1, 1], [], []>} : vector<12x16x32xf32>, vector<32x64xf32>, vector<12x16x64xf32> -> vector<12x16x64xf32>
    %20 = vector.shape_cast %16 : vector<1x64xf32> to vector<1x1x64xf32>
    %21 = vector.broadcast %20 : vector<1x1x64xf32> to vector<12x16x64xf32>
    %22 = arith.addf %19, %21 : vector<12x16x64xf32>
    %cst_31 = arith.constant 0.000000e+00 : f32
    %23 = vector.broadcast %cst_31 : f32 to vector<12x16x64xf32>
    %24 = arith.cmpf oge, %22, %23 : vector<12x16x64xf32>
    %cst_32 = arith.constant 1.000000e-01 : f32
    %25 = vector.broadcast %cst_32 : f32 to vector<12x16x64xf32>
    %26 = arith.mulf %25, %22 : vector<12x16x64xf32>
    %27 = arith.select %24, %22, %26 : vector<12x16x64xi1>, vector<12x16x64xf32>
    %cst_33 = arith.constant dense<0.000000e+00> : vector<12x16x128xf32>
    %28 = tpu.matmul %27, %17, %cst_33 {dimension_numbers = #tpu.dot_dimension_numbers<[2], [0], [0, 1], [1], [0, 0, 0, 1, 1, 1], [], []>} : vector<12x16x64xf32>, vector<64x128xf32>, vector<12x16x128xf32> -> vector<12x16x128xf32>
    %29 = vector.shape_cast %18 : vector<1x128xf32> to vector<1x1x128xf32>
    %30 = vector.broadcast %29 : vector<1x1x128xf32> to vector<12x16x128xf32>
    %31 = arith.addf %28, %30 : vector<12x16x128xf32>
    %32 = vector.extract_strided_slice %31 {offsets = [0, 0, 0], sizes = [12, 16, 64], strides = [1, 1, 1]} : vector<12x16x128xf32> to vector<12x16x64xf32>
    %33 = arith.mulf %7, %32 : vector<12x16x64xf32>
    %34 = vector.extract_strided_slice %31 {offsets = [0, 0, 64], sizes = [12, 16, 64], strides = [1, 1, 1]} : vector<12x16x128xf32> to vector<12x16x64xf32>
    %35 = arith.addf %33, %34 : vector<12x16x64xf32>
    %c2_i32 = arith.constant 2 : i32
    %36 = arith.subi %0, %c2_i32 : i32
    %37 = tpu.iota {dimensions = array<i32: 0>} : vector<12x1x1xi32>
    %38 = vector.broadcast %36 : i32 to vector<12x1x1xi32>
    %39 = arith.addi %38, %37 : vector<12x1x1xi32>
    %c0_i32 = arith.constant 0 : i32
    %40 = vector.broadcast %c0_i32 : i32 to vector<12x1x1xi32>
    %41 = arith.cmpi sge, %39, %40 : vector<12x1x1xi32>
    %c16_i32 = arith.constant 16 : i32
    %42 = vector.broadcast %c16_i32 : i32 to vector<12x1x1xi32>
    %43 = arith.cmpi slt, %39, %42 : vector<12x1x1xi32>
    %44 = arith.andi %41, %43 : vector<12x1x1xi1>
    %cst_34 = arith.constant 0.000000e+00 : f32
    %45 = vector.shape_cast %44 : vector<12x1x1xi1> to vector<12x1x1xi1>
    %46 = vector.broadcast %45 : vector<12x1x1xi1> to vector<12x16x64xi1>
    %47 = vector.broadcast %cst_34 : f32 to vector<12x16x64xf32>
    %48 = arith.select %46, %35, %47 : vector<12x16x64xi1>, vector<12x16x64xf32>
    %c0_35 = arith.constant 0 : index
    %c0_36 = arith.constant 0 : index
    %49 = vector.load %arg13[%c0_35, %c0_36] : memref<1x64xf32, #tpu.memory_space<vmem>>, vector<1x64xf32>
    %cst_37 = arith.constant 0.000000e+00 : f32
    %50 = vector.broadcast %cst_37 : f32 to vector<12x1x64xf32>
    %51 = tpu.concatenate %50, %48, %50 in 1 : vector<12x1x64xf32>, vector<12x16x64xf32>, vector<12x1x64xf32> -> vector<12x18x64xf32>
    %cst_38 = arith.constant 0.000000e+00 : f32
    %52 = vector.broadcast %cst_38 : f32 to vector<10x16x64xf32>
    %53 = vector.extract_strided_slice %51 {offsets = [0, 0, 0], sizes = [10, 16, 64], strides = [1, 1, 1]} : vector<12x18x64xf32> to vector<10x16x64xf32>
    %c0_39 = arith.constant 0 : index
    %c0_40 = arith.constant 0 : index
    %c0_41 = arith.constant 0 : index
    %c0_42 = arith.constant 0 : index
    %54 = vector.load %arg12[%c0_39, %c0_40, %c0_41, %c0_42] : memref<3x3x64x64xf32, #tpu.memory_space<vmem>>, vector<1x1x64x64xf32>
    %55 = vector.shape_cast %54 : vector<1x1x64x64xf32> to vector<64x64xf32>
    %cst_43 = arith.constant dense<0.000000e+00> : vector<10x16x64xf32>
    %56 = tpu.matmul %53, %55, %cst_43 {dimension_numbers = #tpu.dot_dimension_numbers<[2], [0], [0, 1], [1], [0, 0, 0, 1, 1, 1], [], []>} : vector<10x16x64xf32>, vector<64x64xf32>, vector<10x16x64xf32> -> vector<10x16x64xf32>
    %57 = arith.addf %52, %56 : vector<10x16x64xf32>
    %58 = vector.extract_strided_slice %51 {offsets = [0, 1, 0], sizes = [10, 16, 64], strides = [1, 1, 1]} : vector<12x18x64xf32> to vector<10x16x64xf32>
    %c0_44 = arith.constant 0 : index
    %c1 = arith.constant 1 : index
    %c0_45 = arith.constant 0 : index
    %c0_46 = arith.constant 0 : index
    %59 = vector.load %arg12[%c0_44, %c1, %c0_45, %c0_46] : memref<3x3x64x64xf32, #tpu.memory_space<vmem>>, vector<1x1x64x64xf32>
    %60 = vector.shape_cast %59 : vector<1x1x64x64xf32> to vector<64x64xf32>
    %cst_47 = arith.constant dense<0.000000e+00> : vector<10x16x64xf32>
    %61 = tpu.matmul %58, %60, %cst_47 {dimension_numbers = #tpu.dot_dimension_numbers<[2], [0], [0, 1], [1], [0, 0, 0, 1, 1, 1], [], []>} : vector<10x16x64xf32>, vector<64x64xf32>, vector<10x16x64xf32> -> vector<10x16x64xf32>
    %62 = arith.addf %57, %61 : vector<10x16x64xf32>
    %63 = vector.extract_strided_slice %51 {offsets = [0, 2, 0], sizes = [10, 16, 64], strides = [1, 1, 1]} : vector<12x18x64xf32> to vector<10x16x64xf32>
    %c0_48 = arith.constant 0 : index
    %c2 = arith.constant 2 : index
    %c0_49 = arith.constant 0 : index
    %c0_50 = arith.constant 0 : index
    %64 = vector.load %arg12[%c0_48, %c2, %c0_49, %c0_50] : memref<3x3x64x64xf32, #tpu.memory_space<vmem>>, vector<1x1x64x64xf32>
    %65 = vector.shape_cast %64 : vector<1x1x64x64xf32> to vector<64x64xf32>
    %cst_51 = arith.constant dense<0.000000e+00> : vector<10x16x64xf32>
    %66 = tpu.matmul %63, %65, %cst_51 {dimension_numbers = #tpu.dot_dimension_numbers<[2], [0], [0, 1], [1], [0, 0, 0, 1, 1, 1], [], []>} : vector<10x16x64xf32>, vector<64x64xf32>, vector<10x16x64xf32> -> vector<10x16x64xf32>
    %67 = arith.addf %62, %66 : vector<10x16x64xf32>
    %68 = vector.extract_strided_slice %51 {offsets = [1, 0, 0], sizes = [10, 16, 64], strides = [1, 1, 1]} : vector<12x18x64xf32> to vector<10x16x64xf32>
    %c1_52 = arith.constant 1 : index
    %c0_53 = arith.constant 0 : index
    %c0_54 = arith.constant 0 : index
    %c0_55 = arith.constant 0 : index
    %69 = vector.load %arg12[%c1_52, %c0_53, %c0_54, %c0_55] : memref<3x3x64x64xf32, #tpu.memory_space<vmem>>, vector<1x1x64x64xf32>
    %70 = vector.shape_cast %69 : vector<1x1x64x64xf32> to vector<64x64xf32>
    %cst_56 = arith.constant dense<0.000000e+00> : vector<10x16x64xf32>
    %71 = tpu.matmul %68, %70, %cst_56 {dimension_numbers = #tpu.dot_dimension_numbers<[2], [0], [0, 1], [1], [0, 0, 0, 1, 1, 1], [], []>} : vector<10x16x64xf32>, vector<64x64xf32>, vector<10x16x64xf32> -> vector<10x16x64xf32>
    %72 = arith.addf %67, %71 : vector<10x16x64xf32>
    %73 = vector.extract_strided_slice %51 {offsets = [1, 1, 0], sizes = [10, 16, 64], strides = [1, 1, 1]} : vector<12x18x64xf32> to vector<10x16x64xf32>
    %c1_57 = arith.constant 1 : index
    %c1_58 = arith.constant 1 : index
    %c0_59 = arith.constant 0 : index
    %c0_60 = arith.constant 0 : index
    %74 = vector.load %arg12[%c1_57, %c1_58, %c0_59, %c0_60] : memref<3x3x64x64xf32, #tpu.memory_space<vmem>>, vector<1x1x64x64xf32>
    %75 = vector.shape_cast %74 : vector<1x1x64x64xf32> to vector<64x64xf32>
    %cst_61 = arith.constant dense<0.000000e+00> : vector<10x16x64xf32>
    %76 = tpu.matmul %73, %75, %cst_61 {dimension_numbers = #tpu.dot_dimension_numbers<[2], [0], [0, 1], [1], [0, 0, 0, 1, 1, 1], [], []>} : vector<10x16x64xf32>, vector<64x64xf32>, vector<10x16x64xf32> -> vector<10x16x64xf32>
    %77 = arith.addf %72, %76 : vector<10x16x64xf32>
    %78 = vector.extract_strided_slice %51 {offsets = [1, 2, 0], sizes = [10, 16, 64], strides = [1, 1, 1]} : vector<12x18x64xf32> to vector<10x16x64xf32>
    %c1_62 = arith.constant 1 : index
    %c2_63 = arith.constant 2 : index
    %c0_64 = arith.constant 0 : index
    %c0_65 = arith.constant 0 : index
    %79 = vector.load %arg12[%c1_62, %c2_63, %c0_64, %c0_65] : memref<3x3x64x64xf32, #tpu.memory_space<vmem>>, vector<1x1x64x64xf32>
    %80 = vector.shape_cast %79 : vector<1x1x64x64xf32> to vector<64x64xf32>
    %cst_66 = arith.constant dense<0.000000e+00> : vector<10x16x64xf32>
    %81 = tpu.matmul %78, %80, %cst_66 {dimension_numbers = #tpu.dot_dimension_numbers<[2], [0], [0, 1], [1], [0, 0, 0, 1, 1, 1], [], []>} : vector<10x16x64xf32>, vector<64x64xf32>, vector<10x16x64xf32> -> vector<10x16x64xf32>
    %82 = arith.addf %77, %81 : vector<10x16x64xf32>
    %83 = vector.extract_strided_slice %51 {offsets = [2, 0, 0], sizes = [10, 16, 64], strides = [1, 1, 1]} : vector<12x18x64xf32> to vector<10x16x64xf32>
    %c2_67 = arith.constant 2 : index
    %c0_68 = arith.constant 0 : index
    %c0_69 = arith.constant 0 : index
    %c0_70 = arith.constant 0 : index
    %84 = vector.load %arg12[%c2_67, %c0_68, %c0_69, %c0_70] : memref<3x3x64x64xf32, #tpu.memory_space<vmem>>, vector<1x1x64x64xf32>
    %85 = vector.shape_cast %84 : vector<1x1x64x64xf32> to vector<64x64xf32>
    %cst_71 = arith.constant dense<0.000000e+00> : vector<10x16x64xf32>
    %86 = tpu.matmul %83, %85, %cst_71 {dimension_numbers = #tpu.dot_dimension_numbers<[2], [0], [0, 1], [1], [0, 0, 0, 1, 1, 1], [], []>} : vector<10x16x64xf32>, vector<64x64xf32>, vector<10x16x64xf32> -> vector<10x16x64xf32>
    %87 = arith.addf %82, %86 : vector<10x16x64xf32>
    %88 = vector.extract_strided_slice %51 {offsets = [2, 1, 0], sizes = [10, 16, 64], strides = [1, 1, 1]} : vector<12x18x64xf32> to vector<10x16x64xf32>
    %c2_72 = arith.constant 2 : index
    %c1_73 = arith.constant 1 : index
    %c0_74 = arith.constant 0 : index
    %c0_75 = arith.constant 0 : index
    %89 = vector.load %arg12[%c2_72, %c1_73, %c0_74, %c0_75] : memref<3x3x64x64xf32, #tpu.memory_space<vmem>>, vector<1x1x64x64xf32>
    %90 = vector.shape_cast %89 : vector<1x1x64x64xf32> to vector<64x64xf32>
    %cst_76 = arith.constant dense<0.000000e+00> : vector<10x16x64xf32>
    %91 = tpu.matmul %88, %90, %cst_76 {dimension_numbers = #tpu.dot_dimension_numbers<[2], [0], [0, 1], [1], [0, 0, 0, 1, 1, 1], [], []>} : vector<10x16x64xf32>, vector<64x64xf32>, vector<10x16x64xf32> -> vector<10x16x64xf32>
    %92 = arith.addf %87, %91 : vector<10x16x64xf32>
    %93 = vector.extract_strided_slice %51 {offsets = [2, 2, 0], sizes = [10, 16, 64], strides = [1, 1, 1]} : vector<12x18x64xf32> to vector<10x16x64xf32>
    %c2_77 = arith.constant 2 : index
    %c2_78 = arith.constant 2 : index
    %c0_79 = arith.constant 0 : index
    %c0_80 = arith.constant 0 : index
    %94 = vector.load %arg12[%c2_77, %c2_78, %c0_79, %c0_80] : memref<3x3x64x64xf32, #tpu.memory_space<vmem>>, vector<1x1x64x64xf32>
    %95 = vector.shape_cast %94 : vector<1x1x64x64xf32> to vector<64x64xf32>
    %cst_81 = arith.constant dense<0.000000e+00> : vector<10x16x64xf32>
    %96 = tpu.matmul %93, %95, %cst_81 {dimension_numbers = #tpu.dot_dimension_numbers<[2], [0], [0, 1], [1], [0, 0, 0, 1, 1, 1], [], []>} : vector<10x16x64xf32>, vector<64x64xf32>, vector<10x16x64xf32> -> vector<10x16x64xf32>
    %97 = arith.addf %92, %96 : vector<10x16x64xf32>
    %98 = vector.shape_cast %49 : vector<1x64xf32> to vector<1x1x64xf32>
    %99 = vector.broadcast %98 : vector<1x1x64xf32> to vector<10x16x64xf32>
    %100 = arith.addf %97, %99 : vector<10x16x64xf32>
    %cst_82 = arith.constant 0.000000e+00 : f32
    %101 = vector.broadcast %cst_82 : f32 to vector<10x16x64xf32>
    %102 = arith.maximumf %100, %101 : vector<10x16x64xf32>
    %103 = vector.extract_strided_slice %14 {offsets = [1, 0, 0], sizes = [10, 16, 32], strides = [1, 1, 1]} : vector<12x16x32xf32> to vector<10x16x32xf32>
    %c0_83 = arith.constant 0 : index
    %c0_84 = arith.constant 0 : index
    %104 = vector.load %arg14[%c0_83, %c0_84] : memref<32x64xf32, #tpu.memory_space<vmem>>, vector<32x64xf32>
    %c0_85 = arith.constant 0 : index
    %c0_86 = arith.constant 0 : index
    %105 = vector.load %arg15[%c0_85, %c0_86] : memref<1x64xf32, #tpu.memory_space<vmem>>, vector<1x64xf32>
    %c0_87 = arith.constant 0 : index
    %c0_88 = arith.constant 0 : index
    %106 = vector.load %arg16[%c0_87, %c0_88] : memref<64x128xf32, #tpu.memory_space<vmem>>, vector<64x128xf32>
    %c0_89 = arith.constant 0 : index
    %c0_90 = arith.constant 0 : index
    %107 = vector.load %arg17[%c0_89, %c0_90] : memref<1x128xf32, #tpu.memory_space<vmem>>, vector<1x128xf32>
    %cst_91 = arith.constant dense<0.000000e+00> : vector<10x16x64xf32>
    %108 = tpu.matmul %103, %104, %cst_91 {dimension_numbers = #tpu.dot_dimension_numbers<[2], [0], [0, 1], [1], [0, 0, 0, 1, 1, 1], [], []>} : vector<10x16x32xf32>, vector<32x64xf32>, vector<10x16x64xf32> -> vector<10x16x64xf32>
    %109 = vector.shape_cast %105 : vector<1x64xf32> to vector<1x1x64xf32>
    %110 = vector.broadcast %109 : vector<1x1x64xf32> to vector<10x16x64xf32>
    %111 = arith.addf %108, %110 : vector<10x16x64xf32>
    %cst_92 = arith.constant 0.000000e+00 : f32
    %112 = vector.broadcast %cst_92 : f32 to vector<10x16x64xf32>
    %113 = arith.cmpf oge, %111, %112 : vector<10x16x64xf32>
    %cst_93 = arith.constant 1.000000e-01 : f32
    %114 = vector.broadcast %cst_93 : f32 to vector<10x16x64xf32>
    %115 = arith.mulf %114, %111 : vector<10x16x64xf32>
    %116 = arith.select %113, %111, %115 : vector<10x16x64xi1>, vector<10x16x64xf32>
    %cst_94 = arith.constant dense<0.000000e+00> : vector<10x16x128xf32>
    %117 = tpu.matmul %116, %106, %cst_94 {dimension_numbers = #tpu.dot_dimension_numbers<[2], [0], [0, 1], [1], [0, 0, 0, 1, 1, 1], [], []>} : vector<10x16x64xf32>, vector<64x128xf32>, vector<10x16x128xf32> -> vector<10x16x128xf32>
    %118 = vector.shape_cast %107 : vector<1x128xf32> to vector<1x1x128xf32>
    %119 = vector.broadcast %118 : vector<1x1x128xf32> to vector<10x16x128xf32>
    %120 = arith.addf %117, %119 : vector<10x16x128xf32>
    %121 = vector.extract_strided_slice %120 {offsets = [0, 0, 0], sizes = [10, 16, 64], strides = [1, 1, 1]} : vector<10x16x128xf32> to vector<10x16x64xf32>
    %122 = arith.mulf %102, %121 : vector<10x16x64xf32>
    %123 = vector.extract_strided_slice %120 {offsets = [0, 0, 64], sizes = [10, 16, 64], strides = [1, 1, 1]} : vector<10x16x128xf32> to vector<10x16x64xf32>
    %124 = arith.addf %122, %123 : vector<10x16x64xf32>
    %c1_i32 = arith.constant 1 : i32
    %125 = arith.subi %0, %c1_i32 : i32
    %126 = tpu.iota {dimensions = array<i32: 0>} : vector<10x1x1xi32>
    %127 = vector.broadcast %125 : i32 to vector<10x1x1xi32>
    %128 = arith.addi %127, %126 : vector<10x1x1xi32>
    %c0_i32_95 = arith.constant 0 : i32
    %129 = vector.broadcast %c0_i32_95 : i32 to vector<10x1x1xi32>
    %130 = arith.cmpi sge, %128, %129 : vector<10x1x1xi32>
    %c16_i32_96 = arith.constant 16 : i32
    %131 = vector.broadcast %c16_i32_96 : i32 to vector<10x1x1xi32>
    %132 = arith.cmpi slt, %128, %131 : vector<10x1x1xi32>
    %133 = arith.andi %130, %132 : vector<10x1x1xi1>
    %cst_97 = arith.constant 0.000000e+00 : f32
    %134 = vector.shape_cast %133 : vector<10x1x1xi1> to vector<10x1x1xi1>
    %135 = vector.broadcast %134 : vector<10x1x1xi1> to vector<10x16x64xi1>
    %136 = vector.broadcast %cst_97 : f32 to vector<10x16x64xf32>
    %137 = arith.select %135, %124, %136 : vector<10x16x64xi1>, vector<10x16x64xf32>
    %c0_98 = arith.constant 0 : index
    %c0_99 = arith.constant 0 : index
    %138 = vector.load %arg19[%c0_98, %c0_99] : memref<1x64xf32, #tpu.memory_space<vmem>>, vector<1x64xf32>
    %cst_100 = arith.constant 0.000000e+00 : f32
    %139 = vector.broadcast %cst_100 : f32 to vector<10x1x64xf32>
    %140 = tpu.concatenate %139, %137, %139 in 1 : vector<10x1x64xf32>, vector<10x16x64xf32>, vector<10x1x64xf32> -> vector<10x18x64xf32>
    %cst_101 = arith.constant 0.000000e+00 : f32
    %141 = vector.broadcast %cst_101 : f32 to vector<8x16x64xf32>
    %142 = vector.extract_strided_slice %140 {offsets = [0, 0, 0], sizes = [8, 16, 64], strides = [1, 1, 1]} : vector<10x18x64xf32> to vector<8x16x64xf32>
    %c0_102 = arith.constant 0 : index
    %c0_103 = arith.constant 0 : index
    %c0_104 = arith.constant 0 : index
    %c0_105 = arith.constant 0 : index
    %143 = vector.load %arg18[%c0_102, %c0_103, %c0_104, %c0_105] : memref<3x3x64x64xf32, #tpu.memory_space<vmem>>, vector<1x1x64x64xf32>
    %144 = vector.shape_cast %143 : vector<1x1x64x64xf32> to vector<64x64xf32>
    %cst_106 = arith.constant dense<0.000000e+00> : vector<8x16x64xf32>
    %145 = tpu.matmul %142, %144, %cst_106 {dimension_numbers = #tpu.dot_dimension_numbers<[2], [0], [0, 1], [1], [0, 0, 0, 1, 1, 1], [], []>} : vector<8x16x64xf32>, vector<64x64xf32>, vector<8x16x64xf32> -> vector<8x16x64xf32>
    %146 = arith.addf %141, %145 : vector<8x16x64xf32>
    %147 = vector.extract_strided_slice %140 {offsets = [0, 1, 0], sizes = [8, 16, 64], strides = [1, 1, 1]} : vector<10x18x64xf32> to vector<8x16x64xf32>
    %c0_107 = arith.constant 0 : index
    %c1_108 = arith.constant 1 : index
    %c0_109 = arith.constant 0 : index
    %c0_110 = arith.constant 0 : index
    %148 = vector.load %arg18[%c0_107, %c1_108, %c0_109, %c0_110] : memref<3x3x64x64xf32, #tpu.memory_space<vmem>>, vector<1x1x64x64xf32>
    %149 = vector.shape_cast %148 : vector<1x1x64x64xf32> to vector<64x64xf32>
    %cst_111 = arith.constant dense<0.000000e+00> : vector<8x16x64xf32>
    %150 = tpu.matmul %147, %149, %cst_111 {dimension_numbers = #tpu.dot_dimension_numbers<[2], [0], [0, 1], [1], [0, 0, 0, 1, 1, 1], [], []>} : vector<8x16x64xf32>, vector<64x64xf32>, vector<8x16x64xf32> -> vector<8x16x64xf32>
    %151 = arith.addf %146, %150 : vector<8x16x64xf32>
    %152 = vector.extract_strided_slice %140 {offsets = [0, 2, 0], sizes = [8, 16, 64], strides = [1, 1, 1]} : vector<10x18x64xf32> to vector<8x16x64xf32>
    %c0_112 = arith.constant 0 : index
    %c2_113 = arith.constant 2 : index
    %c0_114 = arith.constant 0 : index
    %c0_115 = arith.constant 0 : index
    %153 = vector.load %arg18[%c0_112, %c2_113, %c0_114, %c0_115] : memref<3x3x64x64xf32, #tpu.memory_space<vmem>>, vector<1x1x64x64xf32>
    %154 = vector.shape_cast %153 : vector<1x1x64x64xf32> to vector<64x64xf32>
    %cst_116 = arith.constant dense<0.000000e+00> : vector<8x16x64xf32>
    %155 = tpu.matmul %152, %154, %cst_116 {dimension_numbers = #tpu.dot_dimension_numbers<[2], [0], [0, 1], [1], [0, 0, 0, 1, 1, 1], [], []>} : vector<8x16x64xf32>, vector<64x64xf32>, vector<8x16x64xf32> -> vector<8x16x64xf32>
    %156 = arith.addf %151, %155 : vector<8x16x64xf32>
    %157 = vector.extract_strided_slice %140 {offsets = [1, 0, 0], sizes = [8, 16, 64], strides = [1, 1, 1]} : vector<10x18x64xf32> to vector<8x16x64xf32>
    %c1_117 = arith.constant 1 : index
    %c0_118 = arith.constant 0 : index
    %c0_119 = arith.constant 0 : index
    %c0_120 = arith.constant 0 : index
    %158 = vector.load %arg18[%c1_117, %c0_118, %c0_119, %c0_120] : memref<3x3x64x64xf32, #tpu.memory_space<vmem>>, vector<1x1x64x64xf32>
    %159 = vector.shape_cast %158 : vector<1x1x64x64xf32> to vector<64x64xf32>
    %cst_121 = arith.constant dense<0.000000e+00> : vector<8x16x64xf32>
    %160 = tpu.matmul %157, %159, %cst_121 {dimension_numbers = #tpu.dot_dimension_numbers<[2], [0], [0, 1], [1], [0, 0, 0, 1, 1, 1], [], []>} : vector<8x16x64xf32>, vector<64x64xf32>, vector<8x16x64xf32> -> vector<8x16x64xf32>
    %161 = arith.addf %156, %160 : vector<8x16x64xf32>
    %162 = vector.extract_strided_slice %140 {offsets = [1, 1, 0], sizes = [8, 16, 64], strides = [1, 1, 1]} : vector<10x18x64xf32> to vector<8x16x64xf32>
    %c1_122 = arith.constant 1 : index
    %c1_123 = arith.constant 1 : index
    %c0_124 = arith.constant 0 : index
    %c0_125 = arith.constant 0 : index
    %163 = vector.load %arg18[%c1_122, %c1_123, %c0_124, %c0_125] : memref<3x3x64x64xf32, #tpu.memory_space<vmem>>, vector<1x1x64x64xf32>
    %164 = vector.shape_cast %163 : vector<1x1x64x64xf32> to vector<64x64xf32>
    %cst_126 = arith.constant dense<0.000000e+00> : vector<8x16x64xf32>
    %165 = tpu.matmul %162, %164, %cst_126 {dimension_numbers = #tpu.dot_dimension_numbers<[2], [0], [0, 1], [1], [0, 0, 0, 1, 1, 1], [], []>} : vector<8x16x64xf32>, vector<64x64xf32>, vector<8x16x64xf32> -> vector<8x16x64xf32>
    %166 = arith.addf %161, %165 : vector<8x16x64xf32>
    %167 = vector.extract_strided_slice %140 {offsets = [1, 2, 0], sizes = [8, 16, 64], strides = [1, 1, 1]} : vector<10x18x64xf32> to vector<8x16x64xf32>
    %c1_127 = arith.constant 1 : index
    %c2_128 = arith.constant 2 : index
    %c0_129 = arith.constant 0 : index
    %c0_130 = arith.constant 0 : index
    %168 = vector.load %arg18[%c1_127, %c2_128, %c0_129, %c0_130] : memref<3x3x64x64xf32, #tpu.memory_space<vmem>>, vector<1x1x64x64xf32>
    %169 = vector.shape_cast %168 : vector<1x1x64x64xf32> to vector<64x64xf32>
    %cst_131 = arith.constant dense<0.000000e+00> : vector<8x16x64xf32>
    %170 = tpu.matmul %167, %169, %cst_131 {dimension_numbers = #tpu.dot_dimension_numbers<[2], [0], [0, 1], [1], [0, 0, 0, 1, 1, 1], [], []>} : vector<8x16x64xf32>, vector<64x64xf32>, vector<8x16x64xf32> -> vector<8x16x64xf32>
    %171 = arith.addf %166, %170 : vector<8x16x64xf32>
    %172 = vector.extract_strided_slice %140 {offsets = [2, 0, 0], sizes = [8, 16, 64], strides = [1, 1, 1]} : vector<10x18x64xf32> to vector<8x16x64xf32>
    %c2_132 = arith.constant 2 : index
    %c0_133 = arith.constant 0 : index
    %c0_134 = arith.constant 0 : index
    %c0_135 = arith.constant 0 : index
    %173 = vector.load %arg18[%c2_132, %c0_133, %c0_134, %c0_135] : memref<3x3x64x64xf32, #tpu.memory_space<vmem>>, vector<1x1x64x64xf32>
    %174 = vector.shape_cast %173 : vector<1x1x64x64xf32> to vector<64x64xf32>
    %cst_136 = arith.constant dense<0.000000e+00> : vector<8x16x64xf32>
    %175 = tpu.matmul %172, %174, %cst_136 {dimension_numbers = #tpu.dot_dimension_numbers<[2], [0], [0, 1], [1], [0, 0, 0, 1, 1, 1], [], []>} : vector<8x16x64xf32>, vector<64x64xf32>, vector<8x16x64xf32> -> vector<8x16x64xf32>
    %176 = arith.addf %171, %175 : vector<8x16x64xf32>
    %177 = vector.extract_strided_slice %140 {offsets = [2, 1, 0], sizes = [8, 16, 64], strides = [1, 1, 1]} : vector<10x18x64xf32> to vector<8x16x64xf32>
    %c2_137 = arith.constant 2 : index
    %c1_138 = arith.constant 1 : index
    %c0_139 = arith.constant 0 : index
    %c0_140 = arith.constant 0 : index
    %178 = vector.load %arg18[%c2_137, %c1_138, %c0_139, %c0_140] : memref<3x3x64x64xf32, #tpu.memory_space<vmem>>, vector<1x1x64x64xf32>
    %179 = vector.shape_cast %178 : vector<1x1x64x64xf32> to vector<64x64xf32>
    %cst_141 = arith.constant dense<0.000000e+00> : vector<8x16x64xf32>
    %180 = tpu.matmul %177, %179, %cst_141 {dimension_numbers = #tpu.dot_dimension_numbers<[2], [0], [0, 1], [1], [0, 0, 0, 1, 1, 1], [], []>} : vector<8x16x64xf32>, vector<64x64xf32>, vector<8x16x64xf32> -> vector<8x16x64xf32>
    %181 = arith.addf %176, %180 : vector<8x16x64xf32>
    %182 = vector.extract_strided_slice %140 {offsets = [2, 2, 0], sizes = [8, 16, 64], strides = [1, 1, 1]} : vector<10x18x64xf32> to vector<8x16x64xf32>
    %c2_142 = arith.constant 2 : index
    %c2_143 = arith.constant 2 : index
    %c0_144 = arith.constant 0 : index
    %c0_145 = arith.constant 0 : index
    %183 = vector.load %arg18[%c2_142, %c2_143, %c0_144, %c0_145] : memref<3x3x64x64xf32, #tpu.memory_space<vmem>>, vector<1x1x64x64xf32>
    %184 = vector.shape_cast %183 : vector<1x1x64x64xf32> to vector<64x64xf32>
    %cst_146 = arith.constant dense<0.000000e+00> : vector<8x16x64xf32>
    %185 = tpu.matmul %182, %184, %cst_146 {dimension_numbers = #tpu.dot_dimension_numbers<[2], [0], [0, 1], [1], [0, 0, 0, 1, 1, 1], [], []>} : vector<8x16x64xf32>, vector<64x64xf32>, vector<8x16x64xf32> -> vector<8x16x64xf32>
    %186 = arith.addf %181, %185 : vector<8x16x64xf32>
    %187 = vector.shape_cast %138 : vector<1x64xf32> to vector<1x1x64xf32>
    %188 = vector.broadcast %187 : vector<1x1x64xf32> to vector<8x16x64xf32>
    %189 = arith.addf %186, %188 : vector<8x16x64xf32>
    %190 = vector.extract_strided_slice %7 {offsets = [2, 0, 0], sizes = [8, 16, 64], strides = [1, 1, 1]} : vector<12x16x64xf32> to vector<8x16x64xf32>
    %191 = arith.addf %189, %190 : vector<8x16x64xf32>
    %c0_147 = arith.constant 0 : index
    %c0_148 = arith.constant 0 : index
    %c0_149 = arith.constant 0 : index
    %c0_150 = arith.constant 0 : index
    %192 = vector.load %arg20[%c0_147, %c0_148, %c0_149, %c0_150] : memref<1x8x16x64xf32, #tpu.memory_space<vmem>>, vector<1x8x16x64xf32>
    %193 = vector.shape_cast %192 : vector<1x8x16x64xf32> to vector<8x16x64xf32>
    %194 = vector.shape_cast %191 : vector<8x16x64xf32> to vector<1x8x16x64xf32>
    tpu.vector_store %arg20[%c0_147, %c0_148, %c0_149, %c0_150], %194 {strides = array<i32>} : memref<1x8x16x64xf32, #tpu.memory_space<vmem>>, vector<1x8x16x64xf32>,
    return
  }
  func.func @transform_0(%arg0: i32, %arg1: i32) -> (i32, i32, i32, i32) {
    %c0_i32 = arith.constant 0 : i32
    %c0_i32_0 = arith.constant 0 : i32
    %c0_i32_1 = arith.constant 0 : i32
    return %arg0, %arg1, %c0_i32, %c0_i32_0 : i32, i32, i32, i32
  }
  func.func @transform_1(%arg0: i32, %arg1: i32) -> (i32, i32, i32, i32) {
    %c0_i32 = arith.constant 0 : i32
    %c0_i32_0 = arith.constant 0 : i32
    %c0_i32_1 = arith.constant 0 : i32
    return %arg0, %arg1, %c0_i32, %c0_i32_0 : i32, i32, i32, i32
  }
  func.func @transform_2(%arg0: i32, %arg1: i32) -> (i32, i32, i32, i32) {
    %c0_i32 = arith.constant 0 : i32
    %c0_i32_0 = arith.constant 0 : i32
    %c0_i32_1 = arith.constant 0 : i32
    return %arg0, %arg1, %c0_i32, %c0_i32_0 : i32, i32, i32, i32
  }
  func.func @transform_3(%arg0: i32, %arg1: i32) -> (i32, i32, i32, i32) {
    %c0_i32 = arith.constant 0 : i32
    %c0_i32_0 = arith.constant 0 : i32
    %c0_i32_1 = arith.constant 0 : i32
    return %arg0, %arg1, %c0_i32, %c0_i32_0 : i32, i32, i32, i32
  }
  func.func @transform_4(%arg0: i32, %arg1: i32) -> (i32, i32, i32, i32) {
    %c0_i32 = arith.constant 0 : i32
    %c0_i32_0 = arith.constant 0 : i32
    %c0_i32_1 = arith.constant 0 : i32
    return %arg0, %arg1, %c0_i32, %c0_i32_0 : i32, i32, i32, i32
  }
  func.func @transform_5(%arg0: i32, %arg1: i32) -> (i32, i32, i32, i32) {
    %c0_i32 = arith.constant 0 : i32
    %c0_i32_0 = arith.constant 0 : i32
    %c0_i32_1 = arith.constant 0 : i32
    return %arg0, %arg1, %c0_i32, %c0_i32_0 : i32, i32, i32, i32
  }
  func.func @transform_6(%arg0: i32, %arg1: i32) -> (i32, i32) {
    %c0_i32 = arith.constant 0 : i32
    %c0_i32_0 = arith.constant 0 : i32
    %c0_i32_1 = arith.constant 0 : i32
    return %c0_i32, %c0_i32_0 : i32, i32
  }
  func.func @transform_7(%arg0: i32, %arg1: i32) -> (i32, i32) {
    %c0_i32 = arith.constant 0 : i32
    %c0_i32_0 = arith.constant 0 : i32
    %c0_i32_1 = arith.constant 0 : i32
    return %c0_i32, %c0_i32_0 : i32, i32
  }
  func.func @transform_8(%arg0: i32, %arg1: i32) -> (i32, i32) {
    %c0_i32 = arith.constant 0 : i32
    %c0_i32_0 = arith.constant 0 : i32
    %c0_i32_1 = arith.constant 0 : i32
    return %c0_i32, %c0_i32_0 : i32, i32
  }
  func.func @transform_9(%arg0: i32, %arg1: i32) -> (i32, i32) {
    %c0_i32 = arith.constant 0 : i32
    %c0_i32_0 = arith.constant 0 : i32
    %c0_i32_1 = arith.constant 0 : i32
    return %c0_i32, %c0_i32_0 : i32, i32
  }
  func.func @transform_10(%arg0: i32, %arg1: i32) -> (i32, i32, i32, i32) {
    %c0_i32 = arith.constant 0 : i32
    %c0_i32_0 = arith.constant 0 : i32
    %c0_i32_1 = arith.constant 0 : i32
    %c0_i32_2 = arith.constant 0 : i32
    %c0_i32_3 = arith.constant 0 : i32
    return %c0_i32, %c0_i32_0, %c0_i32_1, %c0_i32_2 : i32, i32, i32, i32
  }
  func.func @transform_11(%arg0: i32, %arg1: i32) -> (i32, i32) {
    %c0_i32 = arith.constant 0 : i32
    %c0_i32_0 = arith.constant 0 : i32
    %c0_i32_1 = arith.constant 0 : i32
    return %c0_i32, %c0_i32_0 : i32, i32
  }
  func.func @transform_12(%arg0: i32, %arg1: i32) -> (i32, i32) {
    %c0_i32 = arith.constant 0 : i32
    %c0_i32_0 = arith.constant 0 : i32
    %c0_i32_1 = arith.constant 0 : i32
    return %c0_i32, %c0_i32_0 : i32, i32
  }
  func.func @transform_13(%arg0: i32, %arg1: i32) -> (i32, i32) {
    %c0_i32 = arith.constant 0 : i32
    %c0_i32_0 = arith.constant 0 : i32
    %c0_i32_1 = arith.constant 0 : i32
    return %c0_i32, %c0_i32_0 : i32, i32
  }
  func.func @transform_14(%arg0: i32, %arg1: i32) -> (i32, i32) {
    %c0_i32 = arith.constant 0 : i32
    %c0_i32_0 = arith.constant 0 : i32
    %c0_i32_1 = arith.constant 0 : i32
    return %c0_i32, %c0_i32_0 : i32, i32
  }
  func.func @transform_15(%arg0: i32, %arg1: i32) -> (i32, i32) {
    %c0_i32 = arith.constant 0 : i32
    %c0_i32_0 = arith.constant 0 : i32
    %c0_i32_1 = arith.constant 0 : i32
    return %c0_i32, %c0_i32_0 : i32, i32
  }
  func.func @transform_16(%arg0: i32, %arg1: i32) -> (i32, i32, i32, i32) {
    %c0_i32 = arith.constant 0 : i32
    %c0_i32_0 = arith.constant 0 : i32
    %c0_i32_1 = arith.constant 0 : i32
    %c0_i32_2 = arith.constant 0 : i32
    %c0_i32_3 = arith.constant 0 : i32
    return %c0_i32, %c0_i32_0, %c0_i32_1, %c0_i32_2 : i32, i32, i32, i32
  }
  func.func @transform_17(%arg0: i32, %arg1: i32) -> (i32, i32) {
    %c0_i32 = arith.constant 0 : i32
    %c0_i32_0 = arith.constant 0 : i32
    %c0_i32_1 = arith.constant 0 : i32
    return %c0_i32, %c0_i32_0 : i32, i32
  }
  func.func @transform_18(%arg0: i32, %arg1: i32) -> (i32, i32, i32, i32) {
    %c0_i32 = arith.constant 0 : i32
    %c0_i32_0 = arith.constant 0 : i32
    %c0_i32_1 = arith.constant 0 : i32
    return %arg0, %arg1, %c0_i32, %c0_i32_0 : i32, i32, i32, i32
  }
}

</mosaic_0001>

<bundles_post_ra>
// kernel: resblock_cfm.1
= control target key start
LH: loop header
LB: loop body
LE: loop exit
PB: predicated region body
PF: predicated region fallthrough
CT: control target
= control target key end

     0   :  { %s12434_s0 = inlined_call_operand.vmem [shape: f32[2,16,16,64], index: 0, kind: input, shape index: {}]   ;;  %s12435_s1 = inlined_call_operand.vmem [shape: f32[2,4,16,64], index: 1, kind: input, shape index: {}]   ;;  %s12436_s2 = inlined_call_operand.vmem [shape: f32[2,4,16,64], index: 2, kind: input, shape index: {}]   ;;  %s12437_s3 = inlined_call_operand.vmem [shape: f32[2,16,16,32], index: 3, kind: input, shape index: {}]   ;;  %s12438_s4 = inlined_call_operand.vmem [shape: f32[2,4,16,32], index: 4, kind: input, shape index: {}]   ;;  %s12439_s5 = inlined_call_operand.vmem [shape: f32[2,4,16,32], index: 5, kind: input, shape index: {}]   ;;  %s12440_s6 = inlined_call_operand.vmem [shape: f32[32,64], index: 6, kind: input, shape index: {}]   ;;  %s12441_s7 = inlined_call_operand.vmem [shape: f32[1,64], index: 7, kind: input, shape index: {}]   ;;  %s12442_s8 = inlined_call_operand.vmem [shape: f32[64,128], index: 8, kind: input, shape index: {}]   ;;  %s12443_s9 = inlined_call_operand.vmem [shape: f32[1,128], index: 9, kind: input, shape index: {}]   ;;  %s12444_s10 = inlined_call_operand.vmem [shape: f32[3,3,64,64], index: 10, kind: input, shape index: {}]   ;;  %s12445_s11 = inlined_call_operand.vmem [shape: f32[1,64], index: 11, kind: input, shape index: {}]   ;;  %s12446_s12 = inlined_call_operand.vmem [shape: f32[32,64], index: 12, kind: input, shape index: {}]   ;;  %s12447_s13 = inlined_call_operand.vmem [shape: f32[1,64], index: 13, kind: input, shape index: {}]   ;;  %s12448_s14 = inlined_call_operand.vmem [shape: f32[64,128], index: 14, kind: input, shape index: {}]   ;;  %s12449_s15 = inlined_call_operand.vmem [shape: f32[1,128], index: 15, kind: input, shape index: {}]   ;;  %s12450_s16 = inlined_call_operand.hbm [shape: f32[3,3,64,64], index: 16, kind: input, shape index: {}]   ;;  %s12451_s17 = inlined_call_operand.vmem [shape: f32[1,64], index: 17, kind: input, shape index: {}]   ;;  %s12452_s18 = inlined_call_operand.hbm [shape: f32[2,16,16,64], index: 18, kind: output, shape index: {}]  }
   0x1   :  { %12475 = sst [smem:[#allocation23_spill]] %s12434_s0 }
   0x2   :  { %12476 = sst [smem:[#allocation24_spill]] %s12435_s1 }
   0x3   :  { %12477 = sst [smem:[#allocation25_spill]] %s12436_s2 }
   0x4   :  { %12478 = sst [smem:[#allocation26_spill]] %s12449_s15 }
   0x5   :  { %12479 = sst [smem:[#allocation27_spill]] %s12450_s16 }
   0x6   :  { %12480 = sst [smem:[#allocation28_spill]] %s12451_s17 }
   0x7   :  { %12481 = sst [smem:[#allocation29_spill]] %s12452_s18 }
   0x8   :  { %23 = vsyncpa [#allocation3], 0 }
   0x9   :  { %24 = vsyncpa [#allocation4], 0 }
   0xa   :  { %26 = vsyncpa [#allocation4 + $0x1], 0  ;;  %s9690_s27 = smov 0   ;;  %s9692_s28 = smov 0  }
   0xb   :  { %s9694_s29 = smov 0   ;;  %s9696_s30 = smov 0  }
   0xc   :  { %s9698_s0 = smov 0   ;;  %s9700_s19 = smov 0  }
   0xd   :  { %s9702_s1 = smov 0   ;;  %s9704_s20 = smov 0  }
   0xe LB: > { %12482 = sst [smem:[#allocation8_spill]] %s9558_s27  ;;  %s6651_s21 = sadd.s32 4294967295, %s9586_s20   ;;  %s9586_s20 = sphi %s9704_s20, %s32_s20   ;;  %s9582_s1 = sphi %s9702_s1, %s12567_s1   ;;  %s9578_s19 = sphi %s9700_s19, %s12566_s19   ;;  %s9574_s0 = sphi %s9698_s0, %s12565_s0   ;;  %s9570_s30 = sphi %s9696_s30, %s12564_s30   ;;  %s9566_s29 = sphi %s9694_s29, %s12563_s29   ;;  %s9562_s28 = sphi %s9692_s28, %s12569_s28   ;;  %s9558_s27 = sphi %s9690_s27, %s12568_s27  }
   0xf   : > { %12483 = sst [smem:[#allocation9_spill]] %s9566_s29  ;;  %s6652_s22 = sadd.s32 4294967294, %s9586_s20  }
  0x10   : > { %12484 = sst [smem:[#allocation10_spill]] %s9574_s0  ;;  %s41_s2 = sadd.s32 1, %s9578_s19 }
  0x11   : > { %12485 = sst [smem:[#allocation11_spill]] %s9578_s19  ;;  %s44_s23 = sadd.s32 1, %s9582_s1 }
  0x12   : > { %12486 = sst [smem:[#allocation12_spill]] %s9582_s1  ;;  %p42_p0 = scmp.ge.s32.totalorder %s41_s2, 2 }
  0x13   : > { %12487 = sst [smem:[#allocation13_spill]] %s9586_s20  ;;  %s473_s24 = sadd.s32 1, %s9566_s29 }
  0x14   : > { %p483_p1 = scmp.ne.s32.totalorder %s9566_s29, %s9562_s28  ;;  %p484_p2 = scmp.eq.s32.totalorder %s6651_s21, 3 }
  0x15   : > { %s12571_s2 = smov (%p42_p0, %s41_s2), 0  ;;  %s12573_s23 = smov (!%p42_p0, %s44_s23), %s9582_s1 }
  0x16   : > { %12488 = sst [smem:[#allocation14_spill]] %s12571_s2  ;;  %s469_s25 = ssub.s32 %s9578_s19, %s12571_s2 }
  0x17   : > { %p9742_p3 = por %p484_p2, %p483_p1  ;;  %p46_p4 = scmp.ge.s32.totalorder %s12573_s23, 2 }
  0x18   : > { %p489_p5 = scmp.ne.s32.totalorder %s9562_s28, %s9558_s27  ;;  %p490_p6 = scmp.eq.s32.totalorder %s6652_s22, 3 }
  0x19   : > { %s12489_s26 = scalar_select %p9742_p3, 1, 0 }
  0x1a   : > { %p6653_p7 = scmp.ge.s32.totalorder %s9586_s20, 1  ;;  %s12575_s23 = smov (%p46_p4, %s12573_s23), 0 }
  0x1b   : > { %12490 = sst [smem:[#allocation15_spill]] %s12489_s26  ;;  %p9751_p8 = por %p490_p6, %p489_p5 }
  0x1c   : > { %12491 = sst [smem:[#allocation16_spill]] %s12575_s23  ;;  %p497_p9 = scmp.lt.s32.totalorder %s9586_s20, 5 }
  0x1d   : > { %s12492_s18 = scalar_select %p9751_p8, 1, 0 }
  0x1e   : > { %s468_s17 = ssub.s32 %s9582_s1, %s12575_s23  ;;  %p9758_p10 = pnand %p6653_p7, %p497_p9 }
  0x1f   : > { %12493 = sst [smem:[#allocation17_spill]] %s12492_s18  ;;  %s470_s15 = sor.u32 %s469_s25, %s468_s17 }
  0x20   : > { %s12494_s2 = scalar_select %p9758_p10, 1, 0 }
  0x21   : > { %p471_p11 = scmp.eq.s32.totalorder %s470_s15, 0  ;;  %p9762_p12 = scmp.eq.s32.totalorder %s6651_s21, 0 }
  0x22   : > { %p9344_p13 = pneg %p9758_p10  ;;  %s9588_s27 = smov [#allocation2]  }
  0x23   : > { %s12495_s19 = scalar_select %p9762_p12, 1, 0 }
  0x24   : > { %s9769_s22 = scalar_select %p471_p11, %s9566_s29, %s473_s24  }
  0x25   : > { %s539_s18 = sshll.u32 %s9588_s27, 4  ;;  %p9773_p0 = pnand %p9762_p12, %p9344_p13  ;;  %s540_s18 = int_to_ptr.vmem [resolvable:$true] %s539_s18 }
  0x26   : > { %12496 = sst [smem:[#allocation18_spill]] %s9769_s22 }
  0x27   : > { %s12498_s16 = sld [smem:[#allocation27_spill]]  ;;  %p9462_p2 = pneg %p9773_p0 }
  0x2d   : > { %s9460_s21 = scalar_lea.hbm %s12498_s16, 9216 }
  0x2e   : > { %p9461_p1 = scmp.ne.s32.totalorder %s12498_s16, %s9460_s21  ;;  %p9467_p6 = scmp.lt.u32.totalorder %s9460_s21, %s12498_s16 }
  0x30   : > { %p9463_p4 = pnand %p9462_p2, %p9461_p1 }
  0x32   : > { %p9464_p5 = pneg %p9463_p4 }
  0x34   : > { %p9469_p7 = pnand %p9467_p6, %p9464_p5 }
  0x36   : > { %9472 = shalt.err (!%p9469_p7)
}
  0x37   : > { %s9473_s22 = scalar_lea.vmem %s540_s18, 9216  ;;  %p9481_p8 = scmp.lt.s32.totalorder %s540_s18, %s540_s18 }
  0x38   : > { %p9474_p9 = scmp.ne.s32.totalorder %s540_s18, %s9473_s22  ;;  %p9482_p3 = scmp.lt.s32.totalorder %s9473_s22, %s9473_s22 }
  0x3a   : > { %p9476_p11 = pnand %p9474_p9, %p9462_p2  ;;  %p9483_p12 = por %p9482_p3, %p9481_p8 }
  0x3c   : > { %p9477_p13 = pneg %p9476_p11 }
  0x3e   : > { %p9484_p10 = pnand %p9483_p12, %p9477_p13 }
  0x40   : > { %9487 = shalt.err (!%p9484_p10)
}
  0x41   : > { %s9589_s1 = smov 128   ;;  %s9590_s23 = smov 8  }
  0x42   : > { %9347 = dma.hbm_to_vmem [thread:$0]  (!%p9773_p0), %s12498_s16, 9216, %s540_s18, [#allocation3], %s9589_s1, %s9589_s1, %s9590_s23  }
  0x43   : > { %p12499_p1 = scmp.ne.s32.totalorder %s12494_s2, 0 }
  0x45   : > { %642 = sbr.rel (%p12499_p1) target bundleno = 2093 (0x82d), region = 92 }
  0x4c   : > { %p12500_p4 = scmp.ne.s32.totalorder %s12495_s19, 0 }
  0x4e   : > { %9549 = dma.done.wait (%p12500_p4), [#allocation3], 9216  }
  0x4f   : > { %9551 = vsyncadd (%p12500_p4), [#allocation3], 4294958080  ;;  %s9800_s22 = sshll.u32 %s9570_s30, 3  ;;  %p752_p3 = scmp.lt.s32.totalorder %s9574_s0, 1  ;;  %v867_v0 = vld [vmem:[%s12440_s6] sm:$0xff]  ;;  %v868_v1 = vld [vmem:[%s12440_s6 + $0x8] sm:$0xff] }
  0x50   : > { %p754_p8 = scmp.lt.s32.totalorder %s9800_s22, 15  ;;  %s6663_s18 = sshll.u32 %s9570_s30, 1  ;;  %v869_v2 = vld [vmem:[%s12440_s6 + $0x10] sm:$0xff]  ;;  %v8710_v3 = vpack.c.bf16 %v868_v1, %v867_v0  ;;  %v870_v4 = vld [vmem:[%s12440_s6 + $0x18] sm:$0xff]  ;;  %v872_v5 = vld [vmem:[%s12442_s8] sm:$0xff]  ;;  %vm887_vm0 = vcmask 261120  }
  0x51   : > { %s753_s17 = scalar_select %p752_p3, %s9574_s0, 1  ;;  %v873_v6 = vld [vmem:[%s12442_s8 + $0x8] sm:$0xff]  ;;  %v8714_v7 = vpack.c.bf16 %v870_v4, %v869_v2  ;;  %v874_v9 = vld [vmem:[%s12442_s8 + $0x10] sm:$0xff]  ;;  %v875_v10 = vld [vmem:[%s12442_s8 + $0x18] sm:$0xff]  ;;  %vm1223_vm3 = vcmask 523264  }
  0x52   : > { %s755_s2 = scalar_select %p754_p8, %s9800_s22, 15  ;;  %v8718_v8 = vpack.c.bf16 %v873_v6, %v872_v5  ;;  %8711 = vmatprep.subr.bf16.mxu0 %v8710_v3  ;;  %v8722_v13 = vpack.c.bf16 %v875_v10, %v874_v9  ;;  %v876_v36 = vld [vmem:[%s12442_s8 + $0x20] sm:$0xff]  ;;  %v877_v37 = vld [vmem:[%s12442_s8 + $0x28] sm:$0xff]  ;;  %v878_v39 = vld [vmem:[%s12442_s8 + $0x30] sm:$0xff] }
  0x53   : > { %p765_p10 = scmp.lt.s32.totalorder %s6663_s18, 3  ;;  %s6661_s25 = sshll.u32 %s753_s17, 5  ;;  %8713 = vmatpush3.bf16.msra.mxu0 %v8710_v3  ;;  %v8726_v38 = vpack.c.bf16 %v877_v37, %v876_v36  ;;  %v879_v40 = vld [vmem:[%s12442_s8 + $0x38] sm:$0xff]  ;;  %v9921_v42 = vld [vmem:[%s12441_s7] ss:$0 sm:$0xff] }
  0x54   : > { %s6660_s29 = sshll.u32 %s755_s2, 1  ;;  %s6665_s20 = sshll.u32 %s753_s17, 3  ;;  %8719 = vmatprep.subr.bf16.mxu1 %v8718_v8  ;;  %8715 = vmatprep.subr.bf16.mxu0 %v8714_v7  ;;  %v8730_v41 = vpack.c.bf16 %v879_v40, %v878_v39 }
  0x55   : > { %s12577_s18 = smov (!%p765_p10, %s6663_s18), 3  ;;  %s9825_s19 = sadd.s32 %s6661_s25, %s6660_s29  ;;  %8721 = vmatpush3.bf16.msra.mxu1 %v8718_v8 }
  0x56   : > { %s6664_s16 = sshll.u32 %s12577_s18, 1  ;;  %s6662_s26 = sshll.u32 %s9825_s19, 3  ;;  %8723 = vmatprep.subr.bf16.mxu1 %v8722_v13 }
  0x57   : > { %s769_s17 = sadd.s32 %s6665_s20, %s6664_s16  ;;  %8717 = vmatpush3.bf16.msra.mxu0 %v8714_v7  ;;  %s9851_s21 = scalar_lea.vmem %s12437_s3, %s6662_s26 }
  0x58   : > { %s9827_s0 = sshll.u32 %s769_s17, 3  ;;  %v847_v16 = vld [vmem:[%s9851_s21] sm:$0xff]  ;;  %v848_v17 = vld [vmem:[%s9851_s21 + $0x8] sm:$0xff]  ;;  %v9861_v18 = vld [vmem:[%s9851_s21 + $0x10] sm:$0xff]  ;;  %s9591_s27 = smov 64  }
  0x59   : > { %s9834_s1 = scalar_lea.vmem %s12438_s4, %s9827_s0  ;;  %8725 = vmatpush3.bf16.msra.mxu1 %v8722_v13  ;;  %v850_v19 = vld [vmem:[%s9851_s21 + $0x18] sm:$0xff]  ;;  %v851_v20 = vld [vmem:[%s9851_s21 + $0x20] sm:$0xff]  ;;  %v852_v21 = vld [vmem:[%s9851_s21 + $0x28] sm:$0xff]  ;;  %s9892_s17 = scalar_lea.vmem %s12439_s5, %s9827_s0 }
  0x5a   : > { %v843_v11 = vld [vmem:[%s9834_s1] sm:$0xff]  ;;  %v844_v12 = vld [vmem:[%s9834_s1 + $0x8] sm:$0xff]  ;;  %v845_v14 = vld [vmem:[%s9834_s1 + $0x10] sm:$0xff]  ;;  %8727 = vmatprep.subr.bf16.mxu1 %v8726_v38  ;;  %s6734_s29 = sadd.s32 4294967294, %s9800_s22  ;;  %s12504_s25 = sld [smem:[#allocation24_spill]] }
  0x5b   : > { %7764 = vmatprep.mubr.msk.f32.mxu0 %vm887_vm0, %v843_v11  ;;  %v846_v15 = vld [vmem:[%s9834_s1 + $0x18] sm:$0xff]  ;;  %v853_v22 = vld [vmem:[%s9851_s21 + $0x30] sm:$0xff]  ;;  %v855_v24 = vld [vmem:[%s9851_s21 + $0x40] sm:$0xff]  ;;  %s12505_s24 = sld [smem:[#allocation23_spill]]  ;;  %s12526_s2 = sld [smem:[#allocation25_spill]] }
  0x5c   : > { %7765 = vmatmul.mubr.msk.f32.vlgmr.msra.gmra.mrb[0].mxu0 %vm887_vm0, %v844_v12  ;;  %v854_v23 = vld [vmem:[%s9851_s21 + $0x38] sm:$0xff]  ;;  %v856_v25 = vld [vmem:[%s9851_s21 + $0x48] sm:$0xff]  ;;  %v857_v26 = vld [vmem:[%s9851_s21 + $0x50] sm:$0xff]  ;;  %s12553_s19 = sld [smem:[#allocation28_spill]] }
  0x5d   : > { %7767 = vmatprep.mubr.msk.f32.mxu0 %vm887_vm0, %v845_v14  ;;  %v858_v27 = vld [vmem:[%s9851_s21 + $0x58] sm:$0xff]  ;;  %v859_v28 = vld [vmem:[%s9851_s21 + $0x60] sm:$0xff]  ;;  %v860_v29 = vld [vmem:[%s9851_s21 + $0x68] sm:$0xff]  ;;  %8729 = vmatpush3.bf16.msra.mxu1 %v8726_v38 }
  0x5e   : > { %v861_v30 = vld [vmem:[%s9851_s21 + $0x70] sm:$0xff]  ;;  %v862_v31 = vld [vmem:[%s9851_s21 + $0x78] sm:$0xff]  ;;  %v863_v32 = vld [vmem:[%s9892_s17] sm:$0xff]  ;;  %8731 = vmatprep.subr.bf16.mxu1 %v8730_v41 }
  0x5f   : > { %v864_v33 = vld [vmem:[%s9892_s17 + $0x8] sm:$0xff]  ;;  %v865_v34 = vld [vmem:[%s9892_s17 + $0x10] sm:$0xff]  ;;  %v866_v35 = vld [vmem:[%s9892_s17 + $0x18] sm:$0xff] }
  0x60   : > { %7768 = vmatmul.mubr.msk.f32.gmra.mrb[2].mxu0 %vm887_vm0, %v846_v15  ;;  %s771_s15 = scalar_lea.vmem %s12504_s25, %s9827_s0  ;;  %s12555_s25 = sld [smem:[#allocation15_spill]] }
  0x61   : > { %7770 = vmatprep.mubr.msk.f32.mxu0 %vm887_vm0, %v847_v16  ;;  %8733 = vmatpush3.bf16.msra.mxu1 %v8730_v41  ;;  %s10146_s23 = scalar_lea.vmem %s12505_s24, %s6662_s26  ;;  %s10532_s24 = scalar_lea.vmem %s12526_s2, %s9827_s0 }
  0x62   : > { %s7022_s2 = sadd.s32 4294967295, %s9800_s22  ;;  %s748_s22 = sand.u32 1, %s9562_s28  }
  0x63   : > { %s6658_s26 = sshll.u32 %s748_s22, 7 }
  0x64   : > { %7771 = vmatmul.mubr.msk.f32.gmra.mrb[4].mxu0 %vm887_vm0, %v848_v17 }
  0x65   : > { %7773 = vmatprep.mubr.msk.f32.mxu0 %vm887_vm0, %v9861_v18 }
  0x66   : > { %p12557_p0 = scmp.ne.s32.totalorder %s12555_s25, 0 }
  0x68   : > { %7774 = vmatmul.mubr.msk.f32.gmra.mrb[6].mxu0 %vm887_vm0, %v850_v19 }
  0x69   : > { %7776 = vmatprep.mubr.msk.f32.mxu0 %vm887_vm0, %v851_v20 }
  0x6c   : > { %7777 = vmatmul.mubr.msk.f32.gmra.mrb[8].mxu0 %vm887_vm0, %v852_v21 }
  0x6d   : > { %7779 = vmatprep.mubr.msk.f32.mxu0 %vm887_vm0, %v853_v22 }
  0x70   : > { %7780 = vmatmul.mubr.msk.f32.gmra.mrb[10].mxu0 %vm887_vm0, %v854_v23 }
  0x71   : > { %7782 = vmatprep.mubr.msk.f32.mxu0 %vm887_vm0, %v855_v24 }
  0x74   : > { %7783 = vmatmul.mubr.msk.f32.gmra.mrb[12].mxu0 %vm887_vm0, %v856_v25 }
  0x75   : > { %7785 = vmatprep.mubr.msk.f32.mxu0 %vm887_vm0, %v857_v26 }
  0x78   : > { %7786 = vmatmul.mubr.msk.f32.gmra.mrb[14].mxu0 %vm887_vm0, %v858_v27 }
  0x79   : > { %7788 = vmatprep.mubr.msk.f32.mxu0 %vm887_vm0, %v859_v28 }
  0x7c   : > { %7789 = vmatmul.mubr.msk.f32.gmra.mrb[16].mxu0 %vm887_vm0, %v860_v29 }
  0x7d   : > { %7791 = vmatprep.mubr.msk.f32.mxu0 %vm887_vm0, %v861_v30 }
  0x80   : > { %7792 = vmatmul.mubr.msk.f32.gmra.mrb[18].mxu0 %vm887_vm0, %v862_v31 }
  0x81   : > { %7794 = vmatprep.mubr.msk.f32.mxu0 %vm887_vm0, %v863_v32 }
  0x84   : > { %7795 = vmatmul.mubr.msk.f32.gmra.mrb[20].mxu0 %vm887_vm0, %v864_v33 }
  0x85   : > { %7797 = vmatprep.mubr.msk.f32.mxu0 %vm887_vm0, %v865_v34 }
  0x88   : > { %7798 = vmatmul.mubr.msk.f32.gmra.mrb[22].mxu0 %vm887_vm0, %v866_v35 }
 0x12f   : > { %v7766_v43 = vpop.f32.mrb[0].mxu0 }
 0x130   : > { %v1032_v44 = vadd.f32 %v7766_v43, %v9921_v42  ;;  %v1026_v45 = vpop.f32.mrb[1].mxu0 }
 0x131   : > { %v1027_v46 = vadd.f32 %v9921_v42, %v1026_v45 }
 0x132   : > { %v1170_v47 = vmul.f32 0.1, %v1032_v44  ;;  %vm1146_vm1 = vcmp.ge.f32.partialorder %v1032_v44, 0.0 }
 0x133   : > { %v7769_v48 = vpop.f32.mrb[2].mxu0  ;;  %vm1145_vm2 = vcmp.ge.f32.partialorder %v1027_v46, 0.0  ;;  %v1169_v49 = vmul.f32 0.1, %v1027_v46 }
 0x134   : > { %v1042_v50 = vadd.f32 %v7769_v48, %v9921_v42  ;;  %v1036_v51 = vpop.f32.mrb[3].mxu0  ;;  %v1194_v55 = vsel %vm1146_vm1, %v1032_v44, %v1170_v47 }
 0x135   : > { %v1037_v52 = vadd.f32 %v9921_v42, %v1036_v51  ;;  %v1193_v53 = vsel %vm1145_vm2, %v1027_v46, %v1169_v49 }
 0x136   : > { %v1172_v54 = vmul.f32 0.1, %v1042_v50  ;;  %7816 = vmatprep.mubr.msk.f32.mxu1 %vm1223_vm3, %v1193_v53  ;;  %vm1148_vm4 = vcmp.ge.f32.partialorder %v1042_v50, 0.0 }
 0x137   : > { %vm1147_vm5 = vcmp.ge.f32.partialorder %v1037_v52, 0.0  ;;  %v1171_v56 = vmul.f32 0.1, %v1037_v52  ;;  %v7772_v57 = vpop.f32.mrb[4].mxu0  ;;  %7817 = vmatmul.mubr.msk.f32.vlgmr.msra.gmra.mrb[0].mxu1 %vm1223_vm3, %v1194_v55 }
 0x138   : > { %v1052_v58 = vadd.f32 %v7772_v57, %v9921_v42  ;;  %v1046_v59 = vpop.f32.mrb[5].mxu0  ;;  %v1196_v63 = vsel %vm1148_vm4, %v1042_v50, %v1172_v54 }
 0x139   : > { %v1047_v60 = vadd.f32 %v9921_v42, %v1046_v59  ;;  %v1195_v61 = vsel %vm1147_vm5, %v1037_v52, %v1171_v56 }
 0x13a   : > { %vm1150_vm6 = vcmp.ge.f32.partialorder %v1052_v58, 0.0  ;;  %v1174_v62 = vmul.f32 0.1, %v1052_v58  ;;  %7819 = vmatprep.mubr.msk.f32.mxu1 %vm1223_vm3, %v1195_v61 }
 0x13b   : > { %vm1149_vm7 = vcmp.ge.f32.partialorder %v1047_v60, 0.0  ;;  %v1173_v0 = vmul.f32 0.1, %v1047_v60  ;;  %v7775_v1 = vpop.f32.mrb[6].mxu0  ;;  %7820 = vmatmul.mubr.msk.f32.gmra.mrb[2].mxu1 %vm1223_vm3, %v1196_v63 }
 0x13c   : > { %v1062_v2 = vadd.f32 %v7775_v1, %v9921_v42  ;;  %v1056_v3 = vpop.f32.mrb[7].mxu0  ;;  %v1198_v4 = vsel %vm1150_vm6, %v1052_v58, %v1174_v62 }
 0x13d   : > { %v1057_v5 = vadd.f32 %v9921_v42, %v1056_v3  ;;  %v1197_v6 = vsel %vm1149_vm7, %v1047_v60, %v1173_v0 }
 0x13e   : > { %vm1152_vm8 = vcmp.ge.f32.partialorder %v1062_v2, 0.0  ;;  %v1176_v7 = vmul.f32 0.1, %v1062_v2  ;;  %7822 = vmatprep.mubr.msk.f32.mxu1 %vm1223_vm3, %v1197_v6 }
 0x13f   : > { %vm1151_vm9 = vcmp.ge.f32.partialorder %v1057_v5, 0.0  ;;  %v1175_v8 = vmul.f32 0.1, %v1057_v5  ;;  %v7778_v9 = vpop.f32.mrb[8].mxu0  ;;  %7823 = vmatmul.mubr.msk.f32.gmra.mrb[4].mxu1 %vm1223_vm3, %v1198_v4 }
 0x140   : > { %v1072_v10 = vadd.f32 %v7778_v9, %v9921_v42  ;;  %v1066_v11 = vpop.f32.mrb[9].mxu0  ;;  %v1200_v12 = vsel %vm1152_vm8, %v1062_v2, %v1176_v7 }
 0x141   : > { %v1067_v13 = vadd.f32 %v9921_v42, %v1066_v11  ;;  %v1199_v14 = vsel %vm1151_vm9, %v1057_v5, %v1175_v8 }
 0x142   : > { %vm1154_vm10 = vcmp.ge.f32.partialorder %v1072_v10, 0.0  ;;  %v1178_v15 = vmul.f32 0.1, %v1072_v10  ;;  %7825 = vmatprep.mubr.msk.f32.mxu1 %vm1223_vm3, %v1199_v14  ;;  %v6737_v14 = vld [vmem:[%s12444_s10 + $0x50] sm:$0xff] }
 0x143   : > { %vm1153_vm11 = vcmp.ge.f32.partialorder %v1067_v13, 0.0  ;;  %v1177_v16 = vmul.f32 0.1, %v1067_v13  ;;  %v7781_v17 = vpop.f32.mrb[10].mxu0  ;;  %7826 = vmatmul.mubr.msk.f32.gmra.mrb[6].mxu1 %vm1223_vm3, %v1200_v12 }
 0x144   : > { %v1082_v19 = vadd.f32 %v7781_v17, %v9921_v42  ;;  %v1076_v20 = vpop.f32.mrb[11].mxu0  ;;  %v1202_v21 = vsel %vm1154_vm10, %v1072_v10, %v1178_v15 }
 0x145   : > { %v1077_v22 = vadd.f32 %v9921_v42, %v1076_v20  ;;  %v1201_v23 = vsel %vm1153_vm11, %v1067_v13, %v1177_v16  ;;  %v6736_v13 = vld [vmem:[%s12444_s10 + $0x48] sm:$0xff]  ;;  %v6738_v16 = vld [vmem:[%s12444_s10 + $0x58] sm:$0xff] }
 0x146   : > { %vm1156_vm12 = vcmp.ge.f32.partialorder %v1082_v19, 0.0  ;;  %v1180_v24 = vmul.f32 0.1, %v1082_v19  ;;  %7828 = vmatprep.mubr.msk.f32.mxu1 %vm1223_vm3, %v1201_v23  ;;  %v8738_v17 = vpack.c.bf16 %v6738_v16, %v6737_v14 }
 0x147   : > { %vm1155_vm13 = vcmp.ge.f32.partialorder %v1077_v22, 0.0  ;;  %v1179_v25 = vmul.f32 0.1, %v1077_v22  ;;  %v7784_v26 = vpop.f32.mrb[12].mxu0  ;;  %7829 = vmatmul.mubr.msk.f32.gmra.mrb[8].mxu1 %vm1223_vm3, %v1202_v21  ;;  %v6741_v21 = vld [vmem:[%s12444_s10 + $0x70] sm:$0xff] }
 0x148   : > { %v1092_v27 = vadd.f32 %v7784_v26, %v9921_v42  ;;  %v1086_v28 = vpop.f32.mrb[13].mxu0  ;;  %v1204_v29 = vsel %vm1156_vm12, %v1082_v19, %v1180_v24  ;;  %v6740_v19 = vld [vmem:[%s12444_s10 + $0x68] sm:$0xff]  ;;  %v10000_v24 = vld [vmem:[%s12443_s9] ss:$0 sm:$0xff] }
 0x149   : > { %v1087_v30 = vadd.f32 %v9921_v42, %v1086_v28  ;;  %v1203_v31 = vsel %vm1155_vm13, %v1077_v22, %v1179_v25  ;;  %v6742_v22 = vld [vmem:[%s12444_s10 + $0x78] sm:$0xff] }
 0x14a   : > { %vm1158_vm14 = vcmp.ge.f32.partialorder %v1092_v27, 0.0  ;;  %v1182_v32 = vmul.f32 0.1, %v1092_v27  ;;  %7831 = vmatprep.mubr.msk.f32.mxu1 %vm1223_vm3, %v1203_v31  ;;  %v8746_v23 = vpack.c.bf16 %v6742_v22, %v6741_v21  ;;  %v821_v22 = vld [vmem:[%s771_s15 + $0x10] sm:$0xff] }
 0x14b   : > { %vm1157_vm15 = vcmp.ge.f32.partialorder %v1087_v30, 0.0  ;;  %v1181_v33 = vmul.f32 0.1, %v1087_v30  ;;  %v7787_v34 = vpop.f32.mrb[14].mxu0  ;;  %7832 = vmatmul.mubr.msk.f32.gmra.mrb[10].mxu1 %vm1223_vm3, %v1204_v29 }
 0x14c   : > { %v1102_v35 = vadd.f32 %v7787_v34, %v9921_v42  ;;  %v1096_v36 = vpop.f32.mrb[15].mxu0  ;;  %v1206_v37 = vsel %vm1158_vm14, %v1092_v27, %v1182_v32  ;;  %v1833_v34 = vld [vmem:[%s12444_s10 + $0x8] sm:$0xff] }
 0x14d   : > { %v1097_v38 = vadd.f32 %v9921_v42, %v1096_v36  ;;  %v1205_v39 = vsel %vm1157_vm15, %v1087_v30, %v1181_v33  ;;  %v1832_v33 = vld [vmem:[%s12444_s10] sm:$0xff] }
 0x14e   : > { %vm1160_vm1 = vcmp.ge.f32.partialorder %v1102_v35, 0.0  ;;  %v1184_v40 = vmul.f32 0.1, %v1102_v35  ;;  %7834 = vmatprep.mubr.msk.f32.mxu1 %vm1223_vm3, %v1205_v39 }
 0x14f   : > { %vm1159_vm2 = vcmp.ge.f32.partialorder %v1097_v38, 0.0  ;;  %v1183_v41 = vmul.f32 0.1, %v1097_v38  ;;  %v7790_v43 = vpop.f32.mrb[16].mxu0  ;;  %7835 = vmatmul.mubr.msk.f32.gmra.mrb[12].mxu1 %vm1223_vm3, %v1206_v37  ;;  %v10026_v37 = vpack.c.bf16 %v1833_v34, %v1832_v33 }
 0x150   : > { %v1112_v44 = vadd.f32 %v7790_v43, %v9921_v42  ;;  %v1106_v45 = vpop.f32.mrb[17].mxu0  ;;  %v1208_v46 = vsel %vm1160_vm1, %v1102_v35, %v1184_v40 }
 0x151   : > { %v1107_v47 = vadd.f32 %v9921_v42, %v1106_v45  ;;  %v1207_v48 = vsel %vm1159_vm2, %v1097_v38, %v1183_v41  ;;  %vm1747_vm2 = vcmask 1040384  }
 0x152   : > { %vm1162_vm4 = vcmp.ge.f32.partialorder %v1112_v44, 0.0  ;;  %v1186_v49 = vmul.f32 0.1, %v1112_v44  ;;  %7837 = vmatprep.mubr.msk.f32.mxu1 %vm1223_vm3, %v1207_v48 }
 0x153   : > { %vm1161_vm5 = vcmp.ge.f32.partialorder %v1107_v47, 0.0  ;;  %v1185_v50 = vmul.f32 0.1, %v1107_v47  ;;  %v7793_v51 = vpop.f32.mrb[18].mxu0  ;;  %7838 = vmatmul.mubr.msk.f32.gmra.mrb[14].mxu1 %vm1223_vm3, %v1208_v46 }
 0x154   : > { %v1122_v52 = vadd.f32 %v7793_v51, %v9921_v42  ;;  %v1116_v53 = vpop.f32.mrb[19].mxu0  ;;  %v1210_v54 = vsel %vm1162_vm4, %v1112_v44, %v1186_v49 }
 0x155   : > { %v1117_v55 = vadd.f32 %v9921_v42, %v1116_v53  ;;  %v1209_v56 = vsel %vm1161_vm5, %v1107_v47, %v1185_v50 }
 0x156   : > { %vm1164_vm6 = vcmp.ge.f32.partialorder %v1122_v52, 0.0  ;;  %v1188_v57 = vmul.f32 0.1, %v1122_v52  ;;  %7840 = vmatprep.mubr.msk.f32.mxu1 %vm1223_vm3, %v1209_v56 }
 0x157   : > { %vm1163_vm7 = vcmp.ge.f32.partialorder %v1117_v55, 0.0  ;;  %v1187_v58 = vmul.f32 0.1, %v1117_v55  ;;  %7841 = vmatmul.mubr.msk.f32.gmra.mrb[16].mxu1 %vm1223_vm3, %v1210_v54  ;;  %v7796_v59 = vpop.f32.mrb[20].mxu0 }
 0x158   : > { %v1212_v60 = vsel %vm1164_vm6, %v1122_v52, %v1188_v57  ;;  %v1132_v61 = vadd.f32 %v7796_v59, %v9921_v42  ;;  %v1126_v62 = vpop.f32.mrb[21].mxu0 }
 0x159   : > { %v1211_v63 = vsel %vm1163_vm7, %v1117_v55, %v1187_v58  ;;  %v1127_v0 = vadd.f32 %v9921_v42, %v1126_v62 }
 0x15a   : > { %7843 = vmatprep.mubr.msk.f32.mxu1 %vm1223_vm3, %v1211_v63  ;;  %vm1166_vm8 = vcmp.ge.f32.partialorder %v1132_v61, 0.0  ;;  %v1190_v1 = vmul.f32 0.1, %v1132_v61 }
 0x15b   : > { %7844 = vmatmul.mubr.msk.f32.gmra.mrb[18].mxu1 %vm1223_vm3, %v1212_v60  ;;  %vm1165_vm9 = vcmp.ge.f32.partialorder %v1127_v0, 0.0  ;;  %v1189_v2 = vmul.f32 0.1, %v1127_v0  ;;  %v7799_v3 = vpop.f32.mrb[22].mxu0 }
 0x15c   : > { %v1214_v4 = vsel %vm1166_vm8, %v1132_v61, %v1190_v1  ;;  %v1142_v5 = vadd.f32 %v7799_v3, %v9921_v42  ;;  %v1136_v6 = vpop.f32.mrb[23].mxu0 }
 0x15d   : > { %v1213_v7 = vsel %vm1165_vm9, %v1127_v0, %v1189_v2  ;;  %v1137_v8 = vadd.f32 %v9921_v42, %v1136_v6  ;;  %v6735_v42 = vld [vmem:[%s12444_s10 + $0x40] sm:$0xff]  ;;  %vm1869_vm9 = vcmask 1046528  }
 0x15e   : > { %7846 = vmatprep.mubr.msk.f32.mxu1 %vm1223_vm3, %v1213_v7  ;;  %vm1168_vm10 = vcmp.ge.f32.partialorder %v1142_v5, 0.0  ;;  %v1192_v9 = vmul.f32 0.1, %v1142_v5  ;;  %v8734_v15 = vpack.c.bf16 %v6736_v13, %v6735_v42  ;;  %v10132_v42 = vstv %s6734_s29  ;;  %v819_v13 = vld [vmem:[%s771_s15] sm:$0xff]  ;;  %s12308_s29 = scalar_lea.vmem [#allocation5], %s6658_s26 }
 0x15f   : > { %7847 = vmatmul.mubr.msk.f32.gmra.mrb[20].mxu1 %vm1223_vm3, %v1214_v4  ;;  %vm1167_vm11 = vcmp.ge.f32.partialorder %v1137_v8, 0.0  ;;  %v1191_v10 = vmul.f32 0.1, %v1137_v8  ;;  %12503 = vst [vmem:[#allocation21_spill] sm:$0xff] %v10132_v42  ;;  %v1627_v14 = vadd.s32 1, %v10132_v42  ;;  %vm1638_vm12 = vcmp.ge.s32.totalorder %v10132_v42, 0 }
 0x160   : > { %v1216_v11 = vsel %vm1168_vm10, %v1142_v5, %v1192_v9  ;;  %8735 = vmatprep.subr.bf16.mxu0 %v8734_v15  ;;  %vm1650_vm13 = vcmp.lt.s32.totalorder %v10132_v42, 16 }
 0x161   : > { %v1215_v12 = vsel %vm1167_vm11, %v1137_v8, %v1191_v10  ;;  %8737 = vmatpush3.bf16.msra.mxu0 %v8734_v15  ;;  %v1628_v15 = vadd.s32 2, %v10132_v42  ;;  %vm10153_vm14 = vmand %vm1638_vm12, %vm1650_vm13  ;;  %vm1639_vm15 = vcmp.ge.s32.totalorder %v1627_v14, 0  ;;  %vm1651_vm1 = vcmp.lt.s32.totalorder %v1627_v14, 16 }
 0x162   : > { %7849 = vmatprep.mubr.msk.f32.mxu1 %vm1223_vm3, %v1215_v12  ;;  %8739 = vmatprep.subr.bf16.mxu0 %v8738_v17  ;;  %vm10169_vm6 = vmand %vm1639_vm15, %vm1651_vm1  ;;  %v10218_v14 = vadd.s32 7, %v10132_v42  ;;  %vm2339_vm15 = vcmask 1045504  }
 0x163   : > { %7850 = vmatmul.mubr.msk.f32.gmra.mrb[22].mxu1 %vm1223_vm3, %v1216_v11  ;;  %vm1640_vm4 = vcmp.ge.s32.totalorder %v1628_v15, 0  ;;  %vm1652_vm5 = vcmp.lt.s32.totalorder %v1628_v15, 16 }
 0x164   : > { %8280 = vmatprep.mubr.msk.f32.mxu1 %vm887_vm0, %v9861_v18  ;;  %v6739_v18 = vld [vmem:[%s12444_s10 + $0x60] sm:$0xff]  ;;  %vm10222_vm12 = vmand %vm1640_vm4, %vm1652_vm5 }
 0x165   : > { %v8742_v20 = vpack.c.bf16 %v6740_v19, %v6739_v18  ;;  %8741 = vmatpush3.bf16.msra.mxu0 %v8738_v17  ;;  %v822_v17 = vld [vmem:[%s771_s15 + $0x18] sm:$0xff]  ;;  %v820_v18 = vld [vmem:[%s771_s15 + $0x8] sm:$0xff]  ;;  %v10151_v19 = vadd.s32 3, %v10132_v42 }
 0x167   : > { %8743 = vmatprep.subr.bf16.mxu0 %v8742_v20  ;;  %vm1641_vm7 = vcmp.ge.s32.totalorder %v10151_v19, 0  ;;  %vm1653_vm8 = vcmp.lt.s32.totalorder %v10151_v19, 16 }
 0x168   : > { %vm10269_vm1 = vmand %vm1641_vm7, %vm1653_vm8  ;;  %vm1645_vm7 = vcmp.ge.s32.totalorder %v10218_v14, 0  ;;  %vm1657_vm8 = vcmp.lt.s32.totalorder %v10218_v14, 16 }
 0x169   : > { %8745 = vmatpush3.bf16.msra.mxu0 %v8742_v20  ;;  %v1836_v20 = vld [vmem:[%s12444_s10 + $0x20] sm:$0xff] }
 0x16a   : > { %8747 = vmatprep.subr.bf16.mxu0 %v8746_v23 }
 0x16d   : > { %8749 = vmatpush3.bf16.msra.mxu0 %v8746_v23 }
 0x16e   : > { %8751 = vmatprep.subr.bf16.mxu0 %v10026_v37 }
 0x20a   : > { %v7818_v25 = vpop.f32.mrb[0].mxu1 }
 0x20b   : > { %v1362_v26 = vpop.f32.mrb[1].mxu1  ;;  %v10011_v31 = vadd.f32 %v7818_v25, %v10000_v24  ;;  %v824_v25 = vld [vmem:[%s10146_s23 + $0x8] sm:$0xff] }
 0x20c   : > { %v10003_v27 = vadd.f32 %v10000_v24, %v1362_v26  ;;  %v10160_v26 = vadd.s32 4, %v10132_v42 }
 0x20e   : > { %v7821_v28 = vpop.f32.mrb[2].mxu1  ;;  %1529 = vrot.lane.b32.xlu0 %v10003_v27, %s9591_s27  ;;  %v1481_v16 = vmul.f32 %v10003_v27, %v819_v13  ;;  %vm1642_vm10 = vcmp.ge.s32.totalorder %v10160_v26, 0  ;;  %vm1654_vm11 = vcmp.lt.s32.totalorder %v10160_v26, 16 }
 0x20f   : > { %v10008_v29 = vadd.f32 %v7821_v28, %v10000_v24  ;;  %v1372_v30 = vpop.f32.mrb[3].mxu1  ;;  %v1482_v28 = vmul.f32 %v10011_v31, %v820_v18 }
 0x210   : > { %v10024_v35 = vadd.f32 %v10000_v24, %v1372_v30  ;;  %v825_v30 = vld [vmem:[%s10146_s23 + $0x10] sm:$0xff] }
 0x211   : > { %1535 = vrot.lane.b32.xlu1 %v10008_v29, %s9591_s27  ;;  %v1484_v27 = vmul.f32 %v10008_v29, %v822_v17  ;;  %v827_v29 = vld [vmem:[%s10146_s23 + $0x20] sm:$0xff] }
 0x212   : > { %v7824_v32 = vpop.f32.mrb[4].mxu1  ;;  %1531 = vrot.lane.b32.xlu0 %v10011_v31, %s9591_s27  ;;  %v828_v31 = vld [vmem:[%s10146_s23 + $0x28] sm:$0xff] }
 0x213   : > { %v1382_v36 = vpop.f32.mrb[5].mxu1  ;;  %v10037_v40 = vadd.f32 %v7824_v32, %v10000_v24  ;;  %v826_v32 = vld [vmem:[%s10146_s23 + $0x18] sm:$0xff] }
 0x214   : > { %v10029_v38 = vadd.f32 %v10000_v24, %v1382_v36 }
 0x215   : > { %1533 = vrot.lane.b32.xlu1 %v10024_v35, %s9591_s27 }
 0x216   : > { %v7827_v39 = vpop.f32.mrb[6].mxu1  ;;  %1537 = vrot.lane.b32.xlu0 %v10029_v38, %s9591_s27 }
 0x217   : > { %v1392_v41 = vpop.f32.mrb[7].mxu1  ;;  %v10047_v45 = vadd.f32 %v7827_v39, %v10000_v24  ;;  %v1483_v39 = vmul.f32 %v10024_v35, %v821_v22  ;;  %v830_v35 = vld [vmem:[%s10146_s23 + $0x38] sm:$0xff] }
 0x218   : > { %v10040_v43 = vadd.f32 %v10000_v24, %v1392_v41 }
 0x219   : > { %1539 = vrot.lane.b32.xlu1 %v10037_v40, %s9591_s27 }
 0x21a   : > { %v7830_v44 = vpop.f32.mrb[8].mxu1  ;;  %1541 = vrot.lane.b32.xlu0 %v10040_v43, %s9591_s27 }
 0x21b   : > { %v1402_v46 = vpop.f32.mrb[9].mxu1  ;;  %v10057_v49 = vadd.f32 %v7830_v44, %v10000_v24 }
 0x21c   : > { %v10050_v47 = vadd.f32 %v10000_v24, %v1402_v46 }
 0x21d   : > { %1543 = vrot.lane.b32.xlu1 %v10047_v45, %s9591_s27 }
 0x21e   : > { %v7833_v48 = vpop.f32.mrb[10].mxu1  ;;  %1545 = vrot.lane.b32.xlu0 %v10050_v47, %s9591_s27 }
 0x21f   : > { %v1412_v50 = vpop.f32.mrb[11].mxu1  ;;  %v10067_v53 = vadd.f32 %v7833_v48, %v10000_v24  ;;  %v1486_v48 = vmul.f32 %v10037_v40, %v824_v25  ;;  %v10192_v40 = vmul.f32 %v10047_v45, %v826_v32  ;;  %v831_v45 = vld [vmem:[%s10146_s23 + $0x40] sm:$0xff] }
 0x220   : > { %v10060_v51 = vadd.f32 %v10000_v24, %v1412_v50  ;;  %v10181_v50 = vadd.s32 5, %v10132_v42 }
 0x221   : > { %1547 = vrot.lane.b32.xlu1 %v10057_v49, %s9591_s27 }
 0x222   : > { %v7836_v52 = vpop.f32.mrb[12].mxu1  ;;  %1549 = vrot.lane.b32.xlu0 %v10060_v51, %s9591_s27  ;;  %vm1643_vm13 = vcmp.ge.s32.totalorder %v10181_v50, 0 }
 0x223   : > { %v1422_v54 = vpop.f32.mrb[13].mxu1  ;;  %v10077_v57 = vadd.f32 %v7836_v52, %v10000_v24  ;;  %v1834_v52 = vld [vmem:[%s12444_s10 + $0x10] sm:$0xff] }
 0x224   : > { %v10070_v55 = vadd.f32 %v10000_v24, %v1422_v54  ;;  %v1835_v54 = vld [vmem:[%s12444_s10 + $0x18] sm:$0xff] }
 0x225   : > { %1551 = vrot.lane.b32.xlu1 %v10067_v53, %s9591_s27  ;;  %v10215_v13 = vpack.c.bf16 %v1835_v54, %v1834_v52 }
 0x226   : > { %v7839_v56 = vpop.f32.mrb[14].mxu1  ;;  %1553 = vrot.lane.b32.xlu0 %v10070_v55, %s9591_s27 }
 0x227   : > { %v1432_v58 = vpop.f32.mrb[15].mxu1  ;;  %v10087_v61 = vadd.f32 %v7839_v56, %v10000_v24 }
 0x228   : > { %v10080_v59 = vadd.f32 %v10000_v24, %v1432_v58  ;;  %v829_v58 = vld [vmem:[%s10146_s23 + $0x30] sm:$0xff] }
 0x229   : > { %1555 = vrot.lane.b32.xlu1 %v10077_v57, %s9591_s27  ;;  %v10227_v18 = vmul.f32 %v10060_v51, %v829_v58  ;;  %v10241_v51 = vmul.f32 %v10070_v55, %v831_v45 }
 0x22a   : > { %v7842_v60 = vpop.f32.mrb[16].mxu1  ;;  %1557 = vrot.lane.b32.xlu0 %v10080_v59, %s9591_s27 }
 0x22b   : > { %v1442_v62 = vpop.f32.mrb[17].mxu1  ;;  %v10097_v1 = vadd.f32 %v7842_v60, %v10000_v24  ;;  %v10198_v60 = vadd.s32 6, %v10132_v42 }
 0x22c   : > { %v10090_v63 = vadd.f32 %v10000_v24, %v1442_v62 }
 0x22d   : > { %1559 = vrot.lane.b32.xlu1 %v10087_v61, %s9591_s27  ;;  %vm1644_vm4 = vcmp.ge.s32.totalorder %v10198_v60, 0  ;;  %vm1656_vm5 = vcmp.lt.s32.totalorder %v10198_v60, 16 }
 0x22e   : > { %v7845_v0 = vpop.f32.mrb[18].mxu1  ;;  %1561 = vrot.lane.b32.xlu0 %v10090_v63, %s9591_s27 }
 0x22f   : > { %v1452_v2 = vpop.f32.mrb[19].mxu1  ;;  %v10107_v5 = vadd.f32 %v7845_v0, %v10000_v24 }
 0x230   : > { %v10100_v3 = vadd.f32 %v10000_v24, %v1452_v2  ;;  %v10203_v2 = vmul.f32 %v10050_v47, %v827_v29 }
 0x231   : > { %1563 = vrot.lane.b32.xlu1 %v10097_v1, %s9591_s27 }
 0x232   : > { %1565 = vrot.lane.b32.xlu0 %v10100_v3, %s9591_s27  ;;  %v7848_v4 = vpop.f32.mrb[20].mxu1 }
 0x233   : > { %v1462_v6 = vpop.f32.mrb[21].mxu1  ;;  %v10115_v8 = vadd.f32 %v7848_v4, %v10000_v24  ;;  %v832_v4 = vld [vmem:[%s10146_s23 + $0x48] sm:$0xff] }
 0x234   : > { %v10110_v7 = vadd.f32 %v10000_v24, %v1462_v6 }
 0x235   : > { %1567 = vrot.lane.b32.xlu1 %v10107_v5, %s9591_s27 }
 0x236   : > { %1569 = vrot.lane.b32.xlu0 %v10110_v7, %s9591_s27  ;;  %v7851_v9 = vpop.f32.mrb[22].mxu1 }
 0x237   : > { %v1472_v10 = vpop.f32.mrb[23].mxu1  ;;  %v10125_v12 = vadd.f32 %v7851_v9, %v10000_v24 }
 0x238   : > { %v10120_v11 = vadd.f32 %v10000_v24, %v1472_v10  ;;  %v823_v24 = vld [vmem:[%s10146_s23] sm:$0xff]  ;;  %v10213_v10 = vmul.f32 %v10067_v53, %v830_v35  ;;  %v10230_v53 = vadd.s32 8, %v10132_v42 }
 0x239   : > { %1571 = vrot.lane.b32.xlu1 %v10115_v8, %s9591_s27  ;;  %12502 = vst [vmem:[#allocation20_spill] sm:$0xff] %v10125_v12  ;;  %v1485_v46 = vmul.f32 %v10029_v38, %v823_v24  ;;  %v1487_v38 = vmul.f32 %v10040_v43, %v825_v30  ;;  %v10206_v43 = vmul.f32 %v10057_v49, %v828_v31 }
 0x23a   : > { %12501 = vst [vmem:[#allocation19_spill] sm:$0xff] %v10120_v11  ;;  %1573 = vrot.lane.b32.xlu0 %v10120_v11, %s9591_s27 }
 0x23d   : > { %1575 = vrot.lane.b32.xlu1 %v10125_v12, %s9591_s27 }
 0x280   : > { %v1530_v21 = vpop.permute.xlu0 %1529 }
 0x281   : > { %v1601_v23 = vadd.f32 %v1530_v21, %v1481_v16  ;;  %v1837_v21 = vld [vmem:[%s12444_s10 + $0x28] sm:$0xff] }
 0x283   : > { %v1698_v33 = vsel %vm10153_vm14, %v1601_v23, 0.0  ;;  %v1536_v36 = vpop.permute.xlu1 %1535  ;;  %v10244_v23 = vmul.f32 %v10077_v57, %v832_v4 }
 0x284   : > { %v1604_v41 = vadd.f32 %v1536_v36, %v1484_v27  ;;  %v1532_v44 = vpop.permute.xlu0 %1531  ;;  %v1748_v62 = vrot.slane %v1698_v33, 7  ;;  %v10263_v33 = vpack.c.bf16 %v1837_v21, %v1836_v20 }
 0x285   : > { %v1602_v56 = vadd.f32 %v1532_v44, %v1482_v28  ;;  %v10256_v28 = vadd.s32 9, %v10132_v42 }
 0x286   : > { %v1701_v0 = vsel %vm10169_vm6, %v1604_v41, 0.0  ;;  %v10247_v24 = vsel %vm1747_vm2, 0.0, %v1748_v62 }
 0x287   : > { %v1699_v6 = vsel %vm10153_vm14, %v1602_v56, 0.0  ;;  %v1534_v9 = vpop.permute.xlu1 %1533  ;;  %v1752_v15 = vrot.slane %v1701_v0, 7  ;;  %vm1655_vm14 = vcmp.lt.s32.totalorder %v10181_v50, 16  ;;  %v1870_v44 = vrot.slane %v10247_v24, 1 }
 0x288   : > { %v1749_v16 = vrot.slane %v1699_v6, 7  ;;  %v1603_v47 = vadd.f32 %v1534_v9, %v1483_v39  ;;  %v1538_v17 = vpop.permute.xlu0 %1537 }
 0x289   : > { %v1605_v22 = vadd.f32 %v1538_v17, %v1485_v46  ;;  %v2340_v46 = vrot.slane %v10247_v24, 2  ;;  %v10277_v35 = vsel %vm1747_vm2, %v1752_v15, 0.0 }
 0x28a   : > { %v10250_v25 = vsel %vm1747_vm2, %v1748_v62, %v1749_v16  ;;  %v10253_v27 = vsel %vm1747_vm2, %v1749_v16, 0.0  ;;  %v1700_v55 = vsel %vm10169_vm6, %v1603_v47, 0.0  ;;  %vm10302_vm6 = vmand %vm1642_vm10, %vm1654_vm11  ;;  %v1878_v21 = vrot.slane %v10277_v35, 1 }
 0x28b   : > { %v1873_v30 = vrot.slane %v10253_v27, 1  ;;  %v1702_v57 = vsel %vm10222_vm12, %v1605_v22, 0.0  ;;  %v1540_v32 = vpop.permute.xlu1 %1539  ;;  %v1751_v36 = vrot.slane %v1700_v55, 7  ;;  %v1871_v34 = vrot.slane %v10250_v25, 1  ;;  %vm10352_vm10 = vmand %vm1643_vm13, %vm1655_vm14 }
 0x28c   : > { %v1754_v39 = vrot.slane %v1702_v57, 7  ;;  %v1606_v29 = vadd.f32 %v1540_v32, %v1486_v48  ;;  %v1542_v41 = vpop.permute.xlu0 %1541  ;;  %vm1646_vm11 = vcmp.ge.s32.totalorder %v10230_v53, 0  ;;  %vm10396_vm13 = vmand %vm1644_vm4, %vm1656_vm5  ;;  %vm1647_vm14 = vcmp.ge.s32.totalorder %v10256_v28, 0 }
 0x28d   : > { %v1607_v52 = vadd.f32 %v1542_v41, %v1487_v38  ;;  %v10282_v19 = vsel %vm1747_vm2, %v1751_v36, %v1752_v15  ;;  %v10285_v48 = vsel %vm1747_vm2, 0.0, %v1751_v36  ;;  %v1872_v62 = vsel %vm1869_vm9, %v1870_v44, %v1871_v34  ;;  %vm10447_vm4 = vmand %vm1645_vm7, %vm1657_vm8 }
 0x28e   : > { %v10288_v54 = vsel %vm1747_vm2, 0.0, %v1754_v39  ;;  %v1703_v56 = vsel %vm10222_vm12, %v1606_v29, 0.0  ;;  %v1874_v45 = vsel %vm1869_vm9, %v1871_v34, %v1873_v30  ;;  %7868 = vmatprep.mubr.msk.f32.mxu0 %vm1223_vm3, %v1872_v62  ;;  %v1875_v47 = vrot.slane %v10285_v48, 1 }
 0x28f   : > { %v1755_v58 = vrot.slane %v1703_v56, 7  ;;  %v1704_v38 = vsel %vm10269_vm1, %v1607_v52, 0.0  ;;  %v1544_v0 = vpop.permute.xlu1 %1543  ;;  %v1876_v49 = vrot.slane %v10282_v19, 1  ;;  %7869 = vmatmul.mubr.msk.f32.vlgmr.msra.gmra.mrb[24].mxu0 %vm1223_vm3, %v1874_v45  ;;  %v2343_v15 = vrot.slane %v10253_v27, 2  ;;  %v834_v27 = vld [vmem:[%s10146_s23 + $0x58] sm:$0xff] }
 0x290   : > { %v1757_v4 = vrot.slane %v1704_v38, 7  ;;  %v1608_v6 = vadd.f32 %v1544_v0, %v10192_v40  ;;  %v1546_v16 = vpop.permute.xlu0 %1545  ;;  %v2341_v40 = vrot.slane %v10250_v25, 2  ;;  %8753 = vmatpush3.bf16.msra.mxu0 %v10026_v37  ;;  %v1880_v30 = vrot.slane %v10288_v54, 1  ;;  %v1839_v37 = vld [vmem:[%s12444_s10 + $0x38] sm:$0xff] }
 0x291   : > { %v10309_v17 = vsel %vm1747_vm2, %v1754_v39, %v1755_v58  ;;  %v10312_v20 = vsel %vm1747_vm2, %v1755_v58, 0.0  ;;  %v1609_v26 = vadd.f32 %v1546_v16, %v10203_v2  ;;  %v10329_v32 = vsel %vm1869_vm9, %v1875_v47, %v1876_v49  ;;  %8755 = vmatprep.subr.bf16.mxu0 %v10215_v13  ;;  %v1838_v39 = vld [vmem:[%s12444_s10 + $0x30] sm:$0xff] }
 0x292   : > { %v1705_v22 = vsel %vm10269_vm1, %v1608_v6, 0.0  ;;  %v1883_v55 = vrot.slane %v10312_v20, 1  ;;  %v10340_v29 = vsel %vm1747_vm2, 0.0, %v1757_v4  ;;  %7871 = vmatprep.mubr.msk.f32.mxu0 %vm1223_vm3, %v10329_v32  ;;  %v10346_v41 = vsel %vm1869_vm9, %v1876_v49, %v1878_v21  ;;  %v833_v47 = vld [vmem:[%s10146_s23 + $0x50] sm:$0xff] }
 0x293   : > { %v1758_v2 = vrot.slane %v1705_v22, 7  ;;  %v1706_v57 = vsel %vm10302_vm6, %v1609_v26, 0.0  ;;  %v1548_v36 = vpop.permute.xlu1 %1547  ;;  %v1881_v52 = vrot.slane %v10309_v17, 1  ;;  %7872 = vmatmul.mubr.msk.f32.gmra.mrb[26].mxu0 %vm1223_vm3, %v10346_v41  ;;  %vm1658_vm12 = vcmp.lt.s32.totalorder %v10230_v53, 16  ;;  %v6783_v22 = vld [vmem:[%s12444_s10 + $0x80] sm:$0xff] }
 0x294   : > { %v1610_v31 = vadd.f32 %v1548_v36, %v10206_v43  ;;  %v1550_v44 = vpop.permute.xlu0 %1549  ;;  %v10369_v50 = vsel %vm2339_vm15, %v2340_v46, %v2341_v40  ;;  %v1760_v38 = vrot.slane %v1706_v57, 7  ;;  %8757 = vmatpush3.bf16.msra.mxu0 %v10215_v13  ;;  %v10375_v0 = vmul.f32 %v10087_v61, %v834_v27  ;;  %vm10487_vm5 = vmand %vm1646_vm11, %vm1658_vm12 }
 0x295   : > { %v10358_v56 = vsel %vm1747_vm2, %v1757_v4, %v1758_v2  ;;  %v10361_v58 = vsel %vm1747_vm2, %v1758_v2, 0.0  ;;  %v1611_v43 = vadd.f32 %v1550_v44, %v10227_v18  ;;  %v8762_v45 = vpack.c.bf16 %v1839_v37, %v1838_v39  ;;  %8759 = vmatprep.subr.bf16.mxu0 %v10263_v33 }
 0x296   : > { %v1707_v62 = vsel %vm10302_vm6, %v1610_v31, 0.0  ;;  %v10380_v6 = vsel %vm1869_vm9, %v1880_v30, %v1881_v52  ;;  %v1885_v46 = vrot.slane %v10340_v29, 1  ;;  %v1888_v9 = vrot.slane %v10361_v58, 1 }
 0x297   : > { %v1761_v4 = vrot.slane %v1707_v62, 7  ;;  %v1708_v18 = vsel %vm10352_vm10, %v1611_v43, 0.0  ;;  %v1552_v16 = vpop.permute.xlu1 %1551  ;;  %7874 = vmatprep.mubr.msk.f32.mxu0 %vm1223_vm3, %v10380_v6  ;;  %v10390_v13 = vsel %vm1869_vm9, %v1881_v52, %v1883_v55  ;;  %v1886_v21 = vrot.slane %v10358_v56, 1  ;;  %v835_v62 = vld [vmem:[%s10146_s23 + $0x60] sm:$0xff] }
 0x298   : > { %v1612_v61 = vadd.f32 %v1552_v16, %v10213_v10  ;;  %v1554_v26 = vpop.permute.xlu0 %1553  ;;  %v6784_v10 = vld [vmem:[%s12444_s10 + $0x88] sm:$0xff]  ;;  %7875 = vmatmul.mubr.msk.f32.gmra.mrb[28].mxu0 %vm1223_vm3, %v10390_v13  ;;  %vm1659_vm1 = vcmp.lt.s32.totalorder %v10256_v28, 16  ;;  %v10419_v2 = vsel %vm2339_vm15, %v2341_v40, %v2343_v15  ;;  %v10422_v57 = vsel %vm1747_vm2, 0.0, %v1760_v38 }
 0x299   : > { %v10408_v30 = vsel %vm1747_vm2, %v1760_v38, %v1761_v4  ;;  %v10411_v60 = vsel %vm1747_vm2, %v1761_v4, 0.0  ;;  %v1613_v55 = vadd.f32 %v1554_v26, %v10241_v51  ;;  %v1763_v36 = vrot.slane %v1708_v18, 7  ;;  %8761 = vmatpush3.bf16.msra.mxu0 %v10263_v33  ;;  %v836_v15 = vld [vmem:[%s10146_s23 + $0x68] sm:$0xff]  ;;  %vm10523_vm6 = vmand %vm1647_vm14, %vm1659_vm1 }
 0x29a   : > { %v1709_v27 = vsel %vm10352_vm10, %v1612_v61, 0.0  ;;  %v1495_v39 = vmul.f32 %v10080_v59, %v833_v47  ;;  %v10431_v31 = vsel %vm1869_vm9, %v1885_v46, %v1886_v21  ;;  %8763 = vmatprep.subr.bf16.mxu0 %v8762_v45  ;;  %v10434_v44 = vpack.c.bf16 %v6784_v10, %v6783_v22 }
 0x29b   : > { %v1764_v51 = vrot.slane %v1709_v27, 7  ;;  %v1710_v37 = vsel %vm10396_vm13, %v1613_v55, 0.0  ;;  %v1556_v40 = vpop.permute.xlu1 %1555  ;;  %v1893_v34 = vrot.slane %v10411_v60, 1  ;;  %7877 = vmatprep.mubr.msk.f32.mxu0 %vm1223_vm3, %v10431_v31  ;;  %v10441_v33 = vsel %vm1869_vm9, %v1886_v21, %v1888_v9  ;;  %v837_v55 = vld [vmem:[%s10146_s23 + $0x70] sm:$0xff] }
 0x29c   : > { %v1614_v59 = vadd.f32 %v1556_v40, %v10244_v23  ;;  %v1558_v43 = vpop.permute.xlu0 %1557  ;;  %v1891_v38 = vrot.slane %v10408_v30, 1  ;;  %7878 = vmatmul.mubr.msk.f32.gmra.mrb[30].mxu0 %vm1223_vm3, %v10441_v33  ;;  %v1890_v14 = vrot.slane %v10422_v57, 1  ;;  %v10463_v16 = vsel %vm1747_vm2, 0.0, %v1763_v36 }
 0x29d   : > { %v10454_v4 = vsel %vm1747_vm2, %v1763_v36, %v1764_v51  ;;  %v10457_v23 = vsel %vm1747_vm2, %v1764_v51, 0.0  ;;  %v1615_v18 = vadd.f32 %v1558_v43, %v1495_v39  ;;  %v1766_v46 = vrot.slane %v1710_v37, 7  ;;  %8765 = vmatpush3.bf16.msra.mxu0 %v8762_v45 }
 0x29e   : > { %v1711_v47 = vsel %vm10396_vm13, %v1614_v59, 0.0  ;;  %v1498_v9 = vmul.f32 %v10097_v1, %v836_v15  ;;  %v10471_v21 = vsel %vm1869_vm9, %v1890_v14, %v1891_v38  ;;  %v1497_v10 = vmul.f32 %v10090_v63, %v835_v62  ;;  %8767 = vmatprep.subr.bf16.mxu0 %v10434_v44  ;;  %v838_v14 = vld [vmem:[%s10146_s23 + $0x78] sm:$0xff] }
 0x29f   : > { %v1767_v61 = vrot.slane %v1711_v47, 7  ;;  %v1712_v26 = vsel %vm10447_vm4, %v1615_v18, 0.0  ;;  %v1560_v22 = vpop.permute.xlu1 %1559  ;;  %v1898_v36 = vrot.slane %v10457_v23, 1  ;;  %7880 = vmatprep.mubr.msk.f32.mxu0 %vm1223_vm3, %v10471_v21  ;;  %v10481_v45 = vsel %vm1869_vm9, %v1891_v38, %v1893_v34 }
 0x2a0   : > { %v1616_v1 = vadd.f32 %v1560_v22, %v10375_v0  ;;  %v1562_v63 = vpop.permute.xlu0 %1561  ;;  %v1896_v27 = vrot.slane %v10454_v4, 1  ;;  %7881 = vmatmul.mubr.msk.f32.gmra.mrb[32].mxu0 %vm1223_vm3, %v10481_v45  ;;  %v1895_v53 = vrot.slane %v10463_v16, 1  ;;  %v10502_v37 = vsel %vm1747_vm2, 0.0, %v1766_v46 }
 0x2a1   : > { %v10493_v39 = vsel %vm1747_vm2, %v1766_v46, %v1767_v61  ;;  %v10496_v0 = vsel %vm1747_vm2, %v1767_v61, 0.0  ;;  %v1617_v51 = vadd.f32 %v1562_v63, %v1497_v10  ;;  %v1769_v40 = vrot.slane %v1712_v26, 7 }
 0x2a2   : > { %v1713_v15 = vsel %vm10447_vm4, %v1616_v1, 0.0  ;;  %v1499_v34 = vmul.f32 %v10100_v3, %v837_v55  ;;  %v1903_v59 = vrot.slane %v10496_v0, 1  ;;  %v10511_v62 = vsel %vm1869_vm9, %v1895_v53, %v1896_v27 }
 0x2a3   : > { %v1770_v43 = vrot.slane %v1713_v15, 7  ;;  %v1714_v38 = vsel %vm10487_vm5, %v1617_v51, 0.0  ;;  %v1564_v18 = vpop.permute.xlu1 %1563  ;;  %7883 = vmatprep.mubr.msk.f32.mxu0 %vm1223_vm3, %v10511_v62  ;;  %v10517_v47 = vsel %vm1869_vm9, %v1896_v27, %v1898_v36  ;;  %v1901_v26 = vrot.slane %v10493_v39, 1 }
 0x2a4   : > { %v1772_v46 = vrot.slane %v1714_v38, 7  ;;  %v1618_v52 = vadd.f32 %v1564_v18, %v1498_v9  ;;  %v1566_v61 = vpop.permute.xlu0 %1565  ;;  %7884 = vmatmul.mubr.msk.f32.gmra.mrb[34].mxu0 %vm1223_vm3, %v10517_v47  ;;  %v1900_v10 = vrot.slane %v10502_v37, 1  ;;  %v10544_v55 = vsel %vm1747_vm2, 0.0, %v1769_v40  ;;  %v839_v18 = vld [vmem:[%s10532_s24] sm:$0xff] }
 0x2a5   : > { %v10535_v9 = vsel %vm1747_vm2, %v1769_v40, %v1770_v43  ;;  %v10538_v22 = vsel %vm1747_vm2, %v1770_v43, 0.0  ;;  %v1619_v28 = vadd.f32 %v1566_v61, %v1499_v34  ;;  %v1500_v63 = vmul.f32 %v10107_v5, %v838_v14  ;;  %v840_v40 = vld [vmem:[%s10532_s24 + $0x8] sm:$0xff] }
 0x2a6   : > { %v1908_v36 = vrot.slane %v10538_v22, 1  ;;  %v1715_v1 = vsel %vm10487_vm5, %v1618_v52, 0.0  ;;  %v10551_v27 = vsel %vm1747_vm2, 0.0, %v1772_v46  ;;  %v10556_v15 = vsel %vm1869_vm9, %v1900_v10, %v1901_v26 }
 0x2a7   : > { %v1773_v51 = vrot.slane %v1715_v1, 7  ;;  %v1716_v53 = vsel %vm10523_vm6, %v1619_v28, 0.0  ;;  %v1568_v34 = vpop.permute.xlu1 %1567  ;;  %7886 = vmatprep.mubr.msk.f32.mxu0 %vm1223_vm3, %v10556_v15  ;;  %v10562_v38 = vsel %vm1869_vm9, %v1901_v26, %v1903_v59  ;;  %v1906_v5 = vrot.slane %v10535_v9, 1 }
 0x2a8   : > { %v1775_v43 = vrot.slane %v1716_v53, 7  ;;  %v1620_v49 = vadd.f32 %v1568_v34, %v1500_v63  ;;  %7887 = vmatmul.mubr.msk.f32.gmra.mrb[36].mxu0 %vm1223_vm3, %v10562_v38  ;;  %v1905_v61 = vrot.slane %v10544_v55, 1  ;;  %v1636_v28 = vadd.s32 10, %v10132_v42  ;;  %v1570_v34 = vpop.permute.xlu0 %1569 }
 0x2a9   : > { %v10567_v14 = vsel %vm1747_vm2, %v1772_v46, %v1773_v51  ;;  %v10570_v52 = vsel %vm1747_vm2, %v1773_v51, 0.0  ;;  %v1502_v26 = vmul.f32 %v10115_v8, %v840_v40  ;;  %v1501_v46 = vmul.f32 %v10110_v7, %v839_v18 }
 0x2aa   : > { %v1717_v59 = vsel %vm10523_vm6, %v1620_v49, 0.0  ;;  %v10580_v1 = vsel %vm1869_vm9, %v1905_v61, %v1906_v5  ;;  %v1910_v63 = vrot.slane %v10551_v27, 1  ;;  %v1913_v51 = vrot.slane %v10570_v52, 1 }
 0x2ab   : > { %v1776_v10 = vrot.slane %v1717_v59, 7  ;;  %v10586_v53 = vsel %vm1747_vm2, 0.0, %v1775_v43  ;;  %7889 = vmatprep.mubr.msk.f32.mxu0 %vm1223_vm3, %v10580_v1  ;;  %v10591_v3 = vsel %vm1869_vm9, %v1906_v5, %v1908_v36  ;;  %v1572_v8 = vpop.permute.xlu1 %1571  ;;  %v1911_v40 = vrot.slane %v10567_v14, 1 }
 0x2ac   : > { %7890 = vmatmul.mubr.msk.f32.gmra.mrb[38].mxu0 %vm1223_vm3, %v10591_v3  ;;  %vm1648_vm7 = vcmp.ge.s32.totalorder %v1636_v28, 0  ;;  %vm1660_vm8 = vcmp.lt.s32.totalorder %v1636_v28, 16  ;;  %v1622_v36 = vadd.f32 %v1572_v8, %v1502_v26  ;;  %v1621_v5 = vadd.f32 %v1570_v34, %v1501_v46  ;;  %v6785_v8 = vld [vmem:[%s12444_s10 + $0x90] sm:$0xff] }
 0x2ad   : > { %v10595_v49 = vsel %vm1747_vm2, %v1775_v43, %v1776_v10  ;;  %v10598_v7 = vsel %vm1747_vm2, %v1776_v10, 0.0  ;;  %v10603_v18 = vsel %vm1869_vm9, %v1910_v63, %v1911_v40  ;;  %v1915_v61 = vrot.slane %v10586_v53, 1  ;;  %vm1672_vm10 = vmand %vm1648_vm7, %vm1660_vm8 }
 0x2ae   : > { %7892 = vmatprep.mubr.msk.f32.mxu0 %vm1223_vm3, %v10603_v18  ;;  %v1916_v43 = vrot.slane %v10595_v49, 1  ;;  %v1918_v59 = vrot.slane %v10598_v7, 1  ;;  %v10611_v10 = vsel %vm1869_vm9, %v1911_v40, %v1913_v51  ;;  %v1719_v26 = vsel %vm1672_vm10, %v1622_v36, 0.0  ;;  %v6786_v51 = vld [vmem:[%s12444_s10 + $0x98] sm:$0xff] }
 0x2af   : > { %v1718_v46 = vsel %vm1672_vm10, %v1621_v5, 0.0  ;;  %v10631_v34 = vrot.slane %v1719_v26, 7  ;;  %v8770_v36 = vpack.c.bf16 %v6786_v51, %v6785_v8  ;;  %v6787_v5 = vld [vmem:[%s12444_s10 + $0xa0] sm:$0xff]  ;;  %v6813_v51 = vld [vmem:[%s12444_s10 + $0xd0] sm:$0xff]  ;;  %v2366_v11 = vrot.slane %v10454_v4, 2 }
 0x2b0   : > { %7893 = vmatmul.mubr.msk.f32.gmra.mrb[40].mxu0 %vm1223_vm3, %v10611_v10  ;;  %v10616_v28 = vsel %vm1869_vm9, %v1915_v61, %v1916_v43  ;;  %v10621_v63 = vsel %vm1869_vm9, %v1916_v43, %v1918_v59  ;;  %v10633_v40 = vrot.slane %v1718_v46, 7  ;;  %v6788_v61 = vld [vmem:[%s12444_s10 + $0xa8] sm:$0xff]  ;;  %v6789_v59 = vld [vmem:[%s12444_s10 + $0xb0] sm:$0xff]  ;;  %v6811_v26 = vld [vmem:[%s12444_s10 + $0xc0] sm:$0xff]  ;;  %v2383_v42 = vrot.slane %v10570_v52, 2 }
 0x2b1   : > { %7895 = vmatprep.mubr.msk.f32.mxu0 %vm1223_vm3, %v10616_v28  ;;  %v8774_v43 = vpack.c.bf16 %v6788_v61, %v6787_v5  ;;  %v6812_v46 = vld [vmem:[%s12444_s10 + $0xc8] sm:$0xff]  ;;  %v2345_v5 = vrot.slane %v10285_v48, 2  ;;  %v2346_v61 = vrot.slane %v10282_v19, 2 }
 0x2b2   : > { %v8782_v8 = vpack.c.bf16 %v6812_v46, %v6811_v26  ;;  %v2351_v26 = vrot.slane %v10309_v17, 2  ;;  %v2348_v46 = vrot.slane %v10277_v35, 2  ;;  %v6818_v35 = vld [vmem:[%s12444_s10 + $0xf8] sm:$0xff] }
 0x2b4   : > { %7896 = vmatmul.mubr.msk.f32.gmra.mrb[42].mxu0 %vm1223_vm3, %v10621_v63  ;;  %v10727_v12 = vsel %vm2339_vm15, %v2346_v61, %v2348_v46  ;;  %v6839_v46 = vld [vmem:[%s12444_s10 + $0x100] sm:$0xff] }
 0x2b5   : > { %7914 = vmatprep.mubr.msk.f32.mxu0 %vm1223_vm3, %v10247_v24  ;;  %v10651_v24 = vsel %vm1747_vm2, %v10633_v40, %v10631_v34 }
 0x2b8   : > { %7915 = vmatmul.mubr.msk.f32.vlgmr.msra.gmra.mrb[24].mxu0 %vm1223_vm3, %v10250_v25  ;;  %v6790_v25 = vld [vmem:[%s12444_s10 + $0xb8] sm:$0xff] }
 0x2b9   : > { %8769 = vmatpush3.bf16.msra.mxu0 %v10434_v44  ;;  %7917 = vmatprep.mubr.msk.f32.mxu0 %vm1223_vm3, %v10285_v48  ;;  %v8778_v44 = vpack.c.bf16 %v6790_v25, %v6789_v59  ;;  %v6815_v59 = vld [vmem:[%s12444_s10 + $0xe0] sm:$0xff]  ;;  %v6816_v25 = vld [vmem:[%s12444_s10 + $0xe8] sm:$0xff] }
 0x2ba   : > { %8771 = vmatprep.subr.bf16.mxu0 %v8770_v36 }
 0x2bc   : > { %7918 = vmatmul.mubr.msk.f32.gmra.mrb[26].mxu0 %vm1223_vm3, %v10282_v19 }
 0x2bd   : > { %7920 = vmatprep.mubr.msk.f32.mxu0 %vm1223_vm3, %v10288_v54  ;;  %8773 = vmatpush3.bf16.msra.mxu0 %v8770_v36  ;;  %v6814_v36 = vld [vmem:[%s12444_s10 + $0xd8] sm:$0xff] }
 0x2be   : > { %8775 = vmatprep.subr.bf16.mxu0 %v8774_v43 }
 0x2c0   : > { %7921 = vmatmul.mubr.msk.f32.gmra.mrb[28].mxu0 %vm1223_vm3, %v10309_v17 }
 0x2c1   : > { %7923 = vmatprep.mubr.msk.f32.mxu0 %vm1223_vm3, %v10340_v29  ;;  %8777 = vmatpush3.bf16.msra.mxu0 %v8774_v43  ;;  %v8786_v43 = vpack.c.bf16 %v6814_v36, %v6813_v51  ;;  %v8790_v51 = vpack.c.bf16 %v6816_v25, %v6815_v59  ;;  %v2353_v36 = vrot.slane %v10312_v20, 2  ;;  %v2355_v20 = vrot.slane %v10340_v29, 2 }
 0x2c2   : > { %8779 = vmatprep.subr.bf16.mxu0 %v8778_v44  ;;  %v2358_v59 = vrot.slane %v10361_v58, 2  ;;  %v2360_v58 = vrot.slane %v10422_v57, 2 }
 0x2c3   : > { %v10746_v25 = vsel %vm2339_vm15, %v2351_v26, %v2353_v36  ;;  %v2363_v36 = vrot.slane %v10411_v60, 2  ;;  %v2368_v60 = vrot.slane %v10457_v23, 2 }
 0x2c4   : > { %7924 = vmatmul.mubr.msk.f32.gmra.mrb[30].mxu0 %vm1223_vm3, %v10358_v56 }
 0x2c5   : > { %7926 = vmatprep.mubr.msk.f32.mxu0 %vm1223_vm3, %v10422_v57  ;;  %8781 = vmatpush3.bf16.msra.mxu0 %v8778_v44  ;;  %v10718_v44 = vsel %vm2339_vm15, %v2345_v5, %v2346_v61  ;;  %v2356_v5 = vrot.slane %v10358_v56, 2  ;;  %v10791_v23 = vsel %vm2339_vm15, %v2366_v11, %v2368_v60  ;;  %v2381_v60 = vrot.slane %v10567_v14, 2 }
 0x2c6   : > { %8783 = vmatprep.subr.bf16.mxu0 %v8782_v8 }
 0x2c7   : > { %v10830_v52 = vsel %vm2339_vm15, %v2381_v60, %v2383_v42  ;;  %v6842_v42 = vld [vmem:[%s12444_s10 + $0x118] sm:$0xff] }
 0x2c8   : > { %7927 = vmatmul.mubr.msk.f32.gmra.mrb[32].mxu0 %vm1223_vm3, %v10408_v30 }
 0x2c9   : > { %7929 = vmatprep.mubr.msk.f32.mxu0 %vm1223_vm3, %v10463_v16 }
 0x2cc   : > { %7930 = vmatmul.mubr.msk.f32.gmra.mrb[34].mxu0 %vm1223_vm3, %v10454_v4 }
 0x2cd   : > { %7932 = vmatprep.mubr.msk.f32.mxu0 %vm1223_vm3, %v10502_v37 }
 0x2d0   : > { %7933 = vmatmul.mubr.msk.f32.gmra.mrb[36].mxu0 %vm1223_vm3, %v10493_v39 }
 0x2d1   : > { %7935 = vmatprep.mubr.msk.f32.mxu0 %vm1223_vm3, %v10544_v55 }
 0x2d4   : > { %7936 = vmatmul.mubr.msk.f32.gmra.mrb[38].mxu0 %vm1223_vm3, %v10535_v9 }
 0x2d5   : > { %7938 = vmatprep.mubr.msk.f32.mxu0 %vm1223_vm3, %v10551_v27 }
 0x2d8   : > { %7939 = vmatmul.mubr.msk.f32.gmra.mrb[40].mxu0 %vm1223_vm3, %v10567_v14 }
 0x2d9   : > { %7941 = vmatprep.mubr.msk.f32.mxu0 %vm1223_vm3, %v10586_v53 }
 0x2dc   : > { %7942 = vmatmul.mubr.msk.f32.gmra.mrb[42].mxu0 %vm1223_vm3, %v10595_v49 }
 0x2dd   : > { %7960 = vmatprep.mubr.msk.f32.mxu0 %vm1223_vm3, %v10369_v50  ;;  %v2350_v50 = vrot.slane %v10288_v54, 2 }
 0x2e0   : > { %7961 = vmatmul.mubr.msk.f32.vlgmr.msra.gmra.mrb[24].mxu0 %vm1223_vm3, %v10419_v2  ;;  %v6817_v2 = vld [vmem:[%s12444_s10 + $0xf0] sm:$0xff] }
 0x2e1   : > { %8785 = vmatpush3.bf16.msra.mxu0 %v8782_v8  ;;  %7963 = vmatprep.mubr.msk.f32.mxu0 %vm1223_vm3, %v10718_v44  ;;  %v10738_v8 = vsel %vm2339_vm15, %v2350_v50, %v2351_v26  ;;  %v8794_v61 = vpack.c.bf16 %v6818_v35, %v6817_v2  ;;  %v6840_v50 = vld [vmem:[%s12444_s10 + $0x108] sm:$0xff]  ;;  %v2361_v2 = vrot.slane %v10408_v30, 2  ;;  %v10765_v35 = vsel %vm2339_vm15, %v2356_v5, %v2358_v59 }
 0x2e2   : > { %8787 = vmatprep.subr.bf16.mxu0 %v8786_v43  ;;  %v8798_v26 = vpack.c.bf16 %v6840_v50, %v6839_v46  ;;  %v2371_v46 = vrot.slane %v10493_v39, 2  ;;  %v2373_v50 = vrot.slane %v10496_v0, 2 }
 0x2e4   : > { %7964 = vmatmul.mubr.msk.f32.gmra.mrb[26].mxu0 %vm1223_vm3, %v10727_v12  ;;  %v10804_v0 = vsel %vm2339_vm15, %v2371_v46, %v2373_v50  ;;  %v2386_v50 = vrot.slane %v10595_v49, 2 }
 0x2e5   : > { %7966 = vmatprep.mubr.msk.f32.mxu0 %vm1223_vm3, %v10738_v8  ;;  %8789 = vmatpush3.bf16.msra.mxu0 %v8786_v43  ;;  %v10757_v43 = vsel %vm2339_vm15, %v2355_v20, %v2356_v5  ;;  %v10770_v20 = vsel %vm2339_vm15, %v2360_v58, %v2361_v2  ;;  %v10778_v5 = vsel %vm2339_vm15, %v2361_v2, %v2363_v36  ;;  %v2376_v58 = vrot.slane %v10535_v9, 2 }
 0x2e6   : > { %8791 = vmatprep.subr.bf16.mxu0 %v8790_v51  ;;  %v2375_v36 = vrot.slane %v10544_v55, 2 }
 0x2e8   : > { %7967 = vmatmul.mubr.msk.f32.gmra.mrb[28].mxu0 %vm1223_vm3, %v10746_v25 }
 0x2e9   : > { %7969 = vmatprep.mubr.msk.f32.mxu0 %vm1223_vm3, %v10757_v43  ;;  %8793 = vmatpush3.bf16.msra.mxu0 %v8790_v51  ;;  %v2365_v51 = vrot.slane %v10463_v16, 2 }
 0x2ea   : > { %8795 = vmatprep.subr.bf16.mxu0 %v8794_v61 }
 0x2eb   : > { %v10783_v59 = vsel %vm2339_vm15, %v2365_v51, %v2366_v11  ;;  %v2378_v51 = vrot.slane %v10538_v22, 2  ;;  %v10809_v11 = vsel %vm2339_vm15, %v2375_v36, %v2376_v58  ;;  %v2385_v36 = vrot.slane %v10586_v53, 2 }
 0x2ec   : > { %7970 = vmatmul.mubr.msk.f32.gmra.mrb[30].mxu0 %vm1223_vm3, %v10765_v35  ;;  %12527 = vst [vmem:[#allocation22_spill] sm:$0xff] %v10809_v11 }
 0x2ed   : > { %7972 = vmatprep.mubr.msk.f32.mxu0 %vm1223_vm3, %v10770_v20  ;;  %8797 = vmatpush3.bf16.msra.mxu0 %v8794_v61  ;;  %v2370_v61 = vrot.slane %v10502_v37, 2  ;;  %v10817_v22 = vsel %vm2339_vm15, %v2376_v58, %v2378_v51  ;;  %v10835_v58 = vsel %vm2339_vm15, %v2385_v36, %v2386_v50  ;;  %v6846_v36 = vld [vmem:[%s12444_s10 + $0x138] sm:$0xff] }
 0x2ee   : > { %8799 = vmatprep.subr.bf16.mxu0 %v8798_v26 }
 0x2ef   : > { %v10796_v2 = vsel %vm2339_vm15, %v2370_v61, %v2371_v46  ;;  %v2380_v61 = vrot.slane %v10551_v27, 2 }
 0x2f0   : > { %7973 = vmatmul.mubr.msk.f32.gmra.mrb[32].mxu0 %vm1223_vm3, %v10778_v5 }
 0x2f1   : > { %7975 = vmatprep.mubr.msk.f32.mxu0 %vm1223_vm3, %v10783_v59  ;;  %v10822_v46 = vsel %vm2339_vm15, %v2380_v61, %v2381_v60  ;;  %v6841_v61 = vld [vmem:[%s12444_s10 + $0x110] sm:$0xff]  ;;  %v6844_v60 = vld [vmem:[%s12444_s10 + $0x128] sm:$0xff] }
 0x2f4   : > { %7976 = vmatmul.mubr.msk.f32.gmra.mrb[34].mxu0 %vm1223_vm3, %v10791_v23 }
 0x2f5   : > { %7978 = vmatprep.mubr.msk.f32.mxu0 %vm1223_vm3, %v10796_v2 }
 0x2f8   : > { %7979 = vmatmul.mubr.msk.f32.gmra.mrb[36].mxu0 %vm1223_vm3, %v10804_v0 }
 0x2f9   : > { %7981 = vmatprep.mubr.msk.f32.mxu0 %vm1223_vm3, %v10809_v11  ;;  %v2388_v11 = vrot.slane %v10598_v7, 2  ;;  %v8802_v7 = vpack.c.bf16 %v6842_v42, %v6841_v61  ;;  %v6868_v61 = vld [vmem:[%s12444_s10 + $0x148] sm:$0xff] }
 0x2fb   : > { %v10840_v51 = vsel %vm2339_vm15, %v2386_v50, %v2388_v11  ;;  %v6843_v11 = vld [vmem:[%s12444_s10 + $0x120] sm:$0xff] }
 0x2fc   : > { %7982 = vmatmul.mubr.msk.f32.gmra.mrb[38].mxu0 %vm1223_vm3, %v10817_v22  ;;  %v8806_v50 = vpack.c.bf16 %v6844_v60, %v6843_v11  ;;  %v6869_v11 = vld [vmem:[%s12444_s10 + $0x150] sm:$0xff]  ;;  %v6870_v60 = vld [vmem:[%s12444_s10 + $0x158] sm:$0xff] }
 0x2fd   : > { %7984 = vmatprep.mubr.msk.f32.mxu0 %vm1223_vm3, %v10822_v46 }
 0x300   : > { %7985 = vmatmul.mubr.msk.f32.gmra.mrb[40].mxu0 %vm1223_vm3, %v10830_v52 }
 0x301   : > { %7987 = vmatprep.mubr.msk.f32.mxu0 %vm1223_vm3, %v10835_v58 }
 0x304   : > { %7988 = vmatmul.mubr.msk.f32.gmra.mrb[42].mxu0 %vm1223_vm3, %v10840_v51 }
 0x305   : > { %8006 = vmatprep.mubr.msk.f32.mxu0 %vm1223_vm3, %v10285_v48  ;;  %v6845_v48 = vld [vmem:[%s12444_s10 + $0x130] sm:$0xff] }
 0x308   : > { %8007 = vmatmul.mubr.msk.f32.vlgmr.msra.gmra.mrb[24].mxu0 %vm1223_vm3, %v10282_v19  ;;  %v8810_v19 = vpack.c.bf16 %v6846_v36, %v6845_v48  ;;  %v6872_v48 = vld [vmem:[%s12444_s10 + $0x168] sm:$0xff] }
 0x309   : > { %8801 = vmatpush3.bf16.msra.mxu0 %v8798_v26  ;;  %8009 = vmatprep.mubr.msk.f32.mxu0 %vm1223_vm3, %v10288_v54  ;;  %v6867_v26 = vld [vmem:[%s12444_s10 + $0x140] sm:$0xff] }
 0x30a   : > { %8803 = vmatprep.subr.bf16.mxu0 %v8802_v7  ;;  %v8814_v42 = vpack.c.bf16 %v6868_v61, %v6867_v26  ;;  %v6895_v26 = vld [vmem:[%s12444_s10 + $0x180] sm:$0xff]  ;;  %v6896_v61 = vld [vmem:[%s12444_s10 + $0x188] sm:$0xff] }
 0x30c   : > { %8010 = vmatmul.mubr.msk.f32.gmra.mrb[26].mxu0 %vm1223_vm3, %v10309_v17 }
 0x30d   : > { %8012 = vmatprep.mubr.msk.f32.mxu0 %vm1223_vm3, %v10340_v29  ;;  %8805 = vmatpush3.bf16.msra.mxu0 %v8802_v7  ;;  %v10906_v7 = vsel %vm1747_vm2, 0.0, %v10633_v40  ;;  %v6871_v40 = vld [vmem:[%s12444_s10 + $0x160] sm:$0xff] }
 0x30e   : > { %8807 = vmatprep.subr.bf16.mxu0 %v8806_v50  ;;  %v8822_v36 = vpack.c.bf16 %v6872_v48, %v6871_v40  ;;  %v3873_v40 = vld [vmem:[%s12446_s12] sm:$0xff]  ;;  %v3874_v48 = vld [vmem:[%s12446_s12 + $0x8] sm:$0xff] }
 0x310   : > { %8013 = vmatmul.mubr.msk.f32.gmra.mrb[28].mxu0 %vm1223_vm3, %v10358_v56 }
 0x311   : > { %8015 = vmatprep.mubr.msk.f32.mxu0 %vm1223_vm3, %v10422_v57  ;;  %8809 = vmatpush3.bf16.msra.mxu0 %v8806_v50  ;;  %v8818_v50 = vpack.c.bf16 %v6870_v60, %v6869_v11  ;;  %v10968_v11 = vsel %vm1747_vm2, %v10631_v34, 0.0  ;;  %v2824_v60 = vrot.slane %v10906_v7, 1  ;;  %v10982_v34 = vpack.c.bf16 %v3874_v48, %v3873_v40  ;;  %v6902_v48 = vld [vmem:[%s12444_s10 + $0x1b8] sm:$0xff] }
 0x312   : > { %8811 = vmatprep.subr.bf16.mxu0 %v8810_v19 }
 0x313   : > { %9046 = vmatprep.subr.bf16.mxu1 %v10982_v34 }
 0x314   : > { %8016 = vmatmul.mubr.msk.f32.gmra.mrb[30].mxu0 %vm1223_vm3, %v10408_v30  ;;  %9048 = vmatpush3.bf16.msra.mxu1 %v10982_v34 }
 0x315   : > { %8018 = vmatprep.mubr.msk.f32.mxu0 %vm1223_vm3, %v10463_v16  ;;  %8813 = vmatpush3.bf16.msra.mxu0 %v8810_v19  ;;  %v6874_v19 = vld [vmem:[%s12444_s10 + $0x178] sm:$0xff] }
 0x316   : > { %8815 = vmatprep.subr.bf16.mxu0 %v8814_v42 }
 0x318   : > { %8019 = vmatmul.mubr.msk.f32.gmra.mrb[32].mxu0 %vm1223_vm3, %v10454_v4 }
 0x319   : > { %8021 = vmatprep.mubr.msk.f32.mxu0 %vm1223_vm3, %v10502_v37 }
 0x31c   : > { %8022 = vmatmul.mubr.msk.f32.gmra.mrb[34].mxu0 %vm1223_vm3, %v10493_v39 }
 0x31d   : > { %8024 = vmatprep.mubr.msk.f32.mxu0 %vm1223_vm3, %v10544_v55 }
 0x320   : > { %8025 = vmatmul.mubr.msk.f32.gmra.mrb[36].mxu0 %vm1223_vm3, %v10535_v9 }
 0x321   : > { %8027 = vmatprep.mubr.msk.f32.mxu0 %vm1223_vm3, %v10551_v27 }
 0x324   : > { %8028 = vmatmul.mubr.msk.f32.gmra.mrb[38].mxu0 %vm1223_vm3, %v10567_v14 }
 0x325   : > { %8030 = vmatprep.mubr.msk.f32.mxu0 %vm1223_vm3, %v10586_v53 }
 0x328   : > { %8031 = vmatmul.mubr.msk.f32.gmra.mrb[40].mxu0 %vm1223_vm3, %v10595_v49 }
 0x329   : > { %8033 = vmatprep.mubr.msk.f32.mxu0 %vm1223_vm3, %v10906_v7 }
 0x32c   : > { %8034 = vmatmul.mubr.msk.f32.gmra.mrb[42].mxu0 %vm1223_vm3, %v10651_v24 }
 0x32d   : > { %8052 = vmatprep.mubr.msk.f32.mxu0 %vm1223_vm3, %v10329_v32  ;;  %v6873_v32 = vld [vmem:[%s12444_s10 + $0x170] sm:$0xff] }
 0x330   : > { %8053 = vmatmul.mubr.msk.f32.vlgmr.msra.gmra.mrb[24].mxu0 %vm1223_vm3, %v10346_v41  ;;  %v8826_v41 = vpack.c.bf16 %v6874_v19, %v6873_v32 }
 0x331   : > { %8817 = vmatpush3.bf16.msra.mxu0 %v8814_v42  ;;  %8055 = vmatprep.mubr.msk.f32.mxu0 %vm1223_vm3, %v10380_v6  ;;  %v8830_v42 = vpack.c.bf16 %v6896_v61, %v6895_v26  ;;  %v6898_v26 = vld [vmem:[%s12444_s10 + $0x198] sm:$0xff] }
 0x332   : > { %8819 = vmatprep.subr.bf16.mxu0 %v8818_v50 }
 0x334   : > { %8056 = vmatmul.mubr.msk.f32.gmra.mrb[26].mxu0 %vm1223_vm3, %v10390_v13 }
 0x335   : > { %8058 = vmatprep.mubr.msk.f32.mxu0 %vm1223_vm3, %v10431_v31  ;;  %8821 = vmatpush3.bf16.msra.mxu0 %v8818_v50  ;;  %v2825_v50 = vrot.slane %v10651_v24, 1 }
 0x336   : > { %8823 = vmatprep.subr.bf16.mxu0 %v8822_v36 }
 0x337   : > { %v10988_v32 = vsel %vm1869_vm9, %v2824_v60, %v2825_v50  ;;  %v6899_v60 = vld [vmem:[%s12444_s10 + $0x1a0] sm:$0xff] }
 0x338   : > { %8059 = vmatmul.mubr.msk.f32.gmra.mrb[28].mxu0 %vm1223_vm3, %v10441_v33 }
 0x339   : > { %8061 = vmatprep.mubr.msk.f32.mxu0 %vm1223_vm3, %v10471_v21  ;;  %8825 = vmatpush3.bf16.msra.mxu0 %v8822_v36  ;;  %v2827_v36 = vrot.slane %v10968_v11, 1 }
 0x33a   : > { %8827 = vmatprep.subr.bf16.mxu0 %v8826_v41 }
 0x33b   : > { %v10995_v19 = vsel %vm1869_vm9, %v2825_v50, %v2827_v36  ;;  %v6900_v50 = vld [vmem:[%s12444_s10 + $0x1a8] sm:$0xff] }
 0x33c   : > { %8062 = vmatmul.mubr.msk.f32.gmra.mrb[30].mxu0 %vm1223_vm3, %v10481_v45  ;;  %v8838_v40 = vpack.c.bf16 %v6900_v50, %v6899_v60  ;;  %v6924_v36 = vld [vmem:[%s12444_s10 + $0x1c8] sm:$0xff]  ;;  %v9425_v50 = vld [vmem:[%s9851_s21 + $0x18] sm:$0xff] }
 0x33d   : > { %8064 = vmatprep.mubr.msk.f32.mxu0 %vm1223_vm3, %v10511_v62  ;;  %8829 = vmatpush3.bf16.msra.mxu0 %v8826_v41  ;;  %v6897_v41 = vld [vmem:[%s12444_s10 + $0x190] sm:$0xff] }
 0x33e   : > { %8831 = vmatprep.subr.bf16.mxu0 %v8830_v42  ;;  %v8834_v61 = vpack.c.bf16 %v6898_v26, %v6897_v41  ;;  %v3875_v41 = vld [vmem:[%s12446_s12 + $0x10] sm:$0xff]  ;;  %v3876_v26 = vld [vmem:[%s12446_s12 + $0x18] sm:$0xff] }
 0x33f   : > { %v11043_v60 = vpack.c.bf16 %v3876_v26, %v3875_v41  ;;  %v3027_v41 = vrot.slane %v10906_v7, 2  ;;  %v3028_v26 = vrot.slane %v10651_v24, 2 }
 0x340   : > { %8065 = vmatmul.mubr.msk.f32.gmra.mrb[32].mxu0 %vm1223_vm3, %v10517_v47 }
 0x341   : > { %8067 = vmatprep.mubr.msk.f32.mxu0 %vm1223_vm3, %v10556_v15  ;;  %9047 = vmatprep.subr.bf16.mxu1 %v11043_v60 }
 0x342   : > { %9049 = vmatpush3.bf16.msra.mxu1 %v11043_v60 }
 0x344   : > { %8068 = vmatmul.mubr.msk.f32.gmra.mrb[34].mxu0 %vm1223_vm3, %v10562_v38 }
 0x345   : > { %8070 = vmatprep.mubr.msk.f32.mxu0 %vm1223_vm3, %v10580_v1  ;;  %8281 = vmatmul.mubr.msk.f32.vlgmr.msra.gmra.mrb[24].mxu1 %vm887_vm0, %v9425_v50  ;;  %v9431_v50 = vld [vmem:[%s9851_s21 + $0x48] sm:$0xff] }
 0x348   : > { %8071 = vmatmul.mubr.msk.f32.gmra.mrb[36].mxu0 %vm1223_vm3, %v10591_v3 }
 0x349   : > { %8073 = vmatprep.mubr.msk.f32.mxu0 %vm1223_vm3, %v10603_v18 }
 0x34c   : > { %8074 = vmatmul.mubr.msk.f32.gmra.mrb[38].mxu0 %vm1223_vm3, %v10611_v10 }
 0x34d   : > { %8076 = vmatprep.mubr.msk.f32.mxu0 %vm1223_vm3, %v10616_v28 }
 0x350   : > { %8077 = vmatmul.mubr.msk.f32.gmra.mrb[40].mxu0 %vm1223_vm3, %v10621_v63 }
 0x351   : > { %8079 = vmatprep.mubr.msk.f32.mxu0 %vm1223_vm3, %v10988_v32 }
 0x354   : > { %8080 = vmatmul.mubr.msk.f32.gmra.mrb[42].mxu0 %vm1223_vm3, %v10995_v19 }
 0x355   : > { %8098 = vmatprep.mubr.msk.f32.mxu0 %vm1223_vm3, %v10718_v44  ;;  %v6901_v44 = vld [vmem:[%s12444_s10 + $0x1b0] sm:$0xff] }
 0x358   : > { %8099 = vmatmul.mubr.msk.f32.vlgmr.msra.gmra.mrb[24].mxu0 %vm1223_vm3, %v10727_v12  ;;  %v8842_v12 = vpack.c.bf16 %v6902_v48, %v6901_v44  ;;  %v12528_v44 = vld [vmem:[#allocation22_spill] sm:$0xff]  ;;  %v9427_v48 = vld [vmem:[%s9851_s21 + $0x28] sm:$0xff] }
 0x359   : > { %8833 = vmatpush3.bf16.msra.mxu0 %v8830_v42  ;;  %8101 = vmatprep.mubr.msk.f32.mxu0 %vm1223_vm3, %v10738_v8  ;;  %v6923_v42 = vld [vmem:[%s12444_s10 + $0x1c0] sm:$0xff] }
 0x35a   : > { %8835 = vmatprep.subr.bf16.mxu0 %v8834_v61 }
 0x35c   : > { %8102 = vmatmul.mubr.msk.f32.gmra.mrb[26].mxu0 %vm1223_vm3, %v10746_v25 }
 0x35d   : > { %8104 = vmatprep.mubr.msk.f32.mxu0 %vm1223_vm3, %v10757_v43  ;;  %8837 = vmatpush3.bf16.msra.mxu0 %v8834_v61  ;;  %v8846_v61 = vpack.c.bf16 %v6924_v36, %v6923_v42  ;;  %v9429_v42 = vld [vmem:[%s9851_s21 + $0x38] sm:$0xff]  ;;  %v9430_v36 = vld [vmem:[%s9851_s21 + $0x40] sm:$0xff] }
 0x35e   : > { %8839 = vmatprep.subr.bf16.mxu0 %v8838_v40 }
 0x360   : > { %8105 = vmatmul.mubr.msk.f32.gmra.mrb[28].mxu0 %vm1223_vm3, %v10765_v35 }
 0x361   : > { %8107 = vmatprep.mubr.msk.f32.mxu0 %vm1223_vm3, %v10770_v20  ;;  %8841 = vmatpush3.bf16.msra.mxu0 %v8838_v40  ;;  %v9426_v40 = vld [vmem:[%s9851_s21 + $0x20] sm:$0xff] }
 0x362   : > { %8843 = vmatprep.subr.bf16.mxu0 %v8842_v12  ;;  %8283 = vmatprep.mubr.msk.f32.mxu1 %vm887_vm0, %v9426_v40  ;;  %v9432_v40 = vld [vmem:[%s9851_s21 + $0x50] sm:$0xff] }
 0x363   : > { %8284 = vmatmul.mubr.msk.f32.gmra.mrb[26].mxu1 %vm887_vm0, %v9427_v48  ;;  %v3030_v48 = vrot.slane %v10968_v11, 2  ;;  %v6925_v11 = vld [vmem:[%s12444_s10 + $0x1d0] sm:$0xff] }
 0x364   : > { %8108 = vmatmul.mubr.msk.f32.gmra.mrb[30].mxu0 %vm1223_vm3, %v10778_v5 }
 0x365   : > { %8110 = vmatprep.mubr.msk.f32.mxu0 %vm1223_vm3, %v10783_v59  ;;  %8845 = vmatpush3.bf16.msra.mxu0 %v8842_v12  ;;  %v9428_v12 = vld [vmem:[%s9851_s21 + $0x30] sm:$0xff] }
 0x366   : > { %8847 = vmatprep.subr.bf16.mxu0 %v8846_v61  ;;  %8286 = vmatprep.mubr.msk.f32.mxu1 %vm887_vm0, %v9428_v12  ;;  %v11089_v12 = vsel %vm2339_vm15, %v3027_v41, %v3028_v26  ;;  %v6926_v41 = vld [vmem:[%s12444_s10 + $0x1d8] sm:$0xff] }
 0x367   : > { %8287 = vmatmul.mubr.msk.f32.gmra.mrb[28].mxu1 %vm887_vm0, %v9429_v42  ;;  %v9433_v42 = vld [vmem:[%s9851_s21 + $0x58] sm:$0xff] }
 0x368   : > { %8111 = vmatmul.mubr.msk.f32.gmra.mrb[32].mxu0 %vm1223_vm3, %v10791_v23  ;;  %8289 = vmatprep.mubr.msk.f32.mxu1 %vm887_vm0, %v9430_v36  ;;  %v9434_v36 = vld [vmem:[%s9851_s21 + $0x60] sm:$0xff] }
 0x369   : > { %8113 = vmatprep.mubr.msk.f32.mxu0 %vm1223_vm3, %v10796_v2 }
 0x36b   : > { %8290 = vmatmul.mubr.msk.f32.gmra.mrb[30].mxu1 %vm887_vm0, %v9431_v50  ;;  %v11098_v50 = vsel %vm2339_vm15, %v3028_v26, %v3030_v48  ;;  %v8850_v26 = vpack.c.bf16 %v6926_v41, %v6925_v11  ;;  %v9436_v48 = vld [vmem:[%s9851_s21 + $0x70] sm:$0xff]  ;;  %v9437_v11 = vld [vmem:[%s9851_s21 + $0x78] sm:$0xff] }
 0x36c   : > { %8114 = vmatmul.mubr.msk.f32.gmra.mrb[34].mxu0 %vm1223_vm3, %v10804_v0  ;;  %8292 = vmatprep.mubr.msk.f32.mxu1 %vm887_vm0, %v9432_v40  ;;  %v9435_v40 = vld [vmem:[%s9851_s21 + $0x68] sm:$0xff]  ;;  %v6929_v41 = vld [vmem:[%s12444_s10 + $0x1f0] sm:$0xff] }
 0x36d   : > { %8116 = vmatprep.mubr.msk.f32.mxu0 %vm1223_vm3, %v12528_v44 }
 0x36f   : > { %8293 = vmatmul.mubr.msk.f32.gmra.mrb[32].mxu1 %vm887_vm0, %v9433_v42  ;;  %v6927_v42 = vld [vmem:[%s12444_s10 + $0x1e0] sm:$0xff] }
 0x370   : > { %8117 = vmatmul.mubr.msk.f32.gmra.mrb[36].mxu0 %vm1223_vm3, %v10817_v22  ;;  %8295 = vmatprep.mubr.msk.f32.mxu1 %vm887_vm0, %v9434_v36  ;;  %v6928_v36 = vld [vmem:[%s12444_s10 + $0x1e8] sm:$0xff] }
 0x371   : > { %8119 = vmatprep.mubr.msk.f32.mxu0 %vm1223_vm3, %v10822_v46 }
 0x373   : > { %8296 = vmatmul.mubr.msk.f32.gmra.mrb[34].mxu1 %vm887_vm0, %v9435_v40  ;;  %v6930_v40 = vld [vmem:[%s12444_s10 + $0x1f8] sm:$0xff] }
 0x374   : > { %8120 = vmatmul.mubr.msk.f32.gmra.mrb[38].mxu0 %vm1223_vm3, %v10830_v52  ;;  %8298 = vmatprep.mubr.msk.f32.mxu1 %vm887_vm0, %v9436_v48  ;;  %v9438_v48 = vld [vmem:[%s9892_s17] sm:$0xff] }
 0x375   : > { %8122 = vmatprep.mubr.msk.f32.mxu0 %vm1223_vm3, %v10835_v58 }
 0x377   : > { %8299 = vmatmul.mubr.msk.f32.gmra.mrb[36].mxu1 %vm887_vm0, %v9437_v11  ;;  %v12530_v11 = vld [vmem:[#allocation19_spill] sm:$0xff] }
 0x378   : > { %8123 = vmatmul.mubr.msk.f32.gmra.mrb[40].mxu0 %vm1223_vm3, %v10840_v51  ;;  %8301 = vmatprep.mubr.msk.f32.mxu1 %vm887_vm0, %v9438_v48 }
 0x379   : > { %8125 = vmatprep.mubr.msk.f32.mxu0 %vm1223_vm3, %v11089_v12 }
 0x37c   : > { %8126 = vmatmul.mubr.msk.f32.gmra.mrb[42].mxu0 %vm1223_vm3, %v11098_v50 }
 0x37d   : > { %8144 = vmatprep.mubr.msk.f32.mxu0 %vm1223_vm3, %v10288_v54  ;;  %v8854_v54 = vpack.c.bf16 %v6928_v36, %v6927_v42  ;;  %v6952_v42 = vld [vmem:[%s12444_s10 + $0x208] sm:$0xff] }
 0x380   : > { %8145 = vmatmul.mubr.msk.f32.vlgmr.msra.gmra.mrb[24].mxu0 %vm1223_vm3, %v10309_v17  ;;  %v8858_v17 = vpack.c.bf16 %v6930_v40, %v6929_v41 }
 0x381   : > { %8849 = vmatpush3.bf16.msra.mxu0 %v8846_v61  ;;  %8147 = vmatprep.mubr.msk.f32.mxu0 %vm1223_vm3, %v10340_v29  ;;  %v9439_v29 = vld [vmem:[%s9892_s17 + $0x8] sm:$0xff]  ;;  %v6951_v61 = vld [vmem:[%s12444_s10 + $0x200] sm:$0xff]  ;;  %s12554_s17 = sld [smem:[#allocation10_spill]] }
 0x382   : > { %8851 = vmatprep.subr.bf16.mxu0 %v8850_v26  ;;  %8302 = vmatmul.mubr.msk.f32.gmra.mrb[38].mxu1 %vm887_vm0, %v9439_v29  ;;  %v6956_v29 = vld [vmem:[%s12444_s10 + $0x228] sm:$0xff] }
 0x384   : > { %8148 = vmatmul.mubr.msk.f32.gmra.mrb[26].mxu0 %vm1223_vm3, %v10358_v56  ;;  %v8862_v56 = vpack.c.bf16 %v6952_v42, %v6951_v61  ;;  %v6958_v42 = vld [vmem:[%s12444_s10 + $0x238] sm:$0xff] }
 0x385   : > { %8150 = vmatprep.mubr.msk.f32.mxu0 %vm1223_vm3, %v10422_v57  ;;  %8853 = vmatpush3.bf16.msra.mxu0 %v8850_v26  ;;  %v841_v57 = vld [vmem:[%s10532_s24 + $0x10] sm:$0xff] }
 0x386   : > { %8855 = vmatprep.subr.bf16.mxu0 %v8854_v54  ;;  %v12529_v26 = vld [vmem:[#allocation21_spill] sm:$0xff] }
 0x387   : > { %v1637_v36 = vadd.s32 11, %v12529_v26  ;;  %s7171_s20 = sshll.u32 %s12554_s17, 5 }
 0x388   : > { %8151 = vmatmul.mubr.msk.f32.gmra.mrb[28].mxu0 %vm1223_vm3, %v10408_v30  ;;  %v842_v30 = vld [vmem:[%s10532_s24 + $0x18] sm:$0xff]  ;;  %s7175_s24 = sshll.u32 %s9570_s30, 4 }
 0x389   : > { %8153 = vmatprep.mubr.msk.f32.mxu0 %vm1223_vm3, %v10463_v16  ;;  %8857 = vmatpush3.bf16.msra.mxu0 %v8854_v54  ;;  %v1503_v16 = vmul.f32 %v12530_v11, %v841_v57  ;;  %v1574_v54 = vpop.permute.xlu0 %1573  ;;  %vm1649_vm11 = vcmp.ge.s32.totalorder %v1637_v36, 0  ;;  %vm1661_vm12 = vcmp.lt.s32.totalorder %v1637_v36, 16  ;;  %s6446_s18 = sadd.s32 %s7175_s24, %s7171_s20 }
 0x38a   : > { %8859 = vmatprep.subr.bf16.mxu0 %v8858_v17  ;;  %vm1673_vm13 = vmand %vm1649_vm11, %vm1661_vm12  ;;  %s7172_s30 = sshll.u32 %s6446_s18, 7 }
 0x38b   : > { %v1623_v40 = vadd.f32 %v1574_v54, %v1503_v16 }
 0x38c   : > { %8154 = vmatmul.mubr.msk.f32.gmra.mrb[30].mxu0 %vm1223_vm3, %v10454_v4  ;;  %v12531_v4 = vld [vmem:[#allocation20_spill] sm:$0xff] }
 0x38d   : > { %8156 = vmatprep.mubr.msk.f32.mxu0 %vm1223_vm3, %v10502_v37  ;;  %8861 = vmatpush3.bf16.msra.mxu0 %v8858_v17  ;;  %v1504_v41 = vmul.f32 %v12531_v4, %v842_v30  ;;  %v1576_v37 = vpop.permute.xlu1 %1575  ;;  %v1720_v48 = vsel %vm1673_vm13, %v1623_v40, 0.0 }
 0x38e   : > { %8863 = vmatprep.subr.bf16.mxu0 %v8862_v56  ;;  %v1781_v17 = vrot.slane %v1720_v48, 7 }
 0x390   : > { %8157 = vmatmul.mubr.msk.f32.gmra.mrb[32].mxu0 %vm1223_vm3, %v10493_v39  ;;  %v1624_v39 = vadd.f32 %v1576_v37, %v1504_v41 }
 0x391   : > { %8159 = vmatprep.mubr.msk.f32.mxu0 %vm1223_vm3, %v10544_v55 }
 0x392   : > { %v1721_v55 = vsel %vm1673_vm13, %v1624_v39, 0.0 }
 0x394   : > { %8160 = vmatmul.mubr.msk.f32.gmra.mrb[34].mxu0 %vm1223_vm3, %v10535_v9  ;;  %v1782_v9 = vrot.slane %v1721_v55, 7 }
 0x395   : > { %8162 = vmatprep.mubr.msk.f32.mxu0 %vm1223_vm3, %v10551_v27  ;;  %v11178_v27 = vsel %vm1747_vm2, 0.0, %v1781_v17 }
 0x398   : > { %8163 = vmatmul.mubr.msk.f32.gmra.mrb[36].mxu0 %vm1223_vm3, %v10567_v14  ;;  %v11183_v14 = vsel %vm1747_vm2, %v1781_v17, %v1782_v9 }
 0x399   : > { %8165 = vmatprep.mubr.msk.f32.mxu0 %vm1223_vm3, %v10586_v53  ;;  %v6953_v53 = vld [vmem:[%s12444_s10 + $0x210] sm:$0xff] }
 0x39c   : > { %8166 = vmatmul.mubr.msk.f32.gmra.mrb[38].mxu0 %vm1223_vm3, %v10595_v49  ;;  %v6954_v49 = vld [vmem:[%s12444_s10 + $0x218] sm:$0xff] }
 0x39d   : > { %8168 = vmatprep.mubr.msk.f32.mxu0 %vm1223_vm3, %v10906_v7  ;;  %v6955_v7 = vld [vmem:[%s12444_s10 + $0x220] sm:$0xff] }
 0x39e   : > { %v8870_v61 = vpack.c.bf16 %v6956_v29, %v6955_v7  ;;  %v11387_v29 = vld [vmem:[%s12445_s11] ss:$0 sm:$0xff] }
 0x3a0   : > { %8169 = vmatmul.mubr.msk.f32.gmra.mrb[40].mxu0 %vm1223_vm3, %v10651_v24  ;;  %v8866_v24 = vpack.c.bf16 %v6954_v49, %v6953_v53 }
 0x3a1   : > { %8171 = vmatprep.mubr.msk.f32.mxu0 %vm1223_vm3, %v11178_v27 }
 0x3a4   : > { %8172 = vmatmul.mubr.msk.f32.gmra.mrb[42].mxu0 %vm1223_vm3, %v11183_v14 }
 0x3a5   : > { %8190 = vmatprep.mubr.msk.f32.mxu0 %vm1223_vm3, %v10380_v6  ;;  %v6957_v6 = vld [vmem:[%s12444_s10 + $0x230] sm:$0xff] }
 0x3a8   : > { %8191 = vmatmul.mubr.msk.f32.vlgmr.msra.gmra.mrb[24].mxu0 %vm1223_vm3, %v10390_v13  ;;  %v8874_v13 = vpack.c.bf16 %v6958_v42, %v6957_v6 }
 0x3a9   : > { %8865 = vmatpush3.bf16.msra.mxu0 %v8862_v56  ;;  %8193 = vmatprep.mubr.msk.f32.mxu0 %vm1223_vm3, %v10431_v31  ;;  %v1831_v31 = vsel %vm1747_vm2, %v1782_v9, 0.0 }
 0x3aa   : > { %8867 = vmatprep.subr.bf16.mxu0 %v8866_v24 }
 0x3ac   : > { %8194 = vmatmul.mubr.msk.f32.gmra.mrb[26].mxu0 %vm1223_vm3, %v10441_v33  ;;  %v3430_v33 = vrot.slane %v11178_v27, 1 }
 0x3ad   : > { %8196 = vmatprep.mubr.msk.f32.mxu0 %vm1223_vm3, %v10471_v21  ;;  %8869 = vmatpush3.bf16.msra.mxu0 %v8866_v24  ;;  %v3431_v21 = vrot.slane %v11183_v14, 1 }
 0x3ae   : > { %8871 = vmatprep.subr.bf16.mxu0 %v8870_v61 }
 0x3b0   : > { %8197 = vmatmul.mubr.msk.f32.gmra.mrb[28].mxu0 %vm1223_vm3, %v10481_v45  ;;  %v3433_v45 = vrot.slane %v1831_v31, 1 }
 0x3b1   : > { %8199 = vmatprep.mubr.msk.f32.mxu0 %vm1223_vm3, %v10511_v62  ;;  %8873 = vmatpush3.bf16.msra.mxu0 %v8870_v61  ;;  %v3432_v62 = vsel %vm1869_vm9, %v3430_v33, %v3431_v21 }
 0x3b2   : > { %8875 = vmatprep.subr.bf16.mxu0 %v8874_v13 }
 0x3b4   : > { %8200 = vmatmul.mubr.msk.f32.gmra.mrb[30].mxu0 %vm1223_vm3, %v10517_v47  ;;  %v3434_v47 = vsel %vm1869_vm9, %v3431_v21, %v3433_v45 }
 0x3b5   : > { %8202 = vmatprep.mubr.msk.f32.mxu0 %vm1223_vm3, %v10556_v15  ;;  %8877 = vmatpush3.bf16.msra.mxu0 %v8874_v13  ;;  %v3633_v15 = vrot.slane %v11178_v27, 2 }
 0x3b6   : > { %8879 = vmatprep.subr.bf16.mxu0 %v10982_v34 }
 0x3b8   : > { %8203 = vmatmul.mubr.msk.f32.gmra.mrb[32].mxu0 %vm1223_vm3, %v10562_v38  ;;  %v3634_v38 = vrot.slane %v11183_v14, 2 }
 0x3b9   : > { %8205 = vmatprep.mubr.msk.f32.mxu0 %vm1223_vm3, %v10580_v1  ;;  %v3636_v1 = vrot.slane %v1831_v31, 2 }
 0x3bc   : > { %8206 = vmatmul.mubr.msk.f32.gmra.mrb[34].mxu0 %vm1223_vm3, %v10591_v3  ;;  %v3635_v3 = vsel %vm2339_vm15, %v3633_v15, %v3634_v38 }
 0x3bd   : > { %8208 = vmatprep.mubr.msk.f32.mxu0 %vm1223_vm3, %v10603_v18  ;;  %v3637_v18 = vsel %vm2339_vm15, %v3634_v38, %v3636_v1 }
 0x3c0   : > { %8209 = vmatmul.mubr.msk.f32.gmra.mrb[36].mxu0 %vm1223_vm3, %v10611_v10  ;;  %v9440_v10 = vld [vmem:[%s9834_s1 + $0x10] sm:$0xff] }
 0x3c1   : > { %8211 = vmatprep.mubr.msk.f32.mxu0 %vm1223_vm3, %v10616_v28  ;;  %v9441_v28 = vld [vmem:[%s9834_s1 + $0x18] sm:$0xff]  ;;  %s6449_s1 = sshll.u32 %s12308_s29, 4  ;;  %s12373_s1 = int_to_ptr.vmem [resolvable:$true] %s6449_s1 }
 0x3c2   : > { %s9488_s0 = scalar_lea.vmem %s12373_s1, 2048 }
 0x3c3   : > { %p9489_p12 = scmp.ne.s32.totalorder %s12373_s1, %s9488_s0 }
 0x3c4   : > { %8212 = vmatmul.mubr.msk.f32.gmra.mrb[38].mxu0 %vm1223_vm3, %v10621_v63  ;;  %v9442_v63 = vld [vmem:[%s9851_s21] sm:$0xff] }
 0x3c5   : > { %8214 = vmatprep.mubr.msk.f32.mxu0 %vm1223_vm3, %v10988_v32  ;;  %p9490_p2 = pnand %p9489_p12, %p12557_p0 }
 0x3c7   : > { %p9491_p5 = pneg %p9490_p2 }
 0x3c8   : > { %8215 = vmatmul.mubr.msk.f32.gmra.mrb[40].mxu0 %vm1223_vm3, %v10995_v19 }
 0x3c9   : > { %8217 = vmatprep.mubr.msk.f32.mxu0 %vm1223_vm3, %v3432_v62  ;;  %v11404_v62 = vld [vmem:[%s12447_s13] ss:$0 sm:$0xff] }
 0x3cc   : > { %8218 = vmatmul.mubr.msk.f32.gmra.mrb[42].mxu0 %vm1223_vm3, %v3434_v47 }
 0x3cd   : > { %8236 = vmatprep.mubr.msk.f32.mxu0 %vm1223_vm3, %v10738_v8  ;;  %v9443_v8 = vld [vmem:[%s9851_s21 + $0x8] sm:$0xff]  ;;  %s12532_s21 = sld [smem:[#allocation26_spill]] }
 0x3d0   : > { %8237 = vmatmul.mubr.msk.f32.vlgmr.msra.gmra.mrb[24].mxu0 %vm1223_vm3, %v10746_v25  ;;  %v3878_v25 = vld [vmem:[%s12448_s14] sm:$0xff] }
 0x3d1   : > { %8881 = vmatpush3.bf16.msra.mxu0 %v10982_v34  ;;  %8239 = vmatprep.mubr.msk.f32.mxu0 %vm1223_vm3, %v10757_v43  ;;  %v3879_v43 = vld [vmem:[%s12448_s14 + $0x8] sm:$0xff] }
 0x3d2   : > { %8883 = vmatprep.subr.bf16.mxu0 %v11043_v60 }
 0x3d4   : > { %8240 = vmatmul.mubr.msk.f32.gmra.mrb[26].mxu0 %vm1223_vm3, %v10765_v35  ;;  %v8886_v35 = vpack.c.bf16 %v3879_v43, %v3878_v25 }
 0x3d5   : > { %8242 = vmatprep.mubr.msk.f32.mxu0 %vm1223_vm3, %v10770_v20  ;;  %8885 = vmatpush3.bf16.msra.mxu0 %v11043_v60  ;;  %v3880_v20 = vld [vmem:[%s12448_s14 + $0x10] sm:$0xff] }
 0x3d6   : > { %8887 = vmatprep.subr.bf16.mxu1 %v8886_v35 }
 0x3d7   : > { %8889 = vmatpush3.bf16.msra.mxu1 %v8886_v35 }
 0x3d8   : > { %8243 = vmatmul.mubr.msk.f32.gmra.mrb[28].mxu0 %vm1223_vm3, %v10778_v5  ;;  %v3881_v5 = vld [vmem:[%s12448_s14 + $0x18] sm:$0xff] }
 0x3d9   : > { %8245 = vmatprep.mubr.msk.f32.mxu0 %vm1223_vm3, %v10783_v59  ;;  %v8890_v59 = vpack.c.bf16 %v3881_v5, %v3880_v20 }
 0x3db   : > { %8891 = vmatprep.subr.bf16.mxu1 %v8890_v59 }
 0x3dc   : > { %8246 = vmatmul.mubr.msk.f32.gmra.mrb[30].mxu0 %vm1223_vm3, %v10791_v23  ;;  %8893 = vmatpush3.bf16.msra.mxu1 %v8890_v59  ;;  %v3882_v23 = vld [vmem:[%s12448_s14 + $0x20] sm:$0xff] }
 0x3dd   : > { %8248 = vmatprep.mubr.msk.f32.mxu0 %vm1223_vm3, %v10796_v2  ;;  %v3883_v2 = vld [vmem:[%s12448_s14 + $0x28] sm:$0xff] }
 0x3e0   : > { %8249 = vmatmul.mubr.msk.f32.gmra.mrb[32].mxu0 %vm1223_vm3, %v10804_v0  ;;  %v8894_v0 = vpack.c.bf16 %v3883_v2, %v3882_v23 }
 0x3e1   : > { %8251 = vmatprep.mubr.msk.f32.mxu0 %vm1223_vm3, %v12528_v44 }
 0x3e2   : > { %8895 = vmatprep.subr.bf16.mxu1 %v8894_v0 }
 0x3e3   : > { %8897 = vmatpush3.bf16.msra.mxu1 %v8894_v0 }
 0x3e4   : > { %8252 = vmatmul.mubr.msk.f32.gmra.mrb[34].mxu0 %vm1223_vm3, %v10817_v22  ;;  %v3884_v22 = vld [vmem:[%s12448_s14 + $0x30] sm:$0xff] }
 0x3e5   : > { %8254 = vmatprep.mubr.msk.f32.mxu0 %vm1223_vm3, %v10822_v46  ;;  %v3885_v46 = vld [vmem:[%s12448_s14 + $0x38] sm:$0xff] }
 0x3e8   : > { %8255 = vmatmul.mubr.msk.f32.gmra.mrb[36].mxu0 %vm1223_vm3, %v10830_v52  ;;  %v8898_v52 = vpack.c.bf16 %v3885_v46, %v3884_v22 }
 0x3e9   : > { %8257 = vmatprep.mubr.msk.f32.mxu0 %vm1223_vm3, %v10835_v58 }
 0x3ea   : > { %8899 = vmatprep.subr.bf16.mxu1 %v8898_v52 }
 0x3eb   : > { %8901 = vmatpush3.bf16.msra.mxu1 %v8898_v52 }
 0x3ec   : > { %8258 = vmatmul.mubr.msk.f32.gmra.mrb[38].mxu0 %vm1223_vm3, %v10840_v51 }
 0x3ed   : > { %8260 = vmatprep.mubr.msk.f32.mxu0 %vm1223_vm3, %v11089_v12 }
 0x3f0   : > { %8261 = vmatmul.mubr.msk.f32.gmra.mrb[40].mxu0 %vm1223_vm3, %v11098_v50 }
 0x3f1   : > { %8263 = vmatprep.mubr.msk.f32.mxu0 %vm1223_vm3, %v3635_v3 }
 0x3f4   : > { %8264 = vmatmul.mubr.msk.f32.gmra.mrb[42].mxu0 %vm1223_vm3, %v3637_v18 }
 0x3f5   : > { %8274 = vmatprep.mubr.msk.f32.mxu0 %vm887_vm0, %v9440_v10 }
 0x3f8   : > { %8275 = vmatmul.mubr.msk.f32.vlgmr.msra.gmra.mrb[44].mxu0 %vm887_vm0, %v9441_v28 }
 0x3f9   : > { %8277 = vmatprep.mubr.msk.f32.mxu0 %vm887_vm0, %v9442_v63 }
 0x3fc   : > { %8278 = vmatmul.mubr.msk.f32.gmra.mrb[46].mxu0 %vm887_vm0, %v9443_v8 }
 0x418   : > { %v8282_v58 = vpop.f32.mrb[24].mxu1 }
 0x419   : > { %v3979_v51 = vpop.f32.mrb[25].mxu1  ;;  %v3985_v23 = vadd.f32 %v8282_v58, %v11404_v62 }
 0x41a   : > { %v3980_v3 = vadd.f32 %v11404_v62, %v3979_v51 }
 0x41b   : > { %v4083_v51 = vmul.f32 0.1, %v3985_v23  ;;  %vm4063_vm7 = vcmp.ge.f32.partialorder %v3985_v23, 0.0 }
 0x41c   : > { %v4082_v43 = vmul.f32 0.1, %v3980_v3  ;;  %vm4062_vm1 = vcmp.ge.f32.partialorder %v3980_v3, 0.0 }
 0x41e   : > { %v4102_v46 = vsel %vm4062_vm1, %v3980_v3, %v4082_v43 }
 0x436   : > { %v11326_v34 = vpop.f32.mrb[26].mxu1 }
 0x437   : > { %v3989_v32 = vpop.f32.mrb[27].mxu1 }
 0x438   : > { %v3990_v20 = vadd.f32 %v11404_v62, %v3989_v32  ;;  %v3995_v32 = vadd.f32 %v11326_v34, %v11404_v62  ;;  %v4103_v34 = vsel %vm4063_vm7, %v3985_v23, %v4083_v51 }
 0x43a   : > { %v11328_v19 = vpop.f32.mrb[28].mxu1  ;;  %v4084_v0 = vmul.f32 0.1, %v3990_v20  ;;  %vm4064_vm6 = vcmp.ge.f32.partialorder %v3990_v20, 0.0  ;;  %vm4065_vm10 = vcmp.ge.f32.partialorder %v3995_v32, 0.0 }
 0x43b   : > { %v11330_v60 = vpop.f32.mrb[29].mxu1 }
 0x43c   : > { %v4000_v52 = vadd.f32 %v11404_v62, %v11330_v60  ;;  %v4005_v60 = vadd.f32 %v11328_v19, %v11404_v62 }
 0x43e   : > { %v11332_v44 = vpop.f32.mrb[30].mxu1  ;;  %vm4066_vm8 = vcmp.ge.f32.partialorder %v4000_v52, 0.0  ;;  %vm4067_vm12 = vcmp.ge.f32.partialorder %v4005_v60, 0.0 }
 0x43f   : > { %v11334_v12 = vpop.f32.mrb[31].mxu1 }
 0x442   : > { %v11336_v50 = vpop.f32.mrb[32].mxu1 }
 0x443   : > { %v11338_v56 = vpop.f32.mrb[33].mxu1 }
 0x446   : > { %v11340_v57 = vpop.f32.mrb[34].mxu1 }
 0x447   : > { %v11342_v26 = vpop.f32.mrb[35].mxu1 }
 0x44a   : > { %v11344_v36 = vpop.f32.mrb[36].mxu1 }
 0x44b   : > { %v11346_v30 = vpop.f32.mrb[37].mxu1 }
 0x455   : > { %v11348_v11 = vpop.f32.mrb[38].mxu1 }
 0x456   : > { %v11350_v16 = vpop.f32.mrb[39].mxu1 }
 0x4a3   : > { %v11352_v54 = vpop.f32.mrb[24].mxu0 }
 0x4a4   : > { %v11354_v4 = vpop.f32.mrb[25].mxu0 }
 0x4a7   : > { %v11356_v41 = vpop.f32.mrb[26].mxu0 }
 0x4a8   : > { %v11358_v37 = vpop.f32.mrb[27].mxu0 }
 0x4ab   : > { %v11360_v40 = vpop.f32.mrb[28].mxu0 }
 0x4ac   : > { %v11362_v39 = vpop.f32.mrb[29].mxu0 }
 0x4af   : > { %v11364_v48 = vpop.f32.mrb[30].mxu0 }
 0x4b0   : > { %v11366_v55 = vpop.f32.mrb[31].mxu0 }
 0x4b3   : > { %v11368_v17 = vpop.f32.mrb[32].mxu0 }
 0x4b4   : > { %v11370_v9 = vpop.f32.mrb[33].mxu0 }
 0x4b7   : > { %v11372_v27 = vpop.f32.mrb[34].mxu0 }
 0x4b8   : > { %v11374_v14 = vpop.f32.mrb[35].mxu0 }
 0x4bb   : > { %v11376_v53 = vpop.f32.mrb[36].mxu0 }
 0x4bc   : > { %v11378_v49 = vpop.f32.mrb[37].mxu0 }
 0x4bf   : > { %v11380_v24 = vpop.f32.mrb[38].mxu0 }
 0x4c0   : > { %v11382_v7 = vpop.f32.mrb[39].mxu0 }
 0x4c3   : > { %v8262_v61 = vpop.f32.mrb[40].mxu0 }
 0x4c4   : > { %v11390_v6 = vadd.f32 %v8262_v61, %v11387_v29  ;;  %v3788_v42 = vpop.f32.mrb[41].mxu0  ;;  %v4086_v61 = vmul.f32 0.1, %v4000_v52 }
 0x4c5   : > { %v11393_v13 = vadd.f32 %v11387_v29, %v3788_v42  ;;  %v4104_v42 = vsel %vm4064_vm6, %v3990_v20, %v4084_v0 }
 0x4c7   : > { %v8265_v31 = vpop.f32.mrb[42].mxu0 }
 0x4c8   : > { %v11396_v33 = vadd.f32 %v8265_v31, %v11387_v29  ;;  %v3798_v21 = vpop.f32.mrb[43].mxu0  ;;  %v4010_v31 = vadd.f32 %v11404_v62, %v11334_v12  ;;  %v4015_v12 = vadd.f32 %v11332_v44, %v11404_v62 }
 0x4c9   : > { %v11399_v45 = vadd.f32 %v11387_v29, %v3798_v21  ;;  %v4085_v21 = vmul.f32 0.1, %v3995_v32 }
 0x4ca   : > { %vm4068_vm11 = vcmp.ge.f32.partialorder %v4010_v31, 0.0 }
 0x4cb   : > { %v8276_v47 = vpop.f32.mrb[44].mxu0  ;;  %v4105_v3 = vsel %vm4065_vm10, %v3995_v32, %v4085_v21  ;;  %v4652_v32 = vld [vmem:[#allocation2 + $0x50] sm:$0xff]  ;;  %v4655_v21 = vld [vmem:[#allocation2 + $0x68] sm:$0xff] }
 0x4cc   : > { %v3965_v15 = vadd.f32 %v8276_v47, %v11404_v62  ;;  %v3959_v38 = vpop.f32.mrb[45].mxu0  ;;  %v4088_v47 = vmul.f32 0.1, %v4010_v31 }
 0x4cd   : > { %v3960_v1 = vadd.f32 %v11404_v62, %v3959_v38  ;;  %v4020_v38 = vadd.f32 %v11404_v62, %v11338_v56  ;;  %v4025_v56 = vadd.f32 %v11336_v50, %v11404_v62  ;;  %v4045_v50 = vadd.f32 %v11344_v36, %v11404_v62 }
 0x4ce   : > { %v4079_v18 = vmul.f32 0.1, %v3965_v15  ;;  %vm4059_vm0 = vcmp.ge.f32.partialorder %v3965_v15, 0.0 }
 0x4cf   : > { %vm4058_vm14 = vcmp.ge.f32.partialorder %v3960_v1, 0.0  ;;  %v4078_v10 = vmul.f32 0.1, %v3960_v1  ;;  %v8279_v28 = vpop.f32.mrb[46].mxu0  ;;  %v4090_v19 = vmul.f32 0.1, %v4020_v38 }
 0x4d0   : > { %v3975_v63 = vadd.f32 %v8279_v28, %v11404_v62  ;;  %v3969_v8 = vpop.f32.mrb[47].mxu0  ;;  %v4099_v5 = vsel %vm4059_vm0, %v3965_v15, %v4079_v18  ;;  %v4106_v15 = vsel %vm4066_vm8, %v4000_v52, %v4086_v61  ;;  %v4108_v18 = vsel %vm4068_vm11, %v4010_v31, %v4088_v47  ;;  %v4653_v61 = vld [vmem:[#allocation2 + $0x58] sm:$0xff]  ;;  %v4654_v31 = vld [vmem:[#allocation2 + $0x60] sm:$0xff] }
 0x4d1   : > { %v3970_v25 = vadd.f32 %v11404_v62, %v3969_v8  ;;  %v4098_v35 = vsel %vm4058_vm14, %v3960_v1, %v4078_v10  ;;  %v4087_v1 = vmul.f32 0.1, %v4005_v60  ;;  %v4030_v10 = vadd.f32 %v11404_v62, %v11342_v26  ;;  %v4657_v47 = vld [vmem:[#allocation2 + $0x78] sm:$0xff] }
 0x4d2   : > { %v4081_v59 = vmul.f32 0.1, %v3975_v63  ;;  %8320 = vmatprep.mubr.msk.f32.mxu1 %vm1223_vm3, %v4098_v35  ;;  %vm4061_vm4 = vcmp.ge.f32.partialorder %v3975_v63, 0.0  ;;  %v4089_v28 = vmul.f32 0.1, %v4015_v12  ;;  %vm4070_vm13 = vcmp.ge.f32.partialorder %v4020_v38, 0.0 }
 0x4d3   : > { %vm4060_vm5 = vcmp.ge.f32.partialorder %v3970_v25, 0.0  ;;  %v4080_v2 = vmul.f32 0.1, %v3970_v25  ;;  %8321 = vmatmul.mubr.msk.f32.vlgmr.msra.gmra.mrb[40].mxu1 %vm1223_vm3, %v4099_v5  ;;  %vm4069_vm0 = vcmp.ge.f32.partialorder %v4015_v12, 0.0  ;;  %v4092_v44 = vmul.f32 0.1, %v4030_v10 }
 0x4d4   : > { %v4101_v58 = vsel %vm4061_vm4, %v3975_v63, %v4081_v59  ;;  %v4107_v63 = vsel %vm4067_vm12, %v4005_v60, %v4087_v1  ;;  %v4110_v8 = vsel %vm4070_vm13, %v4020_v38, %v4090_v19  ;;  %v4091_v43 = vmul.f32 0.1, %v4025_v56 }
 0x4d5   : > { %v4100_v22 = vsel %vm4060_vm5, %v3970_v25, %v4080_v2  ;;  %v4040_v25 = vadd.f32 %v11404_v62, %v11346_v30  ;;  %v4035_v26 = vadd.f32 %v11340_v57, %v11404_v62  ;;  %vm4072_vm14 = vcmp.ge.f32.partialorder %v4030_v10, 0.0 }
 0x4d6   : > { %8323 = vmatprep.mubr.msk.f32.mxu1 %vm1223_vm3, %v4100_v22  ;;  %v4109_v35 = vsel %vm4069_vm0, %v4015_v12, %v4089_v28  ;;  %vm4071_vm1 = vcmp.ge.f32.partialorder %v4025_v56, 0.0  ;;  %v4112_v5 = vsel %vm4072_vm14, %v4030_v10, %v4092_v44  ;;  %v4050_v59 = vadd.f32 %v11404_v62, %v11350_v16  ;;  %v11466_v12 = vld [vmem:[%s12532_s21] ss:$0 sm:$0xff]  ;;  %s12556_s21 = sld [smem:[#allocation29_spill]] }
 0x4d7   : > { %8324 = vmatmul.mubr.msk.f32.gmra.mrb[42].mxu1 %vm1223_vm3, %v4101_v58  ;;  %v4094_v20 = vmul.f32 0.1, %v4040_v25  ;;  %v4093_v30 = vmul.f32 0.1, %v4035_v26  ;;  %v4111_v23 = vsel %vm4071_vm1, %v4025_v56, %v4091_v43  ;;  %vm4074_vm4 = vcmp.ge.f32.partialorder %v4040_v25, 0.0 }
 0x4d8   : > { %8326 = vmatprep.mubr.msk.f32.mxu1 %vm1223_vm3, %v4102_v46  ;;  %vm4073_vm5 = vcmp.ge.f32.partialorder %v4035_v26, 0.0  ;;  %v4095_v57 = vmul.f32 0.1, %v4045_v50  ;;  %v4055_v2 = vadd.f32 %v11348_v11, %v11404_v62  ;;  %vm4075_vm6 = vcmp.ge.f32.partialorder %v4045_v50, 0.0  ;;  %v4650_v11 = vld [vmem:[#allocation2 + $0x40] sm:$0xff]  ;;  %v4651_v62 = vld [vmem:[#allocation2 + $0x48] sm:$0xff] }
 0x4d9   : > { %v4096_v0 = vmul.f32 0.1, %v4050_v59  ;;  %v4114_v36 = vsel %vm4074_vm4, %v4040_v25, %v4094_v20  ;;  %v4113_v22 = vsel %vm4073_vm5, %v4035_v26, %v4093_v30  ;;  %vm4076_vm7 = vcmp.ge.f32.partialorder %v4050_v59, 0.0  ;;  %v4641_v25 = vld [vmem:[#allocation2] sm:$0xff] }
 0x4da   : > { %v4097_v16 = vmul.f32 0.1, %v4055_v2  ;;  %v4115_v46 = vsel %vm4075_vm6, %v4045_v50, %v4095_v57  ;;  %vm4077_vm8 = vcmp.ge.f32.partialorder %v4055_v2, 0.0  ;;  %v8902_v58 = vpack.c.bf16 %v4651_v62, %v4650_v11 }
 0x4db   : > { %8327 = vmatmul.mubr.msk.f32.gmra.mrb[44].mxu1 %vm1223_vm3, %v4103_v34  ;;  %v4116_v52 = vsel %vm4076_vm7, %v4050_v59, %v4096_v0  ;;  %v8910_v60 = vpack.c.bf16 %v4655_v21, %v4654_v31  ;;  %v4656_v34 = vld [vmem:[#allocation2 + $0x70] sm:$0xff]  ;;  %v3833_v1 = vadd.f32 %v11387_v29, %v11354_v4  ;;  %v3835_v56 = vadd.f32 %v11387_v29, %v11358_v37 }
 0x4dc   : > { %8329 = vmatprep.mubr.msk.f32.mxu1 %vm1223_vm3, %v4104_v42  ;;  %v4117_v51 = vsel %vm4077_vm8, %v4055_v2, %v4097_v16  ;;  %v8906_v42 = vpack.c.bf16 %v4653_v61, %v4652_v32  ;;  %8903 = vmatprep.subr.bf16.mxu1 %v8902_v58  ;;  %v8914_v38 = vpack.c.bf16 %v4657_v47, %v4656_v34 }
 0x4dd   : > { %8905 = vmatpush3.bf16.msra.mxu1 %v8902_v58  ;;  %v3838_v26 = vadd.f32 %v11360_v40, %v11387_v29  ;;  %v3855_v20 = vmax.f32 %v3835_v56, 0.0  ;;  %v3840_v2 = vadd.f32 %v11364_v48, %v11387_v29  ;;  %v3842_v48 = vadd.f32 %v11368_v17, %v11387_v29 }
 0x4de   : > { %8907 = vmatprep.subr.bf16.mxu1 %v8906_v42  ;;  %v3844_v17 = vadd.f32 %v11372_v27, %v11387_v29  ;;  %v3846_v27 = vadd.f32 %v11376_v53, %v11387_v29  ;;  %v3848_v53 = vadd.f32 %v11380_v24, %v11387_v29 }
 0x4df   : > { %8330 = vmatmul.mubr.msk.f32.gmra.mrb[46].mxu1 %vm1223_vm3, %v4105_v3  ;;  %v3858_v57 = vmax.f32 %v3838_v26, 0.0  ;;  %v3860_v11 = vmax.f32 %v3840_v2, 0.0 }
 0x4e0   : > { %8332 = vmatprep.mubr.msk.f32.mxu1 %vm1223_vm3, %v4106_v15  ;;  %v3834_v15 = vadd.f32 %v11352_v54, %v11387_v29  ;;  %v3853_v54 = vmax.f32 %v3833_v1, 0.0 }
 0x4e1   : > { %8909 = vmatpush3.bf16.msra.mxu1 %v8906_v42 }
 0x4e2   : > { %8911 = vmatprep.subr.bf16.mxu1 %v8910_v60  ;;  %v3854_v19 = vmax.f32 %v3834_v15, 0.0 }
 0x4e3   : > { %8333 = vmatmul.mubr.msk.f32.gmra.mrb[48].mxu1 %vm1223_vm3, %v4107_v63 }
 0x4e4   : > { %8335 = vmatprep.mubr.msk.f32.mxu1 %vm1223_vm3, %v4108_v18  ;;  %v3836_v18 = vadd.f32 %v11356_v41, %v11387_v29  ;;  %v4642_v41 = vld [vmem:[#allocation2 + $0x8] sm:$0xff] }
 0x4e5   : > { %8913 = vmatpush3.bf16.msra.mxu1 %v8910_v60  ;;  %v11483_v50 = vpack.c.bf16 %v4642_v41, %v4641_v25  ;;  %v3862_v60 = vmax.f32 %v3842_v48, 0.0  ;;  %v3866_v41 = vmax.f32 %v3846_v27, 0.0 }
 0x4e6   : > { %8915 = vmatprep.subr.bf16.mxu1 %v8914_v38  ;;  %v3856_v43 = vmax.f32 %v3836_v18, 0.0  ;;  %v3864_v18 = vmax.f32 %v3844_v17, 0.0  ;;  %v11584_v17 = vstv %s7022_s2  ;;  %s12371_s2 = scalar_lea.hbm %s12556_s21, %s7172_s30 }
 0x4e7   : > { %8336 = vmatmul.mubr.msk.f32.gmra.mrb[50].mxu1 %vm1223_vm3, %v4109_v35  ;;  %vm4480_vm10 = vcmp.ge.s32.totalorder %v11584_v17, 0  ;;  %vm4490_vm11 = vcmp.lt.s32.totalorder %v11584_v17, 16 }
 0x4e8   : > { %8338 = vmatprep.mubr.msk.f32.mxu1 %vm1223_vm3, %v4110_v8  ;;  %vm11590_vm12 = vmand %vm4480_vm10, %vm4490_vm11 }
 0x4e9   : > { %8917 = vmatpush3.bf16.msra.mxu1 %v8914_v38 }
 0x4ea   : > { %8919 = vmatprep.subr.bf16.mxu1 %v11483_v50 }
 0x4eb   : > { %8339 = vmatmul.mubr.msk.f32.gmra.mrb[52].mxu1 %vm1223_vm3, %v4111_v23 }
 0x4ec   : > { %8341 = vmatprep.mubr.msk.f32.mxu1 %vm1223_vm3, %v4112_v5  ;;  %v3837_v5 = vadd.f32 %v11387_v29, %v11362_v39 }
 0x4ef   : > { %8342 = vmatmul.mubr.msk.f32.gmra.mrb[54].mxu1 %vm1223_vm3, %v4113_v22  ;;  %v3839_v22 = vadd.f32 %v11387_v29, %v11366_v55  ;;  %v3841_v55 = vadd.f32 %v11387_v29, %v11370_v9  ;;  %v3843_v9 = vadd.f32 %v11387_v29, %v11374_v14  ;;  %v3845_v14 = vadd.f32 %v11387_v29, %v11378_v49 }
 0x4f0   : > { %8344 = vmatprep.mubr.msk.f32.mxu1 %vm1223_vm3, %v4114_v36  ;;  %v3857_v36 = vmax.f32 %v3837_v5, 0.0  ;;  %v3847_v49 = vadd.f32 %v11387_v29, %v11382_v7 }
 0x4f1   : > { %v3859_v58 = vmax.f32 %v3839_v22, 0.0  ;;  %v3861_v15 = vmax.f32 %v3841_v55, 0.0 }
 0x4f2   : > { %v3867_v2 = vmax.f32 %v3847_v49, 0.0  ;;  %v11627_v49 = vadd.s32 6, %v11584_v17 }
 0x4f3   : > { %8345 = vmatmul.mubr.msk.f32.gmra.mrb[56].mxu1 %vm1223_vm3, %v4115_v46 }
 0x4f4   : > { %8347 = vmatprep.mubr.msk.f32.mxu1 %vm1223_vm3, %v4116_v52 }
 0x4f7   : > { %8348 = vmatmul.mubr.msk.f32.gmra.mrb[58].mxu1 %vm1223_vm3, %v4117_v51 }
 0x5a6   : > { %v8322_v3 = vpop.f32.mrb[40].mxu1 }
 0x5a7   : > { %v4256_v10 = vadd.f32 %v8322_v3, %v11466_v12  ;;  %v4250_v28 = vpop.f32.mrb[41].mxu1 }
 0x5a8   : > { %v4251_v4 = vadd.f32 %v11466_v12, %v4250_v28 }
 0x5a9   : > { %4391 = vrot.lane.b32.xlu1 %v4256_v10, %s9591_s27  ;;  %v11475_v63 = vmul.f32 %v4256_v10, %v3854_v19 }
 0x5aa   : > { %v8325_v44 = vpop.f32.mrb[42].mxu1  ;;  %4389 = vrot.lane.b32.xlu0 %v4251_v4, %s9591_s27  ;;  %v11478_v8 = vmul.f32 %v4251_v4, %v3853_v54  ;;  %v3863_v54 = vmax.f32 %v3843_v9, 0.0 }
 0x5ab   : > { %v4266_v35 = vadd.f32 %v8325_v44, %v11466_v12  ;;  %v4260_v37 = vpop.f32.mrb[43].mxu1 }
 0x5ac   : > { %v4261_v59 = vadd.f32 %v11466_v12, %v4260_v37 }
 0x5ad   : > { %4395 = vrot.lane.b32.xlu1 %v4266_v35, %s9591_s27  ;;  %v11489_v30 = vmul.f32 %v4266_v35, %v3856_v43  ;;  %v3865_v35 = vmax.f32 %v3845_v14, 0.0 }
 0x5ae   : > { %v8328_v23 = vpop.f32.mrb[44].mxu1  ;;  %4393 = vrot.lane.b32.xlu0 %v4261_v59, %s9591_s27  ;;  %v11493_v40 = vmul.f32 %v4261_v59, %v3855_v20 }
 0x5af   : > { %v4276_v0 = vadd.f32 %v8328_v23, %v11466_v12  ;;  %v4270_v39 = vpop.f32.mrb[45].mxu1  ;;  %v3868_v23 = vmax.f32 %v3848_v53, 0.0 }
 0x5b0   : > { %v4271_v16 = vadd.f32 %v11466_v12, %v4270_v39 }
 0x5b1   : > { %4399 = vrot.lane.b32.xlu1 %v4276_v0, %s9591_s27  ;;  %v11502_v46 = vmul.f32 %v4276_v0, %v3858_v57 }
 0x5b2   : > { %v8331_v52 = vpop.f32.mrb[46].mxu1  ;;  %4397 = vrot.lane.b32.xlu0 %v4271_v16, %s9591_s27  ;;  %v11505_v51 = vmul.f32 %v4271_v16, %v3857_v36  ;;  %v3870_v36 = vmax.f32 %v11390_v6, 0.0 }
 0x5b3   : > { %v4286_v62 = vadd.f32 %v8331_v52, %v11466_v12  ;;  %v4280_v32 = vpop.f32.mrb[47].mxu1  ;;  %v3869_v52 = vmax.f32 %v11393_v13, 0.0 }
 0x5b4   : > { %v4281_v61 = vadd.f32 %v11466_v12, %v4280_v32 }
 0x5b5   : > { %4403 = vrot.lane.b32.xlu1 %v4286_v62, %s9591_s27  ;;  %v11514_v42 = vmul.f32 %v4286_v62, %v3860_v11 }
 0x5b6   : > { %v8334_v31 = vpop.f32.mrb[48].mxu1  ;;  %4401 = vrot.lane.b32.xlu0 %v4281_v61, %s9591_s27  ;;  %v11517_v21 = vmul.f32 %v4281_v61, %v3859_v58  ;;  %v3872_v58 = vmax.f32 %v11396_v33, 0.0  ;;  %v3871_v61 = vmax.f32 %v11399_v45, 0.0  ;;  %v4471_v33 = vadd.s32 1, %v11584_v17 }
 0x5b7   : > { %v4296_v34 = vadd.f32 %v8334_v31, %v11466_v12  ;;  %v4290_v47 = vpop.f32.mrb[49].mxu1  ;;  %v4472_v45 = vadd.s32 2, %v11584_v17 }
 0x5b8   : > { %v4291_v38 = vadd.f32 %v11466_v12, %v4290_v47  ;;  %v4473_v47 = vadd.s32 3, %v11584_v17  ;;  %vm4481_vm13 = vcmp.ge.s32.totalorder %v4471_v33, 0  ;;  %vm4491_vm0 = vcmp.lt.s32.totalorder %v4471_v33, 16 }
 0x5b9   : > { %4407 = vrot.lane.b32.xlu1 %v4296_v34, %s9591_s27  ;;  %v11526_v1 = vmul.f32 %v4296_v34, %v3862_v60  ;;  %vm4482_vm14 = vcmp.ge.s32.totalorder %v4472_v45, 0  ;;  %vm4492_vm1 = vcmp.lt.s32.totalorder %v4472_v45, 16  ;;  %vm11604_vm5 = vmand %vm4481_vm13, %vm4491_vm0  ;;  %v4645_v45 = vld [vmem:[#allocation2 + $0x20] sm:$0xff]  ;;  %vm4486_vm0 = vcmp.ge.s32.totalorder %v11627_v49, 0 }
 0x5ba   : > { %v8337_v3 = vpop.f32.mrb[50].mxu1  ;;  %4405 = vrot.lane.b32.xlu0 %v4291_v38, %s9591_s27  ;;  %v11529_v19 = vmul.f32 %v4291_v38, %v3861_v15  ;;  %v11597_v38 = vadd.s32 4, %v11584_v17  ;;  %vm4483_vm4 = vcmp.ge.s32.totalorder %v4473_v47, 0  ;;  %vm4493_vm6 = vcmp.lt.s32.totalorder %v4473_v47, 16  ;;  %vm11637_vm10 = vmand %vm4482_vm14, %vm4492_vm1 }
 0x5bb   : > { %v4306_v10 = vadd.f32 %v8337_v3, %v11466_v12  ;;  %v4300_v28 = vpop.f32.mrb[51].mxu1  ;;  %vm11669_vm13 = vmand %vm4483_vm4, %vm4493_vm6  ;;  %vm4496_vm14 = vcmp.lt.s32.totalorder %v11627_v49, 16 }
 0x5bc   : > { %v4301_v56 = vadd.f32 %v11466_v12, %v4300_v28  ;;  %vm4484_vm7 = vcmp.ge.s32.totalorder %v11597_v38, 0  ;;  %vm4494_vm8 = vcmp.lt.s32.totalorder %v11597_v38, 16  ;;  %v4647_v38 = vld [vmem:[#allocation2 + $0x30] sm:$0xff]  ;;  %vm11787_vm6 = vmand %vm4486_vm0, %vm4496_vm14 }
 0x5bd   : > { %4411 = vrot.lane.b32.xlu1 %v4306_v10, %s9591_s27  ;;  %v11538_v4 = vmul.f32 %v4306_v10, %v3864_v18  ;;  %vm11704_vm1 = vmand %vm4484_vm7, %vm4494_vm8 }
 0x5be   : > { %v8340_v44 = vpop.f32.mrb[52].mxu1  ;;  %4409 = vrot.lane.b32.xlu0 %v4301_v56, %s9591_s27  ;;  %v11541_v25 = vmul.f32 %v4301_v56, %v3863_v54  ;;  %v4644_v54 = vld [vmem:[#allocation2 + $0x18] sm:$0xff] }
 0x5bf   : > { %v4316_v43 = vadd.f32 %v8340_v44, %v11466_v12  ;;  %v4310_v26 = vpop.f32.mrb[53].mxu1 }
 0x5c0   : > { %v4311_v37 = vadd.f32 %v11466_v12, %v4310_v26 }
 0x5c1   : > { %4415 = vrot.lane.b32.xlu1 %v4316_v43, %s9591_s27  ;;  %v11550_v20 = vmul.f32 %v4316_v43, %v3866_v41  ;;  %v11616_v43 = vadd.s32 5, %v11584_v17 }
 0x5c2   : > { %v8343_v5 = vpop.f32.mrb[54].mxu1  ;;  %4413 = vrot.lane.b32.xlu0 %v4311_v37, %s9591_s27  ;;  %v11553_v59 = vmul.f32 %v4311_v37, %v3865_v35 }
 0x5c3   : > { %v4326_v24 = vadd.f32 %v8343_v5, %v11466_v12  ;;  %v4320_v57 = vpop.f32.mrb[55].mxu1  ;;  %vm4485_vm11 = vcmp.ge.s32.totalorder %v11616_v43, 0 }
 0x5c4   : > { %v4321_v0 = vadd.f32 %v11466_v12, %v4320_v57 }
 0x5c5   : > { %4419 = vrot.lane.b32.xlu1 %v4326_v24, %s9591_s27  ;;  %v11558_v7 = vmul.f32 %v4326_v24, %v3868_v23 }
 0x5c6   : > { %v8346_v29 = vpop.f32.mrb[56].mxu1  ;;  %4417 = vrot.lane.b32.xlu0 %v4321_v0, %s9591_s27  ;;  %v11561_v39 = vmul.f32 %v4321_v0, %v3867_v2 }
 0x5c7   : > { %v4336_v22 = vadd.f32 %v8346_v29, %v11466_v12  ;;  %v4330_v16 = vpop.f32.mrb[57].mxu1 }
 0x5c8   : > { %v4331_v11 = vadd.f32 %v11466_v12, %v4330_v16 }
 0x5c9   : > { %4423 = vrot.lane.b32.xlu1 %v4336_v22, %s9591_s27  ;;  %v11568_v48 = vmul.f32 %v4336_v22, %v3870_v36 }
 0x5ca   : > { %v8349_v62 = vpop.f32.mrb[58].mxu1  ;;  %4421 = vrot.lane.b32.xlu0 %v4331_v11, %s9591_s27  ;;  %v11571_v32 = vmul.f32 %v4331_v11, %v3869_v52 }
 0x5cb   : > { %v4346_v6 = vadd.f32 %v8349_v62, %v11466_v12  ;;  %v4340_v55 = vpop.f32.mrb[59].mxu1  ;;  %v11649_v62 = vadd.s32 7, %v11584_v17 }
 0x5cc   : > { %v4341_v13 = vadd.f32 %v11466_v12, %v4340_v55  ;;  %v4646_v12 = vld [vmem:[#allocation2 + $0x28] sm:$0xff] }
 0x5cd   : > { %4427 = vrot.lane.b32.xlu1 %v4346_v6, %s9591_s27  ;;  %v11578_v31 = vmul.f32 %v4346_v6, %v3872_v58  ;;  %vm4487_vm4 = vcmp.ge.s32.totalorder %v11649_v62, 0  ;;  %vm4497_vm7 = vcmp.lt.s32.totalorder %v11649_v62, 16 }
 0x5ce   : > { %4425 = vrot.lane.b32.xlu0 %v4341_v13, %s9591_s27  ;;  %v11581_v60 = vmul.f32 %v4341_v13, %v3871_v61  ;;  %vm11826_vm8 = vmand %vm4487_vm4, %vm4497_vm7  ;;  %s12382_s27 = scalar_lea.sflag [#allocation4], %s748_s22 }
 0x61b   : > { %v4392_v34 = vpop.permute.xlu1 %4391 }
 0x61c   : > { %v4450_v15 = vadd.f32 %v4392_v34, %v11475_v63  ;;  %v4390_v9 = vpop.permute.xlu0 %4389  ;;  %v4643_v63 = vld [vmem:[#allocation2 + $0x10] sm:$0xff] }
 0x61d   : > { %v4449_v3 = vadd.f32 %v4390_v9, %v11478_v8 }
 0x61e   : > { %v4531_v18 = vsel %vm11590_vm12, %v4450_v15, 0.0 }
 0x61f   : > { %v4572_v27 = vrot.slane %v4531_v18, 7  ;;  %v4530_v10 = vsel %vm11590_vm12, %v4449_v3, 0.0  ;;  %v4396_v28 = vpop.permute.xlu1 %4395  ;;  %vm4495_vm12 = vcmp.lt.s32.totalorder %v11616_v43, 16 }
 0x620   : > { %v4571_v14 = vrot.slane %v4530_v10, 7  ;;  %v4452_v8 = vadd.f32 %v4396_v28, %v11489_v30  ;;  %v4394_v44 = vpop.permute.xlu0 %4393  ;;  %v11624_v30 = vpack.c.bf16 %v4644_v54, %v4643_v63 }
 0x621   : > { %v11611_v41 = vsel %vm1747_vm2, %v4572_v27, 0.0  ;;  %v4451_v53 = vadd.f32 %v4394_v44, %v11493_v40 }
 0x622   : > { %v11619_v26 = vsel %vm1747_vm2, %v4571_v14, %v4572_v27  ;;  %v11622_v35 = vsel %vm1747_vm2, 0.0, %v4571_v14  ;;  %v4677_v37 = vrot.slane %v11611_v41, 1  ;;  %v4533_v5 = vsel %vm11604_vm5, %v4452_v8, 0.0 }
 0x623   : > { %v4674_v40 = vrot.slane %v11622_v35, 1  ;;  %v4532_v23 = vsel %vm11604_vm5, %v4451_v53, 0.0  ;;  %v4400_v57 = vpop.permute.xlu1 %4399  ;;  %v4575_v2 = vrot.slane %v4533_v5, 7  ;;  %v4675_v22 = vrot.slane %v11619_v26, 1  ;;  %vm11749_vm5 = vmand %vm4485_vm11, %vm4495_vm12 }
 0x624   : > { %v4574_v0 = vrot.slane %v4532_v23, 7  ;;  %v4454_v29 = vadd.f32 %v4400_v57, %v11502_v46  ;;  %v4398_v36 = vpop.permute.xlu0 %4397  ;;  %v5080_v16 = vrot.slane %v11611_v41, 2  ;;  %v5077_v52 = vrot.slane %v11622_v35, 2 }
 0x625   : > { %v4453_v11 = vadd.f32 %v4398_v36, %v11505_v51  ;;  %v11652_v58 = vsel %vm1747_vm2, %v4575_v2, 0.0  ;;  %v5078_v34 = vrot.slane %v11619_v26, 2  ;;  %v4676_v9 = vsel %vm1869_vm9, %v4674_v40, %v4675_v22 }
 0x626   : > { %v11655_v46 = vsel %vm1747_vm2, %v4574_v0, %v4575_v2  ;;  %v11658_v6 = vsel %vm1747_vm2, 0.0, %v4574_v0  ;;  %v4535_v55 = vsel %vm11637_vm10, %v4454_v29, 0.0  ;;  %v4682_v51 = vrot.slane %v11652_v58, 1  ;;  %8366 = vmatprep.mubr.msk.f32.mxu1 %vm1223_vm3, %v4676_v9  ;;  %v4648_v2 = vld [vmem:[#allocation2 + $0x38] sm:$0xff] }
 0x627   : > { %v4578_v61 = vrot.slane %v4535_v55, 7  ;;  %v4534_v13 = vsel %vm11637_vm10, %v4453_v11, 0.0  ;;  %v4404_v33 = vpop.permute.xlu1 %4403  ;;  %v4678_v27 = vsel %vm1869_vm9, %v4675_v22, %v4677_v37  ;;  %v4679_v63 = vrot.slane %v11658_v6, 1 }
 0x628   : > { %v4577_v15 = vrot.slane %v4534_v13, 7  ;;  %v4456_v18 = vadd.f32 %v4404_v33, %v11514_v42  ;;  %v4402_v10 = vpop.permute.xlu0 %4401  ;;  %v4680_v54 = vrot.slane %v11655_v46, 1  ;;  %8367 = vmatmul.mubr.msk.f32.vlgmr.msra.gmra.mrb[60].mxu1 %vm1223_vm3, %v4678_v27  ;;  %v8926_v8 = vpack.c.bf16 %v4646_v12, %v4645_v45  ;;  %v5069_v33 = vld [vmem:[#allocation2 + $0x80] sm:$0xff]  ;;  %v5070_v45 = vld [vmem:[#allocation2 + $0x88] sm:$0xff] }
 0x629   : > { %v11678_v28 = vsel %vm1747_vm2, %v4578_v61, 0.0  ;;  %v4455_v47 = vadd.f32 %v4402_v10, %v11517_v21  ;;  %8921 = vmatpush3.bf16.msra.mxu1 %v11483_v50  ;;  %v11720_v36 = vsel %vm2339_vm15, %v5077_v52, %v5078_v34  ;;  %v11723_v22 = vsel %vm2339_vm15, %v5078_v34, %v5080_v16 }
 0x62a   : > { %v4687_v42 = vrot.slane %v11678_v28, 1  ;;  %v11686_v14 = vsel %vm1747_vm2, %v4577_v15, %v4578_v61  ;;  %v11689_v56 = vsel %vm1747_vm2, 0.0, %v4577_v15  ;;  %v4537_v44 = vsel %vm11669_vm13, %v4456_v18, 0.0  ;;  %8923 = vmatprep.subr.bf16.mxu1 %v11624_v30 }
 0x62b   : > { %v4536_v21 = vsel %vm11669_vm13, %v4455_v47, 0.0  ;;  %v11698_v41 = vsel %vm1869_vm9, %v4679_v63, %v4680_v54  ;;  %v4408_v37 = vpop.permute.xlu1 %4407  ;;  %v11709_v40 = vsel %vm1869_vm9, %v4680_v54, %v4682_v51  ;;  %v4581_v5 = vrot.slane %v4537_v44, 7 }
 0x62c   : > { %v4580_v50 = vrot.slane %v4536_v21, 7  ;;  %8369 = vmatprep.mubr.msk.f32.mxu1 %vm1223_vm3, %v11698_v41  ;;  %v4458_v23 = vadd.f32 %v4408_v37, %v11526_v1  ;;  %v4406_v24 = vpop.permute.xlu0 %4405  ;;  %v4684_v57 = vrot.slane %v11689_v56, 1  ;;  %v4685_v29 = vrot.slane %v11686_v14, 1 }
 0x62d   : > { %v4457_v0 = vadd.f32 %v4406_v24, %v11529_v19  ;;  %v11726_v1 = vsel %vm1747_vm2, %v4581_v5, 0.0  ;;  %8370 = vmatmul.mubr.msk.f32.gmra.mrb[62].mxu1 %vm1223_vm3, %v11709_v40  ;;  %v8930_v13 = vpack.c.bf16 %v4648_v2, %v4647_v38  ;;  %v11774_v54 = vpack.c.bf16 %v5070_v45, %v5069_v33 }
 0x62e   : > { %v11729_v11 = vsel %vm1747_vm2, %v4580_v50, %v4581_v5  ;;  %v11732_v55 = vsel %vm1747_vm2, 0.0, %v4580_v50  ;;  %v4539_v19 = vsel %vm11704_vm1, %v4458_v23, 0.0  ;;  %v4692_v52 = vrot.slane %v11726_v1, 1  ;;  %8925 = vmatpush3.bf16.msra.mxu1 %v11624_v30 }
 0x62f   : > { %v4584_v51 = vrot.slane %v4539_v19, 7  ;;  %v4538_v16 = vsel %vm11704_vm1, %v4457_v0, 0.0  ;;  %v4412_v61 = vpop.permute.xlu1 %4411  ;;  %v11743_v34 = vsel %vm1869_vm9, %v4684_v57, %v4685_v29  ;;  %v11755_v3 = vsel %vm1869_vm9, %v4685_v29, %v4687_v42  ;;  %8927 = vmatprep.subr.bf16.mxu1 %v8926_v8 }
 0x630   : > { %v4583_v12 = vrot.slane %v4538_v16, 7  ;;  %v4460_v9 = vadd.f32 %v4412_v61, %v11538_v4  ;;  %v4410_v30 = vpop.permute.xlu0 %4409  ;;  %8372 = vmatprep.mubr.msk.f32.mxu1 %vm1223_vm3, %v11743_v34  ;;  %v4689_v43 = vrot.slane %v11732_v55, 1  ;;  %v4690_v10 = vrot.slane %v11729_v11, 1 }
 0x631   : > { %v11758_v18 = vsel %vm1747_vm2, %v4584_v51, 0.0  ;;  %v4459_v27 = vadd.f32 %v4410_v30, %v11541_v25  ;;  %8373 = vmatmul.mubr.msk.f32.gmra.mrb[64].mxu1 %vm1223_vm3, %v11755_v3  ;;  %v4478_v2 = vadd.s32 8, %v11584_v17  ;;  %v4479_v16 = vadd.s32 9, %v11584_v17 }
 0x632   : > { %v4697_v47 = vrot.slane %v11758_v18, 1  ;;  %v11767_v4 = vsel %vm1747_vm2, %v4583_v12, %v4584_v51  ;;  %v11770_v63 = vsel %vm1747_vm2, 0.0, %v4583_v12  ;;  %v4541_v25 = vsel %vm11749_vm5, %v4460_v9, 0.0  ;;  %8929 = vmatpush3.bf16.msra.mxu1 %v8926_v8 }
 0x633   : > { %v4540_v42 = vsel %vm11749_vm5, %v4459_v27, 0.0  ;;  %v11781_v44 = vsel %vm1869_vm9, %v4689_v43, %v4690_v10  ;;  %v4416_v53 = vpop.permute.xlu1 %4415  ;;  %v11792_v37 = vsel %vm1869_vm9, %v4690_v10, %v4692_v52  ;;  %v4587_v5 = vrot.slane %v4541_v25, 7  ;;  %8931 = vmatprep.subr.bf16.mxu1 %v8930_v13 }
 0x634   : > { %v4586_v50 = vrot.slane %v4540_v42, 7  ;;  %8375 = vmatprep.mubr.msk.f32.mxu1 %vm1223_vm3, %v11781_v44  ;;  %v4462_v23 = vadd.f32 %v4416_v53, %v11550_v20  ;;  %v4414_v24 = vpop.permute.xlu0 %4413  ;;  %v4694_v57 = vrot.slane %v11770_v63, 1  ;;  %v4695_v38 = vrot.slane %v11767_v4, 1 }
 0x635   : > { %v4461_v49 = vadd.f32 %v4414_v24, %v11553_v59  ;;  %v11803_v8 = vsel %vm1747_vm2, %v4587_v5, 0.0  ;;  %8376 = vmatmul.mubr.msk.f32.gmra.mrb[66].mxu1 %vm1223_vm3, %v11792_v37  ;;  %vm4488_vm10 = vcmp.ge.s32.totalorder %v4478_v2, 0  ;;  %vm4498_vm11 = vcmp.lt.s32.totalorder %v4478_v2, 16 }
 0x636   : > { %v11806_v0 = vsel %vm1747_vm2, %v4586_v50, %v4587_v5  ;;  %v11809_v20 = vsel %vm1747_vm2, 0.0, %v4586_v50  ;;  %v4543_v29 = vsel %vm11787_vm6, %v4462_v23, 0.0  ;;  %v4702_v59 = vrot.slane %v11803_v8, 1  ;;  %8933 = vmatpush3.bf16.msra.mxu1 %v8930_v13  ;;  %vm11882_vm0 = vmand %vm4488_vm10, %vm4498_vm11 }
 0x637   : > { %v4590_v19 = vrot.slane %v4543_v29, 7  ;;  %v4542_v52 = vsel %vm11787_vm6, %v4461_v49, 0.0  ;;  %v4420_v51 = vpop.permute.xlu1 %4419  ;;  %v11820_v33 = vsel %vm1869_vm9, %v4694_v57, %v4695_v38  ;;  %v11832_v15 = vsel %vm1869_vm9, %v4695_v38, %v4697_v47  ;;  %8935 = vmatprep.subr.bf16.mxu1 %v11774_v54 }
 0x638   : > { %v4589_v61 = vrot.slane %v4542_v52, 7  ;;  %v4464_v12 = vadd.f32 %v4420_v51, %v11558_v7  ;;  %v4418_v9 = vpop.permute.xlu0 %4417  ;;  %8378 = vmatprep.mubr.msk.f32.mxu1 %vm1223_vm3, %v11820_v33  ;;  %v4699_v13 = vrot.slane %v11809_v20, 1  ;;  %v4700_v30 = vrot.slane %v11806_v0, 1  ;;  %v5076_v51 = vld [vmem:[#allocation2 + $0xb8] sm:$0xff] }
 0x639   : > { %v11836_v17 = vsel %vm1747_vm2, %v4590_v19, 0.0  ;;  %v4463_v62 = vadd.f32 %v4418_v9, %v11561_v39  ;;  %8379 = vmatmul.mubr.msk.f32.gmra.mrb[68].mxu1 %vm1223_vm3, %v11832_v15  ;;  %vm4489_vm12 = vcmp.ge.s32.totalorder %v4479_v16, 0  ;;  %vm4499_vm13 = vcmp.lt.s32.totalorder %v4479_v16, 16 }
 0x63a   : > { %v11844_v7 = vsel %vm1747_vm2, %v4589_v61, %v4590_v19  ;;  %v11847_v27 = vsel %vm1747_vm2, 0.0, %v4589_v61  ;;  %v4545_v43 = vsel %vm11826_vm8, %v4464_v12, 0.0  ;;  %v11856_v10 = vsel %vm1869_vm9, %v4699_v13, %v4700_v30  ;;  %vm11889_vm14 = vmand %vm4489_vm12, %vm4499_vm13 }
 0x63b   : > { %v4544_v39 = vsel %vm11826_vm8, %v4463_v62, 0.0  ;;  %v4424_v47 = vpop.permute.xlu1 %4423  ;;  %v11859_v25 = vsel %vm1869_vm9, %v4700_v30, %v4702_v59  ;;  %v4707_v42 = vrot.slane %v11836_v17, 1  ;;  %v4593_v21 = vrot.slane %v4545_v43, 7  ;;  %8381 = vmatprep.mubr.msk.f32.mxu1 %vm1223_vm3, %v11856_v10 }
 0x63c   : > { %v4592_v53 = vrot.slane %v4544_v39, 7  ;;  %v4422_v5 = vpop.permute.xlu0 %4421  ;;  %v4704_v50 = vrot.slane %v11847_v27, 1  ;;  %v4466_v23 = vadd.f32 %v4424_v47, %v11568_v48  ;;  %v4705_v24 = vrot.slane %v11844_v7, 1  ;;  %v5071_v47 = vld [vmem:[#allocation2 + $0x90] sm:$0xff] }
 0x63d   : > { %v11868_v57 = vsel %vm1747_vm2, %v4593_v21, 0.0  ;;  %8382 = vmatmul.mubr.msk.f32.gmra.mrb[70].mxu1 %vm1223_vm3, %v11859_v25  ;;  %v4465_v29 = vadd.f32 %v4422_v5, %v11571_v32 }
 0x63e   : > { %v11871_v49 = vsel %vm1747_vm2, %v4592_v53, %v4593_v21  ;;  %v11874_v38 = vsel %vm1747_vm2, 0.0, %v4592_v53  ;;  %v4712_v48 = vrot.slane %v11868_v57, 1  ;;  %v11887_v52 = vsel %vm1869_vm9, %v4704_v50, %v4705_v24  ;;  %v5073_v50 = vld [vmem:[#allocation2 + $0xa0] sm:$0xff] }
 0x63f   : > { %v4428_v19 = vpop.permute.xlu1 %4427  ;;  %v11895_v32 = vsel %vm1869_vm9, %v4705_v24, %v4707_v42  ;;  %8384 = vmatprep.mubr.msk.f32.mxu1 %vm1223_vm3, %v11887_v52  ;;  %v4709_v2 = vrot.slane %v11874_v38, 1  ;;  %v4710_v45 = vrot.slane %v11871_v49, 1  ;;  %v4547_v12 = vsel %vm11882_vm0, %v4466_v23, 0.0  ;;  %v5072_v42 = vld [vmem:[#allocation2 + $0x98] sm:$0xff]  ;;  %v5074_v23 = vld [vmem:[#allocation2 + $0xa8] sm:$0xff] }
 0x640   : > { %v4468_v16 = vadd.f32 %v4428_v19, %v11578_v31  ;;  %v4426_v61 = vpop.permute.xlu0 %4425  ;;  %v4546_v9 = vsel %vm11882_vm0, %v4465_v29, 0.0  ;;  %v11918_v43 = vrot.slane %v4547_v12, 7  ;;  %v8938_v53 = vpack.c.bf16 %v5072_v42, %v5071_v47  ;;  %v5075_v19 = vld [vmem:[#allocation2 + $0xb0] sm:$0xff] }
 0x641   : > { %8385 = vmatmul.mubr.msk.f32.gmra.mrb[72].mxu1 %vm1223_vm3, %v11895_v32  ;;  %v4467_v31 = vadd.f32 %v4426_v61, %v11581_v60  ;;  %v11911_v13 = vsel %vm1869_vm9, %v4709_v2, %v4710_v45  ;;  %v11914_v30 = vsel %vm1869_vm9, %v4710_v45, %v4712_v48  ;;  %v11920_v39 = vrot.slane %v4546_v9, 7  ;;  %v5311_v9 = vld [vmem:[#allocation2 + $0xc0] sm:$0xff] }
 0x642   : > { %v4549_v62 = vsel %vm11889_vm14, %v4468_v16, 0.0  ;;  %8387 = vmatprep.mubr.msk.f32.mxu1 %vm1223_vm3, %v11911_v13  ;;  %v8946_v12 = vpack.c.bf16 %v5076_v51, %v5075_v19  ;;  %v5087_v51 = vrot.slane %v11689_v56, 2 }
 0x643   : > { %v4599_v21 = vrot.slane %v4549_v62, 7  ;;  %v4548_v60 = vsel %vm11889_vm14, %v4467_v31, 0.0  ;;  %v11931_v24 = vsel %vm1747_vm2, %v11920_v39, %v11918_v43  ;;  %v5312_v31 = vld [vmem:[#allocation2 + $0xc8] sm:$0xff] }
 0x644   : > { %v4598_v5 = vrot.slane %v4548_v60, 7  ;;  %v8950_v60 = vpack.c.bf16 %v5312_v31, %v5311_v9  ;;  %v5093_v9 = vrot.slane %v11729_v11, 2  ;;  %v5095_v31 = vrot.slane %v11726_v1, 2 }
 0x645   : > { %8388 = vmatmul.mubr.msk.f32.gmra.mrb[74].mxu1 %vm1223_vm3, %v11914_v30  ;;  %v4640_v29 = vsel %vm1747_vm2, %v4599_v21, 0.0 }
 0x646   : > { %8406 = vmatprep.mubr.msk.f32.mxu1 %vm1223_vm3, %v11622_v35  ;;  %v8942_v35 = vpack.c.bf16 %v5074_v23, %v5073_v50  ;;  %v6032_v48 = vrot.slane %v4640_v29, 1  ;;  %v6211_v59 = vrot.slane %v4640_v29, 2  ;;  %v11940_v16 = vsel %vm1747_vm2, 0.0, %v4598_v5 }
 0x647   : > { %v11943_v61 = vsel %vm1747_vm2, %v4598_v5, %v4599_v21  ;;  %v5314_v5 = vld [vmem:[#allocation2 + $0xd8] sm:$0xff]  ;;  %v5082_v50 = vrot.slane %v11658_v6, 2  ;;  %v5083_v23 = vrot.slane %v11655_v46, 2 }
 0x648   : > { %v6030_v2 = vrot.slane %v11943_v61, 1  ;;  %v6209_v45 = vrot.slane %v11943_v61, 2 }
 0x649   : > { %8407 = vmatmul.mubr.msk.f32.vlgmr.msra.gmra.mrb[60].mxu1 %vm1223_vm3, %v11619_v26  ;;  %v6029_v26 = vrot.slane %v11940_v16, 1  ;;  %v11995_v19 = vsel %vm2339_vm15, %v5082_v50, %v5083_v23 }
 0x64a   : > { %8937 = vmatpush3.bf16.msra.mxu1 %v11774_v54  ;;  %8409 = vmatprep.mubr.msk.f32.mxu1 %vm1223_vm3, %v11658_v6  ;;  %v6208_v54 = vrot.slane %v11940_v16, 2  ;;  %v11957_v47 = vsel %vm1869_vm9, %v6030_v2, %v6032_v48  ;;  %v11963_v21 = vsel %vm2339_vm15, %v6209_v45, %v6211_v59  ;;  %v5315_v48 = vld [vmem:[#allocation2 + $0xe0] sm:$0xff]  ;;  %v5316_v59 = vld [vmem:[#allocation2 + $0xe8] sm:$0xff] }
 0x64b   : > { %8939 = vmatprep.subr.bf16.mxu1 %v8938_v53  ;;  %v11954_v62 = vsel %vm1869_vm9, %v6029_v26, %v6030_v2  ;;  %v5088_v26 = vrot.slane %v11686_v14, 2  ;;  %v5317_v2 = vld [vmem:[#allocation2 + $0xf0] sm:$0xff] }
 0x64c   : > { %v11960_v42 = vsel %vm2339_vm15, %v6208_v54, %v6209_v45 }
 0x64d   : > { %8410 = vmatmul.mubr.msk.f32.gmra.mrb[62].mxu1 %vm1223_vm3, %v11655_v46  ;;  %v12008_v45 = vsel %vm2339_vm15, %v5087_v51, %v5088_v26  ;;  %v5102_v51 = vrot.slane %v11809_v20, 2 }
 0x64e   : > { %8412 = vmatprep.mubr.msk.f32.mxu1 %vm1223_vm3, %v11689_v56  ;;  %8941 = vmatpush3.bf16.msra.mxu1 %v8938_v53  ;;  %v5313_v53 = vld [vmem:[#allocation2 + $0xd0] sm:$0xff] }
 0x64f   : > { %8943 = vmatprep.subr.bf16.mxu1 %v8942_v35  ;;  %v8954_v29 = vpack.c.bf16 %v5314_v5, %v5313_v53  ;;  %v5486_v53 = vld [vmem:[#allocation2 + $0x100] sm:$0xff]  ;;  %v5487_v5 = vld [vmem:[#allocation2 + $0x108] sm:$0xff] }
 0x650   : > { %v8966_v1 = vpack.c.bf16 %v5487_v5, %v5486_v53  ;;  %v5115_v53 = vrot.slane %v11868_v57, 2 }
 0x651   : > { %8413 = vmatmul.mubr.msk.f32.gmra.mrb[64].mxu1 %vm1223_vm3, %v11686_v14 }
 0x652   : > { %8415 = vmatprep.mubr.msk.f32.mxu1 %vm1223_vm3, %v11732_v55  ;;  %8945 = vmatpush3.bf16.msra.mxu1 %v8942_v35  ;;  %v5085_v35 = vrot.slane %v11652_v58, 2  ;;  %v5090_v58 = vrot.slane %v11678_v28, 2 }
 0x653   : > { %8947 = vmatprep.subr.bf16.mxu1 %v8946_v12 }
 0x654   : > { %v12003_v54 = vsel %vm2339_vm15, %v5083_v23, %v5085_v35  ;;  %v5097_v23 = vrot.slane %v11770_v63, 2  ;;  %v5098_v35 = vrot.slane %v11767_v4, 2 }
 0x655   : > { %8416 = vmatmul.mubr.msk.f32.gmra.mrb[66].mxu1 %vm1223_vm3, %v11729_v11 }
 0x656   : > { %8418 = vmatprep.mubr.msk.f32.mxu1 %vm1223_vm3, %v11770_v63  ;;  %8949 = vmatpush3.bf16.msra.mxu1 %v8946_v12  ;;  %v5092_v12 = vrot.slane %v11732_v55, 2 }
 0x657   : > { %8951 = vmatprep.subr.bf16.mxu1 %v8950_v60 }
 0x658   : > { %v12021_v50 = vsel %vm2339_vm15, %v5092_v12, %v5093_v9  ;;  %v5110_v12 = vrot.slane %v11836_v17, 2 }
 0x659   : > { %8419 = vmatmul.mubr.msk.f32.gmra.mrb[68].mxu1 %vm1223_vm3, %v11767_v4 }
 0x65a   : > { %8421 = vmatprep.mubr.msk.f32.mxu1 %vm1223_vm3, %v11809_v20 }
 0x65d   : > { %8422 = vmatmul.mubr.msk.f32.gmra.mrb[70].mxu1 %vm1223_vm3, %v11806_v0 }
 0x65e   : > { %8424 = vmatprep.mubr.msk.f32.mxu1 %vm1223_vm3, %v11847_v27 }
 0x661   : > { %8425 = vmatmul.mubr.msk.f32.gmra.mrb[72].mxu1 %vm1223_vm3, %v11844_v7 }
 0x662   : > { %8427 = vmatprep.mubr.msk.f32.mxu1 %vm1223_vm3, %v11874_v38 }
 0x665   : > { %8428 = vmatmul.mubr.msk.f32.gmra.mrb[74].mxu1 %vm1223_vm3, %v11871_v49 }
 0x666   : > { %8446 = vmatprep.mubr.msk.f32.mxu1 %vm1223_vm3, %v11720_v36  ;;  %v8958_v36 = vpack.c.bf16 %v5316_v59, %v5315_v48  ;;  %v12029_v48 = vsel %vm2339_vm15, %v5093_v9, %v5095_v31  ;;  %v12034_v59 = vsel %vm2339_vm15, %v5097_v23, %v5098_v35  ;;  %v5113_v31 = vrot.slane %v11871_v49, 2 }
 0x668   : > { %v12078_v23 = vsel %vm2339_vm15, %v5113_v31, %v5115_v53  ;;  %v5669_v53 = vld [vmem:[#allocation2 + $0x158] sm:$0xff] }
 0x669   : > { %8447 = vmatmul.mubr.msk.f32.vlgmr.msra.gmra.mrb[60].mxu1 %vm1223_vm3, %v11723_v22  ;;  %v5318_v22 = vld [vmem:[#allocation2 + $0xf8] sm:$0xff] }
 0x66a   : > { %8953 = vmatpush3.bf16.msra.mxu1 %v8950_v60  ;;  %8449 = vmatprep.mubr.msk.f32.mxu1 %vm1223_vm3, %v11995_v19  ;;  %v8962_v28 = vpack.c.bf16 %v5318_v22, %v5317_v2  ;;  %v12016_v60 = vsel %vm2339_vm15, %v5088_v26, %v5090_v58  ;;  %v5103_v26 = vrot.slane %v11806_v0, 2  ;;  %v5107_v2 = vrot.slane %v11847_v27, 2 }
 0x66b   : > { %8955 = vmatprep.subr.bf16.mxu1 %v8954_v29  ;;  %v5108_v22 = vrot.slane %v11844_v7, 2 }
 0x66c   : > { %v12047_v58 = vsel %vm2339_vm15, %v5102_v51, %v5103_v26  ;;  %v5490_v51 = vld [vmem:[#allocation2 + $0x120] sm:$0xff] }
 0x66d   : > { %8450 = vmatmul.mubr.msk.f32.gmra.mrb[62].mxu1 %vm1223_vm3, %v12003_v54  ;;  %v12060_v9 = vsel %vm2339_vm15, %v5107_v2, %v5108_v22  ;;  %v12068_v17 = vsel %vm2339_vm15, %v5108_v22, %v5110_v12  ;;  %v5492_v2 = vld [vmem:[#allocation2 + $0x130] sm:$0xff]  ;;  %v5493_v22 = vld [vmem:[#allocation2 + $0x138] sm:$0xff]  ;;  %v5666_v12 = vld [vmem:[#allocation2 + $0x140] sm:$0xff] }
 0x66e   : > { %8452 = vmatprep.mubr.msk.f32.mxu1 %vm1223_vm3, %v12008_v45  ;;  %8957 = vmatpush3.bf16.msra.mxu1 %v8954_v29  ;;  %v5100_v29 = vrot.slane %v11758_v18, 2  ;;  %v5105_v18 = vrot.slane %v11803_v8, 2 }
 0x66f   : > { %8959 = vmatprep.subr.bf16.mxu1 %v8958_v36 }
 0x670   : > { %v12055_v8 = vsel %vm2339_vm15, %v5103_v26, %v5105_v18  ;;  %v5491_v26 = vld [vmem:[#allocation2 + $0x128] sm:$0xff] }
 0x671   : > { %8453 = vmatmul.mubr.msk.f32.gmra.mrb[64].mxu1 %vm1223_vm3, %v12016_v60  ;;  %v8974_v18 = vpack.c.bf16 %v5491_v26, %v5490_v51  ;;  %v5672_v51 = vld [vmem:[#allocation2 + $0x170] sm:$0xff]  ;;  %v5673_v26 = vld [vmem:[#allocation2 + $0x178] sm:$0xff] }
 0x672   : > { %8455 = vmatprep.mubr.msk.f32.mxu1 %vm1223_vm3, %v12021_v50  ;;  %8961 = vmatpush3.bf16.msra.mxu1 %v8958_v36  ;;  %v12042_v36 = vsel %vm2339_vm15, %v5098_v35, %v5100_v29  ;;  %v5488_v35 = vld [vmem:[#allocation2 + $0x110] sm:$0xff]  ;;  %v5489_v29 = vld [vmem:[#allocation2 + $0x118] sm:$0xff] }
 0x673   : > { %8963 = vmatprep.subr.bf16.mxu1 %v8962_v28  ;;  %v8970_v57 = vpack.c.bf16 %v5489_v29, %v5488_v35  ;;  %v5670_v29 = vld [vmem:[#allocation2 + $0x160] sm:$0xff] }
 0x675   : > { %8456 = vmatmul.mubr.msk.f32.gmra.mrb[66].mxu1 %vm1223_vm3, %v12029_v48 }
 0x676   : > { %8458 = vmatprep.mubr.msk.f32.mxu1 %vm1223_vm3, %v12034_v59  ;;  %8965 = vmatpush3.bf16.msra.mxu1 %v8962_v28  ;;  %v5112_v28 = vrot.slane %v11874_v38, 2 }
 0x677   : > { %8967 = vmatprep.subr.bf16.mxu1 %v8966_v1 }
 0x678   : > { %v12073_v5 = vsel %vm2339_vm15, %v5112_v28, %v5113_v31  ;;  %v5667_v28 = vld [vmem:[#allocation2 + $0x148] sm:$0xff]  ;;  %v5668_v31 = vld [vmem:[#allocation2 + $0x150] sm:$0xff] }
 0x679   : > { %8459 = vmatmul.mubr.msk.f32.gmra.mrb[68].mxu1 %vm1223_vm3, %v12042_v36  ;;  %v8986_v35 = vpack.c.bf16 %v5669_v53, %v5668_v31  ;;  %v5847_v31 = vld [vmem:[#allocation2 + $0x190] sm:$0xff]  ;;  %v5848_v53 = vld [vmem:[#allocation2 + $0x198] sm:$0xff] }
 0x67a   : > { %8461 = vmatprep.mubr.msk.f32.mxu1 %vm1223_vm3, %v12047_v58 }
 0x67d   : > { %8462 = vmatmul.mubr.msk.f32.gmra.mrb[70].mxu1 %vm1223_vm3, %v12055_v8 }
 0x67e   : > { %8464 = vmatprep.mubr.msk.f32.mxu1 %vm1223_vm3, %v12060_v9 }
 0x681   : > { %8465 = vmatmul.mubr.msk.f32.gmra.mrb[72].mxu1 %vm1223_vm3, %v12068_v17 }
 0x682   : > { %8467 = vmatprep.mubr.msk.f32.mxu1 %vm1223_vm3, %v12073_v5 }
 0x685   : > { %8468 = vmatmul.mubr.msk.f32.gmra.mrb[74].mxu1 %vm1223_vm3, %v12078_v23 }
 0x686   : > { %8486 = vmatprep.mubr.msk.f32.mxu1 %vm1223_vm3, %v11658_v6  ;;  %v8978_v6 = vpack.c.bf16 %v5493_v22, %v5492_v2  ;;  %v5846_v2 = vld [vmem:[#allocation2 + $0x188] sm:$0xff]  ;;  %v4639_v22 = vsel %vm1747_vm2, %v11918_v43, 0.0 }
 0x689   : > { %8487 = vmatmul.mubr.msk.f32.vlgmr.msra.gmra.mrb[60].mxu1 %vm1223_vm3, %v11655_v46  ;;  %v8982_v46 = vpack.c.bf16 %v5667_v28, %v5666_v12  ;;  %v5496_v12 = vrot.slane %v11931_v24, 1  ;;  %v5498_v28 = vrot.slane %v4639_v22, 1 }
 0x68a   : > { %8969 = vmatpush3.bf16.msra.mxu1 %v8966_v1  ;;  %8489 = vmatprep.mubr.msk.f32.mxu1 %vm1223_vm3, %v11689_v56  ;;  %v12112_v1 = vsel %vm1747_vm2, 0.0, %v11920_v39 }
 0x68b   : > { %8971 = vmatprep.subr.bf16.mxu1 %v8970_v57  ;;  %v12156_v43 = vsel %vm1869_vm9, %v5496_v12, %v5498_v28 }
 0x68d   : > { %8490 = vmatmul.mubr.msk.f32.gmra.mrb[62].mxu1 %vm1223_vm3, %v11686_v14 }
 0x68e   : > { %8492 = vmatprep.mubr.msk.f32.mxu1 %vm1223_vm3, %v11732_v55  ;;  %8973 = vmatpush3.bf16.msra.mxu1 %v8970_v57  ;;  %v5671_v57 = vld [vmem:[#allocation2 + $0x168] sm:$0xff] }
 0x68f   : > { %8975 = vmatprep.subr.bf16.mxu1 %v8974_v18  ;;  %v8990_v39 = vpack.c.bf16 %v5671_v57, %v5670_v29  ;;  %v5849_v29 = vld [vmem:[#allocation2 + $0x1a0] sm:$0xff]  ;;  %v5850_v57 = vld [vmem:[#allocation2 + $0x1a8] sm:$0xff] }
 0x691   : > { %8493 = vmatmul.mubr.msk.f32.gmra.mrb[64].mxu1 %vm1223_vm3, %v11729_v11 }
 0x692   : > { %8495 = vmatprep.mubr.msk.f32.mxu1 %vm1223_vm3, %v11770_v63  ;;  %8977 = vmatpush3.bf16.msra.mxu1 %v8974_v18  ;;  %v5845_v18 = vld [vmem:[#allocation2 + $0x180] sm:$0xff] }
 0x693   : > { %8979 = vmatprep.subr.bf16.mxu1 %v8978_v6 }
 0x695   : > { %8496 = vmatmul.mubr.msk.f32.gmra.mrb[66].mxu1 %vm1223_vm3, %v11767_v4 }
 0x696   : > { %8498 = vmatprep.mubr.msk.f32.mxu1 %vm1223_vm3, %v11809_v20  ;;  %8981 = vmatpush3.bf16.msra.mxu1 %v8978_v6  ;;  %v5495_v6 = vrot.slane %v12112_v1, 1 }
 0x697   : > { %8983 = vmatprep.subr.bf16.mxu1 %v8982_v46 }
 0x699   : > { %8499 = vmatmul.mubr.msk.f32.gmra.mrb[68].mxu1 %vm1223_vm3, %v11806_v0 }
 0x69a   : > { %8501 = vmatprep.mubr.msk.f32.mxu1 %vm1223_vm3, %v11847_v27 }
 0x69d   : > { %8502 = vmatmul.mubr.msk.f32.gmra.mrb[70].mxu1 %vm1223_vm3, %v11844_v7 }
 0x69e   : > { %8504 = vmatprep.mubr.msk.f32.mxu1 %vm1223_vm3, %v11874_v38 }
 0x6a1   : > { %8505 = vmatmul.mubr.msk.f32.gmra.mrb[72].mxu1 %vm1223_vm3, %v11871_v49 }
 0x6a2   : > { %8507 = vmatprep.mubr.msk.f32.mxu1 %vm1223_vm3, %v12112_v1 }
 0x6a5   : > { %8508 = vmatmul.mubr.msk.f32.gmra.mrb[74].mxu1 %vm1223_vm3, %v11931_v24 }
 0x6a6   : > { %8526 = vmatprep.mubr.msk.f32.mxu1 %vm1223_vm3, %v11698_v41  ;;  %v8994_v41 = vpack.c.bf16 %v5673_v26, %v5672_v51  ;;  %v5851_v51 = vld [vmem:[#allocation2 + $0x1b0] sm:$0xff]  ;;  %v5852_v26 = vld [vmem:[#allocation2 + $0x1b8] sm:$0xff] }
 0x6a9   : > { %8527 = vmatmul.mubr.msk.f32.vlgmr.msra.gmra.mrb[60].mxu1 %vm1223_vm3, %v11709_v40  ;;  %v8998_v40 = vpack.c.bf16 %v5846_v2, %v5845_v18  ;;  %v6021_v18 = vld [vmem:[#allocation2 + $0x1c8] sm:$0xff]  ;;  %v5674_v2 = vrot.slane %v12112_v1, 2 }
 0x6aa   : > { %8985 = vmatpush3.bf16.msra.mxu1 %v8982_v46  ;;  %8529 = vmatprep.mubr.msk.f32.mxu1 %vm1223_vm3, %v11743_v34  ;;  %v12151_v46 = vsel %vm1869_vm9, %v5495_v6, %v5496_v12  ;;  %v5677_v6 = vrot.slane %v4639_v22, 2 }
 0x6ab   : > { %8987 = vmatprep.subr.bf16.mxu1 %v8986_v35 }
 0x6ad   : > { %8530 = vmatmul.mubr.msk.f32.gmra.mrb[62].mxu1 %vm1223_vm3, %v11755_v3 }
 0x6ae   : > { %8532 = vmatprep.mubr.msk.f32.mxu1 %vm1223_vm3, %v11781_v44  ;;  %8989 = vmatpush3.bf16.msra.mxu1 %v8986_v35  ;;  %v9002_v35 = vpack.c.bf16 %v5848_v53, %v5847_v31  ;;  %v6022_v31 = vld [vmem:[#allocation2 + $0x1d0] sm:$0xff]  ;;  %v6023_v53 = vld [vmem:[#allocation2 + $0x1d8] sm:$0xff] }
 0x6af   : > { %8991 = vmatprep.subr.bf16.mxu1 %v8990_v39  ;;  %v9018_v22 = vpack.c.bf16 %v6023_v53, %v6022_v31 }
 0x6b1   : > { %8533 = vmatmul.mubr.msk.f32.gmra.mrb[64].mxu1 %vm1223_vm3, %v11792_v37 }
 0x6b2   : > { %8535 = vmatprep.mubr.msk.f32.mxu1 %vm1223_vm3, %v11820_v33  ;;  %8993 = vmatpush3.bf16.msra.mxu1 %v8990_v39  ;;  %v9006_v39 = vpack.c.bf16 %v5850_v57, %v5849_v29  ;;  %v6025_v29 = vld [vmem:[#allocation2 + $0x1e8] sm:$0xff] }
 0x6b3   : > { %8995 = vmatprep.subr.bf16.mxu1 %v8994_v41 }
 0x6b5   : > { %8536 = vmatmul.mubr.msk.f32.gmra.mrb[66].mxu1 %vm1223_vm3, %v11832_v15 }
 0x6b6   : > { %8538 = vmatprep.mubr.msk.f32.mxu1 %vm1223_vm3, %v11856_v10  ;;  %8997 = vmatpush3.bf16.msra.mxu1 %v8994_v41  ;;  %v6020_v41 = vld [vmem:[#allocation2 + $0x1c0] sm:$0xff] }
 0x6b7   : > { %8999 = vmatprep.subr.bf16.mxu1 %v8998_v40 }
 0x6b9   : > { %8539 = vmatmul.mubr.msk.f32.gmra.mrb[68].mxu1 %vm1223_vm3, %v11859_v25 }
 0x6ba   : > { %8541 = vmatprep.mubr.msk.f32.mxu1 %vm1223_vm3, %v11887_v52 }
 0x6bd   : > { %8542 = vmatmul.mubr.msk.f32.gmra.mrb[70].mxu1 %vm1223_vm3, %v11895_v32 }
 0x6be   : > { %8544 = vmatprep.mubr.msk.f32.mxu1 %vm1223_vm3, %v11911_v13 }
 0x6c1   : > { %8545 = vmatmul.mubr.msk.f32.gmra.mrb[72].mxu1 %vm1223_vm3, %v11914_v30 }
 0x6c2   : > { %8547 = vmatprep.mubr.msk.f32.mxu1 %vm1223_vm3, %v12151_v46 }
 0x6c5   : > { %8548 = vmatmul.mubr.msk.f32.gmra.mrb[74].mxu1 %vm1223_vm3, %v12156_v43 }
 0x6c6   : > { %8566 = vmatprep.mubr.msk.f32.mxu1 %vm1223_vm3, %v11995_v19  ;;  %v9010_v19 = vpack.c.bf16 %v5852_v26, %v5851_v51  ;;  %v6027_v51 = vld [vmem:[#allocation2 + $0x1f8] sm:$0xff]  ;;  %v6200_v26 = vld [vmem:[#allocation2 + $0x200] sm:$0xff] }
 0x6c9   : > { %8567 = vmatmul.mubr.msk.f32.vlgmr.msra.gmra.mrb[60].mxu1 %vm1223_vm3, %v12003_v54  ;;  %v9014_v54 = vpack.c.bf16 %v6021_v18, %v6020_v41 }
 0x6ca   : > { %9001 = vmatpush3.bf16.msra.mxu1 %v8998_v40  ;;  %8569 = vmatprep.mubr.msk.f32.mxu1 %vm1223_vm3, %v12008_v45  ;;  %v5675_v40 = vrot.slane %v11931_v24, 2 }
 0x6cb   : > { %9003 = vmatprep.subr.bf16.mxu1 %v9002_v35 }
 0x6cc   : > { %v12191_v12 = vsel %vm2339_vm15, %v5674_v2, %v5675_v40  ;;  %v12196_v28 = vsel %vm2339_vm15, %v5675_v40, %v5677_v6  ;;  %v9453_v40 = vld [vmem:[%s10146_s23 + $0x40] sm:$0xff] }
 0x6cd   : > { %8570 = vmatmul.mubr.msk.f32.gmra.mrb[62].mxu1 %vm1223_vm3, %v12016_v60 }
 0x6ce   : > { %8572 = vmatprep.mubr.msk.f32.mxu1 %vm1223_vm3, %v12021_v50  ;;  %9005 = vmatpush3.bf16.msra.mxu1 %v9002_v35  ;;  %v6024_v35 = vld [vmem:[#allocation2 + $0x1e0] sm:$0xff] }
 0x6cf   : > { %9007 = vmatprep.subr.bf16.mxu1 %v9006_v39  ;;  %v9022_v57 = vpack.c.bf16 %v6025_v29, %v6024_v35  ;;  %v9455_v29 = vld [vmem:[%s10146_s23 + $0x50] sm:$0xff] }
 0x6d1   : > { %8573 = vmatmul.mubr.msk.f32.gmra.mrb[64].mxu1 %vm1223_vm3, %v12029_v48 }
 0x6d2   : > { %8575 = vmatprep.mubr.msk.f32.mxu1 %vm1223_vm3, %v12034_v59  ;;  %9009 = vmatpush3.bf16.msra.mxu1 %v9006_v39  ;;  %v6026_v39 = vld [vmem:[#allocation2 + $0x1f0] sm:$0xff] }
 0x6d3   : > { %9011 = vmatprep.subr.bf16.mxu1 %v9010_v19 }
 0x6d5   : > { %8576 = vmatmul.mubr.msk.f32.gmra.mrb[66].mxu1 %vm1223_vm3, %v12042_v36 }
 0x6d6   : > { %8578 = vmatprep.mubr.msk.f32.mxu1 %vm1223_vm3, %v12047_v58  ;;  %9013 = vmatpush3.bf16.msra.mxu1 %v9010_v19  ;;  %v6201_v19 = vld [vmem:[#allocation2 + $0x208] sm:$0xff] }
 0x6d7   : > { %9015 = vmatprep.subr.bf16.mxu1 %v9014_v54 }
 0x6d9   : > { %8579 = vmatmul.mubr.msk.f32.gmra.mrb[68].mxu1 %vm1223_vm3, %v12055_v8 }
 0x6da   : > { %8581 = vmatprep.mubr.msk.f32.mxu1 %vm1223_vm3, %v12060_v9 }
 0x6dd   : > { %8582 = vmatmul.mubr.msk.f32.gmra.mrb[70].mxu1 %vm1223_vm3, %v12068_v17 }
 0x6de   : > { %8584 = vmatprep.mubr.msk.f32.mxu1 %vm1223_vm3, %v12073_v5 }
 0x6e1   : > { %8585 = vmatmul.mubr.msk.f32.gmra.mrb[72].mxu1 %vm1223_vm3, %v12078_v23 }
 0x6e2   : > { %8587 = vmatprep.mubr.msk.f32.mxu1 %vm1223_vm3, %v12191_v12 }
 0x6e5   : > { %8588 = vmatmul.mubr.msk.f32.gmra.mrb[74].mxu1 %vm1223_vm3, %v12196_v28 }
 0x6e6   : > { %8606 = vmatprep.mubr.msk.f32.mxu1 %vm1223_vm3, %v11689_v56  ;;  %v9026_v56 = vpack.c.bf16 %v6027_v51, %v6026_v39 }
 0x6e9   : > { %8607 = vmatmul.mubr.msk.f32.vlgmr.msra.gmra.mrb[60].mxu1 %vm1223_vm3, %v11686_v14  ;;  %v9030_v14 = vpack.c.bf16 %v6201_v19, %v6200_v26  ;;  %v9456_v19 = vld [vmem:[%s10146_s23 + $0x68] sm:$0xff] }
 0x6ea   : > { %9017 = vmatpush3.bf16.msra.mxu1 %v9014_v54  ;;  %8609 = vmatprep.mubr.msk.f32.mxu1 %vm1223_vm3, %v11732_v55  ;;  %v6203_v55 = vld [vmem:[#allocation2 + $0x218] sm:$0xff]  ;;  %v9452_v54 = vld [vmem:[%s10146_s23 + $0x48] sm:$0xff] }
 0x6eb   : > { %9019 = vmatprep.subr.bf16.mxu1 %v9018_v22 }
 0x6ed   : > { %8610 = vmatmul.mubr.msk.f32.gmra.mrb[62].mxu1 %vm1223_vm3, %v11729_v11  ;;  %v6202_v11 = vld [vmem:[#allocation2 + $0x210] sm:$0xff] }
 0x6ee   : > { %8612 = vmatprep.mubr.msk.f32.mxu1 %vm1223_vm3, %v11770_v63  ;;  %9021 = vmatpush3.bf16.msra.mxu1 %v9018_v22  ;;  %v6204_v63 = vld [vmem:[#allocation2 + $0x220] sm:$0xff]  ;;  %v9454_v22 = vld [vmem:[%s10146_s23 + $0x58] sm:$0xff] }
 0x6ef   : > { %9023 = vmatprep.subr.bf16.mxu1 %v9022_v57 }
 0x6f1   : > { %8613 = vmatmul.mubr.msk.f32.gmra.mrb[64].mxu1 %vm1223_vm3, %v11767_v4  ;;  %v9034_v4 = vpack.c.bf16 %v6203_v55, %v6202_v11  ;;  %v9457_v11 = vld [vmem:[%s10146_s23 + $0x60] sm:$0xff] }
 0x6f2   : > { %8615 = vmatprep.mubr.msk.f32.mxu1 %vm1223_vm3, %v11809_v20  ;;  %9025 = vmatpush3.bf16.msra.mxu1 %v9022_v57 }
 0x6f3   : > { %9027 = vmatprep.subr.bf16.mxu1 %v9026_v56 }
 0x6f5   : > { %8616 = vmatmul.mubr.msk.f32.gmra.mrb[66].mxu1 %vm1223_vm3, %v11806_v0  ;;  %v6205_v0 = vld [vmem:[#allocation2 + $0x228] sm:$0xff] }
 0x6f6   : > { %8618 = vmatprep.mubr.msk.f32.mxu1 %vm1223_vm3, %v11847_v27  ;;  %9029 = vmatpush3.bf16.msra.mxu1 %v9026_v56  ;;  %v9038_v20 = vpack.c.bf16 %v6205_v0, %v6204_v63  ;;  %v6207_v27 = vld [vmem:[#allocation2 + $0x238] sm:$0xff] }
 0x6f7   : > { %9031 = vmatprep.subr.bf16.mxu1 %v9030_v14 }
 0x6f9   : > { %8619 = vmatmul.mubr.msk.f32.gmra.mrb[68].mxu1 %vm1223_vm3, %v11844_v7  ;;  %v6206_v7 = vld [vmem:[#allocation2 + $0x230] sm:$0xff] }
 0x6fa   : > { %8621 = vmatprep.mubr.msk.f32.mxu1 %vm1223_vm3, %v11874_v38 }
 0x6fd   : > { %8622 = vmatmul.mubr.msk.f32.gmra.mrb[70].mxu1 %vm1223_vm3, %v11871_v49  ;;  %v9445_v49 = vld [vmem:[%s10146_s23] sm:$0xff] }
 0x6fe   : > { %8624 = vmatprep.mubr.msk.f32.mxu1 %vm1223_vm3, %v12112_v1 }
 0x701   : > { %8625 = vmatmul.mubr.msk.f32.gmra.mrb[72].mxu1 %vm1223_vm3, %v11931_v24  ;;  %v9446_v24 = vld [vmem:[%s10146_s23 + $0x18] sm:$0xff] }
 0x702   : > { %8627 = vmatprep.mubr.msk.f32.mxu1 %vm1223_vm3, %v11940_v16 }
 0x705   : > { %8628 = vmatmul.mubr.msk.f32.gmra.mrb[74].mxu1 %vm1223_vm3, %v11943_v61  ;;  %v9447_v61 = vld [vmem:[%s10146_s23 + $0x10] sm:$0xff] }
 0x706   : > { %8646 = vmatprep.mubr.msk.f32.mxu1 %vm1223_vm3, %v11743_v34  ;;  %v9042_v34 = vpack.c.bf16 %v6207_v27, %v6206_v7  ;;  %v9458_v7 = vld [vmem:[%s10146_s23 + $0x78] sm:$0xff] }
 0x709   : > { %8647 = vmatmul.mubr.msk.f32.vlgmr.msra.gmra.mrb[60].mxu1 %vm1223_vm3, %v11755_v3  ;;  %v12300_v3 = vld [vmem:[%s12553_s19] ss:$0 sm:$0xff]  ;;  %s9592_s19 = smov [#allocation5]  }
 0x70a   : > { %9033 = vmatpush3.bf16.msra.mxu1 %v9030_v14  ;;  %8649 = vmatprep.mubr.msk.f32.mxu1 %vm1223_vm3, %v11781_v44  ;;  %s9492_s26 = sshll.u32 %s9592_s19, 4  ;;  %s9493_s26 = int_to_ptr.vmem [resolvable:$false] %s9492_s26 }
 0x70b   : > { %9035 = vmatprep.subr.bf16.mxu1 %v9034_v4  ;;  %s9494_s17 = scalar_lea.vmem %s9493_s26, 4096  ;;  %p9495_p6 = scmp.lt.s32.totalorder %s12373_s1, %s9493_s26 }
 0x70c   : > { %p9496_p7 = scmp.lt.s32.totalorder %s9494_s17, %s9488_s0 }
 0x70d   : > { %8650 = vmatmul.mubr.msk.f32.gmra.mrb[62].mxu1 %vm1223_vm3, %v11792_v37 }
 0x70e   : > { %8652 = vmatprep.mubr.msk.f32.mxu1 %vm1223_vm3, %v11820_v33  ;;  %9037 = vmatpush3.bf16.msra.mxu1 %v9034_v4  ;;  %p9497_p9 = por %p9496_p7, %p9495_p6 }
 0x70f   : > { %9039 = vmatprep.subr.bf16.mxu1 %v9038_v20 }
 0x710   : > { %p9498_p11 = pnand %p9497_p9, %p9491_p5 }
 0x711   : > { %8653 = vmatmul.mubr.msk.f32.gmra.mrb[64].mxu1 %vm1223_vm3, %v11832_v15 }
 0x712   : > { %8655 = vmatprep.mubr.msk.f32.mxu1 %vm1223_vm3, %v11856_v10  ;;  %9041 = vmatpush3.bf16.msra.mxu1 %v9038_v20  ;;  %v9444_v10 = vld [vmem:[%s10146_s23 + $0x8] sm:$0xff] }
 0x713   : > { %9043 = vmatprep.subr.bf16.mxu1 %v9042_v34 }
 0x715   : > { %8656 = vmatmul.mubr.msk.f32.gmra.mrb[66].mxu1 %vm1223_vm3, %v11859_v25 }
 0x716   : > { %8658 = vmatprep.mubr.msk.f32.mxu1 %vm1223_vm3, %v11887_v52  ;;  %9045 = vmatpush3.bf16.msra.mxu1 %v9042_v34  ;;  %v9459_v34 = vld [vmem:[%s10146_s23 + $0x70] sm:$0xff] }
 0x719   : > { %8659 = vmatmul.mubr.msk.f32.gmra.mrb[68].mxu1 %vm1223_vm3, %v11895_v32 }
 0x71a   : > { %8661 = vmatprep.mubr.msk.f32.mxu1 %vm1223_vm3, %v11911_v13 }
 0x71d   : > { %8662 = vmatmul.mubr.msk.f32.gmra.mrb[70].mxu1 %vm1223_vm3, %v11914_v30 }
 0x71e   : > { %8664 = vmatprep.mubr.msk.f32.mxu1 %vm1223_vm3, %v12151_v46 }
 0x721   : > { %8665 = vmatmul.mubr.msk.f32.gmra.mrb[72].mxu1 %vm1223_vm3, %v12156_v43 }
 0x722   : > { %8667 = vmatprep.mubr.msk.f32.mxu1 %vm1223_vm3, %v11954_v62 }
 0x725   : > { %8668 = vmatmul.mubr.msk.f32.gmra.mrb[74].mxu1 %vm1223_vm3, %v11957_v47 }
 0x726   : > { %8686 = vmatprep.mubr.msk.f32.mxu1 %vm1223_vm3, %v12008_v45 }
 0x729   : > { %8687 = vmatmul.mubr.msk.f32.vlgmr.msra.gmra.mrb[60].mxu1 %vm1223_vm3, %v12016_v60  ;;  %v9448_v60 = vld [vmem:[%s10146_s23 + $0x28] sm:$0xff] }
 0x72a   : > { %8689 = vmatprep.mubr.msk.f32.mxu1 %vm1223_vm3, %v12021_v50 }
 0x72d   : > { %8690 = vmatmul.mubr.msk.f32.gmra.mrb[62].mxu1 %vm1223_vm3, %v12029_v48  ;;  %v9449_v48 = vld [vmem:[%s10146_s23 + $0x20] sm:$0xff] }
 0x72e   : > { %8692 = vmatprep.mubr.msk.f32.mxu1 %vm1223_vm3, %v12034_v59 }
 0x731   : > { %8693 = vmatmul.mubr.msk.f32.gmra.mrb[64].mxu1 %vm1223_vm3, %v12042_v36 }
 0x732   : > { %8695 = vmatprep.mubr.msk.f32.mxu1 %vm1223_vm3, %v12047_v58 }
 0x735   : > { %8696 = vmatmul.mubr.msk.f32.gmra.mrb[66].mxu1 %vm1223_vm3, %v12055_v8 }
 0x736   : > { %8698 = vmatprep.mubr.msk.f32.mxu1 %vm1223_vm3, %v12060_v9 }
 0x739   : > { %8699 = vmatmul.mubr.msk.f32.gmra.mrb[68].mxu1 %vm1223_vm3, %v12068_v17  ;;  %v9450_v17 = vld [vmem:[%s10146_s23 + $0x38] sm:$0xff] }
 0x73a   : > { %8701 = vmatprep.mubr.msk.f32.mxu1 %vm1223_vm3, %v12073_v5 }
 0x73d   : > { %8702 = vmatmul.mubr.msk.f32.gmra.mrb[70].mxu1 %vm1223_vm3, %v12078_v23  ;;  %v9451_v23 = vld [vmem:[%s10146_s23 + $0x30] sm:$0xff] }
 0x73e   : > { %8704 = vmatprep.mubr.msk.f32.mxu1 %vm1223_vm3, %v12191_v12 }
 0x741   : > { %8705 = vmatmul.mubr.msk.f32.gmra.mrb[72].mxu1 %vm1223_vm3, %v12196_v28 }
 0x742   : > { %8707 = vmatprep.mubr.msk.f32.mxu1 %vm1223_vm3, %v11960_v42 }
 0x745   : > { %8708 = vmatmul.mubr.msk.f32.gmra.mrb[74].mxu1 %vm1223_vm3, %v11963_v21 }
 0x7fc   : > { %v8688_v44 = vpop.f32.mrb[60].mxu1 }
 0x7fd   : > { %v6385_v37 = vadd.f32 %v8688_v44, %v12300_v3  ;;  %v6283_v33 = vpop.f32.mrb[61].mxu1 }
 0x7fe   : > { %v6384_v15 = vadd.f32 %v12300_v3, %v6283_v33 }
 0x7ff   : > { %v6401_v25 = vadd.f32 %v9444_v10, %v6385_v37 }
 0x800   : > { %v6400_v38 = vadd.f32 %v9445_v49, %v6384_v15  ;;  %v8691_v52 = vpop.f32.mrb[62].mxu1 }
 0x801   : > { %6417 = vst.msk [vmem:[%s12308_s29 + $0x8] sm:$0xff] %vm1223_vm3, %v6401_v25  ;;  %v6387_v32 = vadd.f32 %v8691_v52, %v12300_v3  ;;  %v6293_v13 = vpop.f32.mrb[63].mxu1 }
 0x802   : > { %6416 = vst.msk [vmem:[%s12308_s29] sm:$0xff] %vm1223_vm3, %v6400_v38  ;;  %v6386_v30 = vadd.f32 %v12300_v3, %v6293_v13 }
 0x803   : > { %v6403_v16 = vadd.f32 %v9446_v24, %v6387_v32 }
 0x804   : > { %v6402_v62 = vadd.f32 %v9447_v61, %v6386_v30  ;;  %v8694_v47 = vpop.f32.mrb[64].mxu1 }
 0x805   : > { %6419 = vst.msk [vmem:[%s12308_s29 + $0x18] sm:$0xff] %vm1223_vm3, %v6403_v16  ;;  %v6389_v42 = vadd.f32 %v8694_v47, %v12300_v3  ;;  %v6303_v21 = vpop.f32.mrb[65].mxu1 }
 0x806   : > { %6418 = vst.msk [vmem:[%s12308_s29 + $0x10] sm:$0xff] %vm1223_vm3, %v6402_v62  ;;  %v6388_v45 = vadd.f32 %v12300_v3, %v6303_v21 }
 0x807   : > { %v6405_v50 = vadd.f32 %v9448_v60, %v6389_v42 }
 0x808   : > { %v6404_v59 = vadd.f32 %v9449_v48, %v6388_v45  ;;  %v8697_v36 = vpop.f32.mrb[66].mxu1 }
 0x809   : > { %6421 = vst.msk [vmem:[%s12308_s29 + $0x28] sm:$0xff] %vm1223_vm3, %v6405_v50  ;;  %v6391_v58 = vadd.f32 %v8697_v36, %v12300_v3  ;;  %v6313_v8 = vpop.f32.mrb[67].mxu1 }
 0x80a   : > { %6420 = vst.msk [vmem:[%s12308_s29 + $0x20] sm:$0xff] %vm1223_vm3, %v6404_v59  ;;  %v6390_v9 = vadd.f32 %v12300_v3, %v6313_v8 }
 0x80b   : > { %v6407_v5 = vadd.f32 %v9450_v17, %v6391_v58 }
 0x80c   : > { %v6406_v1 = vadd.f32 %v9451_v23, %v6390_v9  ;;  %v8700_v46 = vpop.f32.mrb[68].mxu1 }
 0x80d   : > { %6423 = vst.msk [vmem:[%s12308_s29 + $0x38] sm:$0xff] %vm1223_vm3, %v6407_v5  ;;  %v6393_v43 = vadd.f32 %v8700_v46, %v12300_v3  ;;  %v6323_v41 = vpop.f32.mrb[69].mxu1 }
 0x80e   : > { %6422 = vst.msk [vmem:[%s12308_s29 + $0x30] sm:$0xff] %vm1223_vm3, %v6406_v1  ;;  %v6392_v18 = vadd.f32 %v12300_v3, %v6323_v41 }
 0x80f   : > { %v6409_v2 = vadd.f32 %v9452_v54, %v6393_v43 }
 0x810   : > { %v6408_v6 = vadd.f32 %v9453_v40, %v6392_v18  ;;  %v8703_v12 = vpop.f32.mrb[70].mxu1 }
 0x811   : > { %6425 = vst.msk [vmem:[%s12308_s29 + $0x48] sm:$0xff] %vm1223_vm3, %v6409_v2  ;;  %v6395_v28 = vadd.f32 %v8703_v12, %v12300_v3  ;;  %v6333_v31 = vpop.f32.mrb[71].mxu1 }
 0x812   : > { %6424 = vst.msk [vmem:[%s12308_s29 + $0x40] sm:$0xff] %vm1223_vm3, %v6408_v6  ;;  %v6394_v53 = vadd.f32 %v12300_v3, %v6333_v31 }
 0x813   : > { %v6411_v35 = vadd.f32 %v9454_v22, %v6395_v28 }
 0x814   : > { %v6410_v57 = vadd.f32 %v9455_v29, %v6394_v53  ;;  %v8706_v39 = vpop.f32.mrb[72].mxu1 }
 0x815   : > { %6427 = vst.msk [vmem:[%s12308_s29 + $0x58] sm:$0xff] %vm1223_vm3, %v6411_v35  ;;  %v6397_v51 = vadd.f32 %v8706_v39, %v12300_v3  ;;  %v6343_v56 = vpop.f32.mrb[73].mxu1 }
 0x816   : > { %6426 = vst.msk [vmem:[%s12308_s29 + $0x50] sm:$0xff] %vm1223_vm3, %v6410_v57  ;;  %v6396_v26 = vadd.f32 %v12300_v3, %v6343_v56 }
 0x817   : > { %v6413_v14 = vadd.f32 %v9456_v19, %v6397_v51 }
 0x818   : > { %v6412_v55 = vadd.f32 %v9457_v11, %v6396_v26  ;;  %v8709_v4 = vpop.f32.mrb[74].mxu1 }
 0x819   : > { %6429 = vst.msk [vmem:[%s12308_s29 + $0x68] sm:$0xff] %vm1223_vm3, %v6413_v14  ;;  %v6399_v63 = vadd.f32 %v8709_v4, %v12300_v3  ;;  %v6353_v0 = vpop.f32.mrb[75].mxu1 }
 0x81a   : > { %6428 = vst.msk [vmem:[%s12308_s29 + $0x60] sm:$0xff] %vm1223_vm3, %v6412_v55  ;;  %v6398_v20 = vadd.f32 %v12300_v3, %v6353_v0 }
 0x81b   : > { %v6415_v27 = vadd.f32 %v9458_v7, %v6399_v63 }
 0x81c   : > { %v6414_v44 = vadd.f32 %v9459_v34, %v6398_v20 }
 0x81d   : > { %6431 = vst.msk [vmem:[%s12308_s29 + $0x78] sm:$0xff] %vm1223_vm3, %v6415_v27 }
 0x81e   : > { %6430 = vst.msk [vmem:[%s12308_s29 + $0x70] sm:$0xff] %vm1223_vm3, %v6414_v44 }
 0x81f   : > { %9501 = shalt.err (!%p9498_p11)
}
 0x820   : > { %s9502_s23 = scalar_lea.hbm %s12371_s2, 2048  ;;  %s9506_s24 = scalar_lea.hbm %s12556_s21, 8192 }
 0x821   : > { %p9503_p13 = scmp.ne.s32.totalorder %s12371_s2, %s9502_s23  ;;  %p9507_p3 = scmp.lt.u32.totalorder %s12371_s2, %s12556_s21 }
 0x822   : > { %p9508_p8 = scmp.lt.u32.totalorder %s9506_s24, %s9502_s23  ;;  %p9510_p12 = scmp.lt.u32.totalorder %s9502_s23, %s12371_s2 }
 0x823   : > { %p9504_p1 = pnand %p9503_p13, %p12557_p0 }
 0x824   : > { %p9509_p10 = por %p9508_p8, %p9507_p3 }
 0x825   : > { %p9505_p4 = pneg %p9504_p1 }
 0x826   : > { %p9511_p2 = por %p9510_p12, %p9509_p10 }
 0x828   : > { %p9512_p5 = pnand %p9511_p2, %p9505_p4 }
 0x82a   : > { %9515 = shalt.err (!%p9512_p5)
}
 0x82b   : > { %s9593_s30 = smov 128   ;;  %s9594_s15 = smov 8  }
 0x82c   : > { %9342 = dma.vmem_to_hbm [thread:$0]  (%p12557_p0), %s12373_s1, 2048, %s12371_s2, %s12382_s27, %s9593_s30, %s9593_s30, %s9594_s15  }
 0x82d PF: > { %s12558_s16 = sld [smem:[#allocation13_spill]]  ;;  %s12559_s0 = sld [smem:[#allocation8_spill]] }
 0x82e   : > { %s12560_s19 = sld [smem:[#allocation17_spill]] }
 0x833   : > { %p9354_p6 = scmp.ge.s32.totalorder %s12558_s16, 2  ;;  %s6464_s26 = sand.u32 1, %s12559_s0  }
 0x834   : > { %p12561_p7 = scmp.ne.s32.totalorder %s12560_s19, 0  ;;  %s6465_s17 = scalar_lea.sflag [#allocation4], %s6464_s26 }
 0x836   : > { %p9349_p9 = pnand %p9354_p6, %p12561_p7 }
 0x838   : > { %9553 = dma.done.wait (!%p9349_p9), %s6465_s17, 2048  }
 0x839   : > { %9555 = vsyncadd (!%p9349_p9), %s6465_s17, 4294965248  ;;  %s32_s20 = sadd.s32 1, %s12558_s16   ;;  %s12562_s23 = sld [smem:[#allocation9_spill]] }
 0x83a   : > { %p29_p11 = scmp.ge.s32.totalorder %s32_s20, 6   ;;  %s12563_s29 = sld [smem:[#allocation18_spill]] }
 0x83b   : > { %s12564_s30 = sld [smem:[#allocation11_spill]]  ;;  %s12565_s0 = sld [smem:[#allocation12_spill]] }
 0x83c   : > { %s12566_s19 = sld [smem:[#allocation14_spill]]  ;;  %s12567_s1 = sld [smem:[#allocation16_spill]] }
 0x83d   : > { %s12568_s27 = smov %s9562_s28  ;;  %31 = sbr.rel (!%p29_p11) target bundleno = 14 (0xe), region = 163 }
 0x83f   : > { %s12569_s28 = smov %s12562_s23 }
 0x844   :  { %6470 = vsyncpa [#allocation3], 1 }
 0x845   :  { %6472 = vsyncpa [#allocation3 + $0x1], 1 }
 0x846   :  { %6473 = vsyncpa [#allocation4], 1 }
 0x847   :  { %6475 = vsyncpa [#allocation4 + $0x1], 1 }

</bundles_post_ra>
